<compile_context>
chip_gen: v7x
topology: tpu7x:2x2x1
jax: 0.10.0
libtpu: 0.0.40
codegen_flags: <defaults>
</compile_context>

<pallas_src>
import jax
import jax.numpy as jnp
from jax.experimental import pallas as pl
from jax.experimental.pallas import tpu as pltpu


# ----------------------------- in-kernel helpers ------------------------------
def _conv3x3(load_tap, w_ref, hout, wout, cout):
    """3x3 conv (stride 1) as 9 shifted-tap MXU matmuls, f32 accumulation.

    load_tap(ky, kx) -> (hout, wout, cin) bf16 value
    w_ref            -> (9, cin, cout) bf16 ref, leading dim ordered (ky, kx)
    returns (hout*wout, cout) f32
    """
    acc = jnp.zeros((hout * wout, cout), jnp.float32)
    for ky in range(3):
        for kx in range(3):
            tap = load_tap(ky, kx)
            cin = tap.shape[-1]
            acc = acc + jnp.dot(tap.reshape(hout * wout, cin),
                                w_ref[ky * 3 + kx],
                                preferred_element_type=jnp.float32)
    return acc


def _left_branch(x_ref, w1_ref, b1_ref, w2_ref, b2_ref, pad_ref, tr, w, cout):
    """conv1 -> BN1(bias)+ReLU -> pad -> conv2 -> BN2(bias). Returns (tr*w, cout) f32."""
    wp = w + 2
    t = pl.program_id(1)
    nt = pl.num_programs(1)

    # conv1 over TR+2 rows (1-row halo on each side of the output tile).
    acc1 = _conv3x3(lambda ky, kx: x_ref[0, ky:ky + tr + 2, kx:kx + w, :],
                    w1_ref, tr + 2, w, cout)
    h1 = jnp.maximum(acc1 + b1_ref[...], 0.0)     # BN1 bias + ReLU (scale in w1)

    # Fill the zero-padded conv2 scratch. Every cell is written this step, so
    # no cross-step scratch state is relied upon (megacore-safe).
    pad_ref[:, 1:w + 1, :] = h1.astype(pad_ref.dtype).reshape(tr + 2, w, cout)
    zc = jnp.zeros((tr + 2, 1, cout), pad_ref.dtype)
    pad_ref[:, 0:1, :] = zc                        # left  pad column
    pad_ref[:, w + 1:w + 2, :] = zc                # right pad column

    @pl.when(t == 0)                               # top image edge: halo row = conv2 zero pad
    def _():
        pad_ref[0:1, :, :] = jnp.zeros((1, wp, cout), pad_ref.dtype)

    @pl.when(t == nt - 1)                          # bottom image edge
    def _():
        pad_ref[tr + 1:tr + 2, :, :] = jnp.zeros((1, wp, cout), pad_ref.dtype)

    # conv2 over the TR output rows.
    acc2 = _conv3x3(lambda ky, kx: pad_ref[ky:ky + tr, kx:kx + w, :],
                    w2_ref, tr, w, cout)
    return acc2 + b2_ref[...]                      # BN2 bias (scale in w2)


def _resblock_proj_kernel(x_ref, w1_ref, b1_ref, w2_ref, b2_ref, ws_ref, bs_ref,
                          o_ref, pad_ref):
    """Projection-shortcut block (inchannel != outchannel)."""
    tr, w, cout = o_ref.shape[1], o_ref.shape[2], o_ref.shape[3]
    cin = x_ref.shape[-1]

    left = _left_branch(x_ref, w1_ref, b1_ref, w2_ref, b2_ref, pad_ref, tr, w, cout)

    # shortcut: 1x1 conv (BN scale folded into ws) + bias
    xs = x_ref[0, 2:tr + 2, 1:w + 1, :].reshape(tr * w, cin)
    sc = jnp.dot(xs, ws_ref[...], preferred_element_type=jnp.float32) + bs_ref[...]

    out = jnp.maximum(left + sc, 0.0)
    o_ref[0] = out.reshape(tr, w, cout).astype(o_ref.dtype)


def _resblock_id_kernel(x_ref, w1_ref, b1_ref, w2_ref, b2_ref, o_ref, pad_ref):
    """Identity-shortcut block (inchannel == outchannel, stride 1)."""
    tr, w, cout = o_ref.shape[1], o_ref.shape[2], o_ref.shape[3]

    left = _left_branch(x_ref, w1_ref, b1_ref, w2_ref, b2_ref, pad_ref, tr, w, cout)

    sc = x_ref[0, 2:tr + 2, 1:w + 1, :].reshape(tr * w, cout).astype(jnp.float32)
    out = jnp.maximum(left + sc, 0.0)
    o_ref[0] = out.reshape(tr, w, cout).astype(o_ref.dtype)


# --------------------------------- wrapper ------------------------------------
def _fold_bn(gamma, beta, mean, var, eps=1e-5):
    scale = gamma / jnp.sqrt(var + eps)
    bias = beta - mean * scale
    return scale.reshape(1, -1), bias.reshape(1, -1)


def _pick_tile_rows(h, target=8):
    for tr in range(min(h, target), 0, -1):
        if h % tr == 0:
            return tr
    return h


def residual_block(x_nchw, p, stride=1):
    """Fused residual block. x_nchw: (N, Cin, H, W) f32 -> (N, Cout, H, W) f32."""
    assert stride == 1  # TODO(synk): stride-2 down-sampling blocks not implemented
    N, Cin, H, W = x_nchw.shape
    Cout = p["w1"].shape[-1]
    TR = _pick_tile_rows(H)
    n_tiles = H // TR
    Wp = W + 2

    # NHWC; pad 2 rows / 1 col so every row tile carries its halo.
    x = jnp.transpose(x_nchw, (0, 2, 3, 1)).astype(jnp.float32)
    xpad = jnp.pad(x, ((0, 0), (2, 2), (1, 1), (0, 0)))
    x_tiles = jnp.stack([xpad[:, t * TR:t * TR + TR + 4] for t in range(n_tiles)],
                        axis=1)                                # (N, T, TR+4, Wp, Cin)
    x_tiles = x_tiles.reshape(N * n_tiles, TR + 4, Wp, Cin).astype(jnp.bfloat16)

    # Fold BN scale into the conv weights; only the bias stays in the kernel.
    s1, b1 = _fold_bn(p["g1"], p["b1"], p["m1"], p["v1"])
    s2, b2 = _fold_bn(p["g2"], p["b2"], p["m2"], p["v2"])
    w1 = (p["w1"].reshape(9, Cin, Cout) * s1).astype(jnp.bfloat16)   # (9, Cin, Cout)
    w2 = (p["w2"].reshape(9, Cout, Cout) * s2).astype(jnp.bfloat16)  # (9, Cout, Cout)

    projection = "ws" in p
    if projection:
        ss, bs = _fold_bn(p["gs"], p["bs"], p["ms"], p["vs"])
        ws = (p["ws"] * ss).astype(jnp.bfloat16)                     # (Cin, Cout)
    else:
        assert Cin == Cout, "identity shortcut requires inchannel == outchannel"

    vec_spec = pl.BlockSpec((1, Cout), lambda n, t: (0, 0))
    in_specs = [
        pl.BlockSpec((1, TR + 4, Wp, Cin), lambda n, t: (n * n_tiles + t, 0, 0, 0)),
        pl.BlockSpec((9, Cin, Cout), lambda n, t: (0, 0, 0)),
        vec_spec,
        pl.BlockSpec((9, Cout, Cout), lambda n, t: (0, 0, 0)),
        vec_spec,
    ]
    args = [x_tiles, w1, b1, w2, b2]
    if projection:
        in_specs += [pl.BlockSpec((Cin, Cout), lambda n, t: (0, 0)), vec_spec]
        args += [ws, bs]
        kernel = _resblock_proj_kernel
    else:
        kernel = _resblock_id_kernel

    # VMEM budget estimate (double-buffered I/O + scratch + accumulators), with
    # ~2x headroom, capped so it is valid on v7x (64 MiB physical per TC).
    est = (2 * (TR + 4) * Wp * Cin * 2           # input slabs (bf16, 2 bufs)
           + 2 * TR * W * Cout * 4               # output tiles (f32, 2 bufs)
           + 2 * (9 * Cin + 9 * Cout + Cin + 4) * Cout * 4   # weights + biases
           + (TR + 2) * Wp * Cout * 2            # conv2 pad scratch (bf16)
           + 4 * (TR + 2) * W * Cout * 4)        # live f32 accumulators
    vmem_limit = int(min(max(2 * est, 16 * 2 ** 20), 64 * 2 ** 20))

    out_nhwc = pl.pallas_call(
        kernel,
        out_shape=jax.ShapeDtypeStruct((N, H, W, Cout), jnp.float32),
        grid_spec=pltpu.PrefetchScalarGridSpec(
            num_scalar_prefetch=0,
            grid=(N, n_tiles),
            in_specs=in_specs,
            out_specs=pl.BlockSpec((1, TR, W, Cout), lambda n, t: (n, t, 0, 0)),
            scratch_shapes=[pltpu.VMEM((TR + 2, Wp, Cout), jnp.bfloat16)],
        ),
        compiler_params=pltpu.CompilerParams(
            dimension_semantics=("parallel", "parallel"),
            vmem_limit_bytes=vmem_limit),
    )(*args)

    return jnp.transpose(out_nhwc, (0, 3, 1, 2))  # back to NCHW


# ----------------------------- pure-JAX reference -----------------------------
def _reference(x_nchw, p):
    x = jnp.transpose(x_nchw, (0, 2, 3, 1)).astype(jnp.float32)

    def conv(x, w, pad):
        return jax.lax.conv_general_dilated(
            x, w, window_strides=(1, 1), padding=[(pad, pad), (pad, pad)],
            dimension_numbers=("NHWC", "HWIO", "NHWC"))

    def bn(x, g, b, m, v, eps=1e-5):
        return (x - m) / jnp.sqrt(v + eps) * g + b

    h = jax.nn.relu(bn(conv(x, p["w1"], 1), p["g1"], p["b1"], p["m1"], p["v1"]))
    left = bn(conv(h, p["w2"], 1), p["g2"], p["b2"], p["m2"], p["v2"])
    if "ws" in p:
        ws = p["ws"].reshape(1, 1, *p["ws"].shape)
        short = bn(conv(x, ws, 0), p["gs"], p["bs"], p["ms"], p["vs"])
    else:
        short = x
    out = jax.nn.relu(left + short)
    return jnp.transpose(out, (0, 3, 1, 2))


# ----------------------------------- test --------------------------------------
if __name__ == "__main__":
    key = jax.random.PRNGKey(0)

    def bn_params(k, C):
        k0, k1, k2, k3 = jax.random.split(k, 4)
        return dict(
            g=1.0 + 0.1 * jax.random.normal(k0, (C,), jnp.float32),
            b=0.1 * jax.random.normal(k1, (C,), jnp.float32),
            m=0.1 * jax.random.normal(k2, (C,), jnp.float32),
            v=1.0 + 0.5 * jax.random.uniform(k3, (C,), jnp.float32),
        )

    def make_params(k, Cin, Cout, projection):
        ks = jax.random.split(k, 6)
        p = {"w1": 0.1 * jax.random.normal(ks[0], (3, 3, Cin, Cout), jnp.float32),
             "w2": 0.1 * jax.random.normal(ks[1], (3, 3, Cout, Cout), jnp.float32)}
        bn1, bn2 = bn_params(ks[2], Cout), bn_params(ks[3], Cout)
        p.update({"g1": bn1["g"], "b1": bn1["b"], "m1": bn1["m"], "v1": bn1["v"],
                  "g2": bn2["g"], "b2": bn2["b"], "m2": bn2["m"], "v2": bn2["v"]})
        if projection:
            bns = bn_params(ks[4], Cout)
            p["ws"] = 0.1 * jax.random.normal(ks[5], (Cin, Cout), jnp.float32)
            p.update({"gs": bns["g"], "bs": bns["b"], "ms": bns["m"], "vs": bns["v"]})
        return p

    N, H, W = 2, 16, 16
    k1, k2, k3, k4 = jax.random.split(key, 4)

    # case 1: projection shortcut (inchannel != outchannel)
    x1 = jax.random.normal(k1, (N, 4, H, W), jnp.float32)
    p1 = make_params(k2, 4, 8, projection=True)
    out1 = jax.block_until_ready(residual_block(x1, p1, stride=1))
    ref1 = jax.block_until_ready(_reference(x1, p1))
    assert out1.shape == (N, 8, H, W), out1.shape
    err1 = float(jnp.max(jnp.abs(out1 - ref1)))
    assert err1 < 5e-2, f"projection max abs err {err1}"

    # case 2: identity shortcut (inchannel == outchannel)
    x2 = jax.random.normal(k3, (N, 8, H, W), jnp.float32)
    p2 = make_params(k4, 8, 8, projection=False)
    out2 = jax.block_until_ready(residual_block(x2, p2, stride=1))
    ref2 = jax.block_until_ready(_reference(x2, p2))
    assert out2.shape == (N, 8, H, W), out2.shape
    err2 = float(jnp.max(jnp.abs(out2 - ref2)))
    assert err2 < 5e-2, f"identity max abs err {err2}"

    print("KERNEL_OK")
</pallas_src>

<mosaic_0001>
module attributes {stable_mosaic.version = 11 : i64} {
  func.func @_resblock_proj_kernel(%arg0: i32, %arg1: i32, %arg2: memref<1x12x18x4xbf16, #tpu.memory_space<vmem>>, %arg3: memref<9x4x8xbf16, #tpu.memory_space<vmem>>, %arg4: memref<1x8xf32, #tpu.memory_space<vmem>>, %arg5: memref<9x8x8xbf16, #tpu.memory_space<vmem>>, %arg6: memref<1x8xf32, #tpu.memory_space<vmem>>, %arg7: memref<4x8xbf16, #tpu.memory_space<vmem>>, %arg8: memref<1x8xf32, #tpu.memory_space<vmem>>, %arg9: memref<1x8x16x8xf32, #tpu.memory_space<vmem>>, %arg10: memref<10x18x8xbf16, #tpu.memory_space<vmem>>) attributes {dimension_semantics = [#tpu.dimension_semantics<parallel>, #tpu.dimension_semantics<parallel>], iteration_bounds = array<i64: 2, 2>, scalar_prefetch = 0 : i64, scratch_operands = 1 : i64, tpu.core_type = #tpu.core_type<tc>, window_params = [{transform_indices = @transform_0, window_bounds = array<i64: 1, 12, 18, 4>}, {pipeline_mode = #tpu.pipeline_mode<synchronous>, transform_indices = @transform_1, window_bounds = array<i64: 9, 4, 8>}, {pipeline_mode = #tpu.pipeline_mode<synchronous>, transform_indices = @transform_2, window_bounds = array<i64: 1, 8>}, {pipeline_mode = #tpu.pipeline_mode<synchronous>, transform_indices = @transform_3, window_bounds = array<i64: 9, 8, 8>}, {pipeline_mode = #tpu.pipeline_mode<synchronous>, transform_indices = @transform_4, window_bounds = array<i64: 1, 8>}, {pipeline_mode = #tpu.pipeline_mode<synchronous>, transform_indices = @transform_5, window_bounds = array<i64: 4, 8>}, {pipeline_mode = #tpu.pipeline_mode<synchronous>, transform_indices = @transform_6, window_bounds = array<i64: 1, 8>}, {transform_indices = @transform_7, window_bounds = array<i64: 1, 8, 16, 8>}]} {
    %cst = arith.constant 0.000000e+00 : f32
    %0 = vector.broadcast %cst : f32 to vector<160x8xf32>
    %c0 = arith.constant 0 : index
    %c0_0 = arith.constant 0 : index
    %c0_1 = arith.constant 0 : index
    %c0_2 = arith.constant 0 : index
    %1 = vector.load %arg2[%c0, %c0_0, %c0_1, %c0_2] : memref<1x12x18x4xbf16, #tpu.memory_space<vmem>>, vector<1x10x16x4xbf16>
    %2 = vector.shape_cast %1 : vector<1x10x16x4xbf16> to vector<10x16x4xbf16>
    %3 = vector.shape_cast %2 : vector<10x16x4xbf16> to vector<160x4xbf16>
    %c0_3 = arith.constant 0 : index
    %c0_4 = arith.constant 0 : index
    %c0_5 = arith.constant 0 : index
    %4 = vector.load %arg3[%c0_3, %c0_4, %c0_5] : memref<9x4x8xbf16, #tpu.memory_space<vmem>>, vector<1x4x8xbf16>
    %5 = vector.shape_cast %4 : vector<1x4x8xbf16> to vector<4x8xbf16>
    %cst_6 = arith.constant dense<0.000000e+00> : vector<160x8xf32>
    %6 = tpu.matmul %3, %5, %cst_6 {dimension_numbers = #tpu.dot_dimension_numbers<[1], [0], [0], [1], [0, 0, 1, 1], [], []>} : vector<160x4xbf16>, vector<4x8xbf16>, vector<160x8xf32> -> vector<160x8xf32>
    %7 = arith.addf %0, %6 : vector<160x8xf32>
    %c0_7 = arith.constant 0 : index
    %c0_8 = arith.constant 0 : index
    %c1 = arith.constant 1 : index
    %c0_9 = arith.constant 0 : index
    %8 = vector.load %arg2[%c0_7, %c0_8, %c1, %c0_9] : memref<1x12x18x4xbf16, #tpu.memory_space<vmem>>, vector<1x10x16x4xbf16>
    %9 = vector.shape_cast %8 : vector<1x10x16x4xbf16> to vector<10x16x4xbf16>
    %10 = vector.shape_cast %9 : vector<10x16x4xbf16> to vector<160x4xbf16>
    %c1_10 = arith.constant 1 : index
    %c0_11 = arith.constant 0 : index
    %c0_12 = arith.constant 0 : index
    %11 = vector.load %arg3[%c1_10, %c0_11, %c0_12] : memref<9x4x8xbf16, #tpu.memory_space<vmem>>, vector<1x4x8xbf16>
    %12 = vector.shape_cast %11 : vector<1x4x8xbf16> to vector<4x8xbf16>
    %cst_13 = arith.constant dense<0.000000e+00> : vector<160x8xf32>
    %13 = tpu.matmul %10, %12, %cst_13 {dimension_numbers = #tpu.dot_dimension_numbers<[1], [0], [0], [1], [0, 0, 1, 1], [], []>} : vector<160x4xbf16>, vector<4x8xbf16>, vector<160x8xf32> -> vector<160x8xf32>
    %14 = arith.addf %7, %13 : vector<160x8xf32>
    %c0_14 = arith.constant 0 : index
    %c0_15 = arith.constant 0 : index
    %c2 = arith.constant 2 : index
    %c0_16 = arith.constant 0 : index
    %15 = vector.load %arg2[%c0_14, %c0_15, %c2, %c0_16] : memref<1x12x18x4xbf16, #tpu.memory_space<vmem>>, vector<1x10x16x4xbf16>
    %16 = vector.shape_cast %15 : vector<1x10x16x4xbf16> to vector<10x16x4xbf16>
    %17 = vector.shape_cast %16 : vector<10x16x4xbf16> to vector<160x4xbf16>
    %c2_17 = arith.constant 2 : index
    %c0_18 = arith.constant 0 : index
    %c0_19 = arith.constant 0 : index
    %18 = vector.load %arg3[%c2_17, %c0_18, %c0_19] : memref<9x4x8xbf16, #tpu.memory_space<vmem>>, vector<1x4x8xbf16>
    %19 = vector.shape_cast %18 : vector<1x4x8xbf16> to vector<4x8xbf16>
    %cst_20 = arith.constant dense<0.000000e+00> : vector<160x8xf32>
    %20 = tpu.matmul %17, %19, %cst_20 {dimension_numbers = #tpu.dot_dimension_numbers<[1], [0], [0], [1], [0, 0, 1, 1], [], []>} : vector<160x4xbf16>, vector<4x8xbf16>, vector<160x8xf32> -> vector<160x8xf32>
    %21 = arith.addf %14, %20 : vector<160x8xf32>
    %c0_21 = arith.constant 0 : index
    %c1_22 = arith.constant 1 : index
    %c0_23 = arith.constant 0 : index
    %c0_24 = arith.constant 0 : index
    %22 = vector.load %arg2[%c0_21, %c1_22, %c0_23, %c0_24] : memref<1x12x18x4xbf16, #tpu.memory_space<vmem>>, vector<1x10x16x4xbf16>
    %23 = vector.shape_cast %22 : vector<1x10x16x4xbf16> to vector<10x16x4xbf16>
    %24 = vector.shape_cast %23 : vector<10x16x4xbf16> to vector<160x4xbf16>
    %c3 = arith.constant 3 : index
    %c0_25 = arith.constant 0 : index
    %c0_26 = arith.constant 0 : index
    %25 = vector.load %arg3[%c3, %c0_25, %c0_26] : memref<9x4x8xbf16, #tpu.memory_space<vmem>>, vector<1x4x8xbf16>
    %26 = vector.shape_cast %25 : vector<1x4x8xbf16> to vector<4x8xbf16>
    %cst_27 = arith.constant dense<0.000000e+00> : vector<160x8xf32>
    %27 = tpu.matmul %24, %26, %cst_27 {dimension_numbers = #tpu.dot_dimension_numbers<[1], [0], [0], [1], [0, 0, 1, 1], [], []>} : vector<160x4xbf16>, vector<4x8xbf16>, vector<160x8xf32> -> vector<160x8xf32>
    %28 = arith.addf %21, %27 : vector<160x8xf32>
    %c0_28 = arith.constant 0 : index
    %c1_29 = arith.constant 1 : index
    %c1_30 = arith.constant 1 : index
    %c0_31 = arith.constant 0 : index
    %29 = vector.load %arg2[%c0_28, %c1_29, %c1_30, %c0_31] : memref<1x12x18x4xbf16, #tpu.memory_space<vmem>>, vector<1x10x16x4xbf16>
    %30 = vector.shape_cast %29 : vector<1x10x16x4xbf16> to vector<10x16x4xbf16>
    %31 = vector.shape_cast %30 : vector<10x16x4xbf16> to vector<160x4xbf16>
    %c4 = arith.constant 4 : index
    %c0_32 = arith.constant 0 : index
    %c0_33 = arith.constant 0 : index
    %32 = vector.load %arg3[%c4, %c0_32, %c0_33] : memref<9x4x8xbf16, #tpu.memory_space<vmem>>, vector<1x4x8xbf16>
    %33 = vector.shape_cast %32 : vector<1x4x8xbf16> to vector<4x8xbf16>
    %cst_34 = arith.constant dense<0.000000e+00> : vector<160x8xf32>
    %34 = tpu.matmul %31, %33, %cst_34 {dimension_numbers = #tpu.dot_dimension_numbers<[1], [0], [0], [1], [0, 0, 1, 1], [], []>} : vector<160x4xbf16>, vector<4x8xbf16>, vector<160x8xf32> -> vector<160x8xf32>
    %35 = arith.addf %28, %34 : vector<160x8xf32>
    %c0_35 = arith.constant 0 : index
    %c1_36 = arith.constant 1 : index
    %c2_37 = arith.constant 2 : index
    %c0_38 = arith.constant 0 : index
    %36 = vector.load %arg2[%c0_35, %c1_36, %c2_37, %c0_38] : memref<1x12x18x4xbf16, #tpu.memory_space<vmem>>, vector<1x10x16x4xbf16>
    %37 = vector.shape_cast %36 : vector<1x10x16x4xbf16> to vector<10x16x4xbf16>
    %38 = vector.shape_cast %37 : vector<10x16x4xbf16> to vector<160x4xbf16>
    %c5 = arith.constant 5 : index
    %c0_39 = arith.constant 0 : index
    %c0_40 = arith.constant 0 : index
    %39 = vector.load %arg3[%c5, %c0_39, %c0_40] : memref<9x4x8xbf16, #tpu.memory_space<vmem>>, vector<1x4x8xbf16>
    %40 = vector.shape_cast %39 : vector<1x4x8xbf16> to vector<4x8xbf16>
    %cst_41 = arith.constant dense<0.000000e+00> : vector<160x8xf32>
    %41 = tpu.matmul %38, %40, %cst_41 {dimension_numbers = #tpu.dot_dimension_numbers<[1], [0], [0], [1], [0, 0, 1, 1], [], []>} : vector<160x4xbf16>, vector<4x8xbf16>, vector<160x8xf32> -> vector<160x8xf32>
    %42 = arith.addf %35, %41 : vector<160x8xf32>
    %c0_42 = arith.constant 0 : index
    %c2_43 = arith.constant 2 : index
    %c0_44 = arith.constant 0 : index
    %c0_45 = arith.constant 0 : index
    %43 = vector.load %arg2[%c0_42, %c2_43, %c0_44, %c0_45] : memref<1x12x18x4xbf16, #tpu.memory_space<vmem>>, vector<1x10x16x4xbf16>
    %44 = vector.shape_cast %43 : vector<1x10x16x4xbf16> to vector<10x16x4xbf16>
    %45 = vector.shape_cast %44 : vector<10x16x4xbf16> to vector<160x4xbf16>
    %c6 = arith.constant 6 : index
    %c0_46 = arith.constant 0 : index
    %c0_47 = arith.constant 0 : index
    %46 = vector.load %arg3[%c6, %c0_46, %c0_47] : memref<9x4x8xbf16, #tpu.memory_space<vmem>>, vector<1x4x8xbf16>
    %47 = vector.shape_cast %46 : vector<1x4x8xbf16> to vector<4x8xbf16>
    %cst_48 = arith.constant dense<0.000000e+00> : vector<160x8xf32>
    %48 = tpu.matmul %45, %47, %cst_48 {dimension_numbers = #tpu.dot_dimension_numbers<[1], [0], [0], [1], [0, 0, 1, 1], [], []>} : vector<160x4xbf16>, vector<4x8xbf16>, vector<160x8xf32> -> vector<160x8xf32>
    %49 = arith.addf %42, %48 : vector<160x8xf32>
    %c0_49 = arith.constant 0 : index
    %c2_50 = arith.constant 2 : index
    %c1_51 = arith.constant 1 : index
    %c0_52 = arith.constant 0 : index
    %50 = vector.load %arg2[%c0_49, %c2_50, %c1_51, %c0_52] : memref<1x12x18x4xbf16, #tpu.memory_space<vmem>>, vector<1x10x16x4xbf16>
    %51 = vector.shape_cast %50 : vector<1x10x16x4xbf16> to vector<10x16x4xbf16>
    %52 = vector.shape_cast %51 : vector<10x16x4xbf16> to vector<160x4xbf16>
    %c7 = arith.constant 7 : index
    %c0_53 = arith.constant 0 : index
    %c0_54 = arith.constant 0 : index
    %53 = vector.load %arg3[%c7, %c0_53, %c0_54] : memref<9x4x8xbf16, #tpu.memory_space<vmem>>, vector<1x4x8xbf16>
    %54 = vector.shape_cast %53 : vector<1x4x8xbf16> to vector<4x8xbf16>
    %cst_55 = arith.constant dense<0.000000e+00> : vector<160x8xf32>
    %55 = tpu.matmul %52, %54, %cst_55 {dimension_numbers = #tpu.dot_dimension_numbers<[1], [0], [0], [1], [0, 0, 1, 1], [], []>} : vector<160x4xbf16>, vector<4x8xbf16>, vector<160x8xf32> -> vector<160x8xf32>
    %56 = arith.addf %49, %55 : vector<160x8xf32>
    %c0_56 = arith.constant 0 : index
    %c2_57 = arith.constant 2 : index
    %c2_58 = arith.constant 2 : index
    %c0_59 = arith.constant 0 : index
    %57 = vector.load %arg2[%c0_56, %c2_57, %c2_58, %c0_59] : memref<1x12x18x4xbf16, #tpu.memory_space<vmem>>, vector<1x10x16x4xbf16>
    %58 = vector.shape_cast %57 : vector<1x10x16x4xbf16> to vector<10x16x4xbf16>
    %59 = vector.shape_cast %58 : vector<10x16x4xbf16> to vector<160x4xbf16>
    %c8 = arith.constant 8 : index
    %c0_60 = arith.constant 0 : index
    %c0_61 = arith.constant 0 : index
    %60 = vector.load %arg3[%c8, %c0_60, %c0_61] : memref<9x4x8xbf16, #tpu.memory_space<vmem>>, vector<1x4x8xbf16>
    %61 = vector.shape_cast %60 : vector<1x4x8xbf16> to vector<4x8xbf16>
    %cst_62 = arith.constant dense<0.000000e+00> : vector<160x8xf32>
    %62 = tpu.matmul %59, %61, %cst_62 {dimension_numbers = #tpu.dot_dimension_numbers<[1], [0], [0], [1], [0, 0, 1, 1], [], []>} : vector<160x4xbf16>, vector<4x8xbf16>, vector<160x8xf32> -> vector<160x8xf32>
    %63 = arith.addf %56, %62 : vector<160x8xf32>
    %c0_63 = arith.constant 0 : index
    %c0_64 = arith.constant 0 : index
    %64 = vector.load %arg4[%c0_63, %c0_64] : memref<1x8xf32, #tpu.memory_space<vmem>>, vector<1x8xf32>
    %65 = vector.broadcast %64 : vector<1x8xf32> to vector<160x8xf32>
    %66 = arith.addf %63, %65 : vector<160x8xf32>
    %cst_65 = arith.constant 0.000000e+00 : f32
    %67 = vector.broadcast %cst_65 : f32 to vector<160x8xf32>
    %68 = arith.maximumf %66, %67 : vector<160x8xf32>
    %69 = arith.truncf %68 : vector<160x8xf32> to vector<160x8xbf16>
    %70 = vector.shape_cast %69 : vector<160x8xbf16> to vector<10x16x8xbf16>
    %c0_66 = arith.constant 0 : index
    %c1_67 = arith.constant 1 : index
    %c0_68 = arith.constant 0 : index
    %71 = vector.load %arg10[%c0_66, %c1_67, %c0_68] : memref<10x18x8xbf16, #tpu.memory_space<vmem>>, vector<10x16x8xbf16>
    tpu.vector_store %arg10[%c0_66, %c1_67, %c0_68], %70 {strides = array<i32>} : memref<10x18x8xbf16, #tpu.memory_space<vmem>>, vector<10x16x8xbf16>,
    %cst_69 = arith.constant 0.000000e+00 : bf16
    %72 = vector.broadcast %cst_69 : bf16 to vector<10x1x8xbf16>
    %c0_70 = arith.constant 0 : index
    %c0_71 = arith.constant 0 : index
    %c0_72 = arith.constant 0 : index
    %73 = vector.load %arg10[%c0_70, %c0_71, %c0_72] : memref<10x18x8xbf16, #tpu.memory_space<vmem>>, vector<10x1x8xbf16>
    tpu.vector_store %arg10[%c0_70, %c0_71, %c0_72], %72 {strides = array<i32>} : memref<10x18x8xbf16, #tpu.memory_space<vmem>>, vector<10x1x8xbf16>,
    %c0_73 = arith.constant 0 : index
    %c17 = arith.constant 17 : index
    %c0_74 = arith.constant 0 : index
    %74 = vector.load %arg10[%c0_73, %c17, %c0_74] : memref<10x18x8xbf16, #tpu.memory_space<vmem>>, vector<10x1x8xbf16>
    tpu.vector_store %arg10[%c0_73, %c17, %c0_74], %72 {strides = array<i32>} : memref<10x18x8xbf16, #tpu.memory_space<vmem>>, vector<10x1x8xbf16>,
    %c0_i32 = arith.constant 0 : i32
    %75 = arith.cmpi eq, %arg1, %c0_i32 : i32
    %76 = arith.extui %75 : i1 to i32
    %c0_i32_75 = arith.constant 0 : i32
    %77 = arith.cmpi ne, %76, %c0_i32_75 : i32
    scf.if %77 {
      %cst_157 = arith.constant 0.000000e+00 : bf16
      %154 = vector.broadcast %cst_157 : bf16 to vector<1x18x8xbf16>
      %c0_158 = arith.constant 0 : index
      %c0_159 = arith.constant 0 : index
      %c0_160 = arith.constant 0 : index
      %155 = vector.load %arg10[%c0_158, %c0_159, %c0_160] : memref<10x18x8xbf16, #tpu.memory_space<vmem>>, vector<1x18x8xbf16>
      tpu.vector_store %arg10[%c0_158, %c0_159, %c0_160], %154 {strides = array<i32>} : memref<10x18x8xbf16, #tpu.memory_space<vmem>>, vector<1x18x8xbf16>,
    } else {
    }
    %c1_i32 = arith.constant 1 : i32
    %78 = arith.cmpi eq, %arg1, %c1_i32 : i32
    %79 = arith.extui %78 : i1 to i32
    %c0_i32_76 = arith.constant 0 : i32
    %80 = arith.cmpi ne, %79, %c0_i32_76 : i32
    scf.if %80 {
      %cst_157 = arith.constant 0.000000e+00 : bf16
      %154 = vector.broadcast %cst_157 : bf16 to vector<1x18x8xbf16>
      %c9 = arith.constant 9 : index
      %c0_158 = arith.constant 0 : index
      %c0_159 = arith.constant 0 : index
      %155 = vector.load %arg10[%c9, %c0_158, %c0_159] : memref<10x18x8xbf16, #tpu.memory_space<vmem>>, vector<1x18x8xbf16>
      tpu.vector_store %arg10[%c9, %c0_158, %c0_159], %154 {strides = array<i32>} : memref<10x18x8xbf16, #tpu.memory_space<vmem>>, vector<1x18x8xbf16>,
    } else {
    }
    %cst_77 = arith.constant 0.000000e+00 : f32
    %81 = vector.broadcast %cst_77 : f32 to vector<128x8xf32>
    %c0_78 = arith.constant 0 : index
    %c0_79 = arith.constant 0 : index
    %c0_80 = arith.constant 0 : index
    %82 = vector.load %arg10[%c0_78, %c0_79, %c0_80] : memref<10x18x8xbf16, #tpu.memory_space<vmem>>, vector<8x16x8xbf16>
    %83 = vector.shape_cast %82 : vector<8x16x8xbf16> to vector<128x8xbf16>
    %c0_81 = arith.constant 0 : index
    %c0_82 = arith.constant 0 : index
    %c0_83 = arith.constant 0 : index
    %84 = vector.load %arg5[%c0_81, %c0_82, %c0_83] : memref<9x8x8xbf16, #tpu.memory_space<vmem>>, vector<1x8x8xbf16>
    %85 = vector.shape_cast %84 : vector<1x8x8xbf16> to vector<8x8xbf16>
    %cst_84 = arith.constant dense<0.000000e+00> : vector<128x8xf32>
    %86 = tpu.matmul %83, %85, %cst_84 {dimension_numbers = #tpu.dot_dimension_numbers<[1], [0], [0], [1], [0, 0, 1, 1], [], []>} : vector<128x8xbf16>, vector<8x8xbf16>, vector<128x8xf32> -> vector<128x8xf32>
    %87 = arith.addf %81, %86 : vector<128x8xf32>
    %c0_85 = arith.constant 0 : index
    %c1_86 = arith.constant 1 : index
    %c0_87 = arith.constant 0 : index
    %88 = vector.load %arg10[%c0_85, %c1_86, %c0_87] : memref<10x18x8xbf16, #tpu.memory_space<vmem>>, vector<8x16x8xbf16>
    %89 = vector.shape_cast %88 : vector<8x16x8xbf16> to vector<128x8xbf16>
    %c1_88 = arith.constant 1 : index
    %c0_89 = arith.constant 0 : index
    %c0_90 = arith.constant 0 : index
    %90 = vector.load %arg5[%c1_88, %c0_89, %c0_90] : memref<9x8x8xbf16, #tpu.memory_space<vmem>>, vector<1x8x8xbf16>
    %91 = vector.shape_cast %90 : vector<1x8x8xbf16> to vector<8x8xbf16>
    %cst_91 = arith.constant dense<0.000000e+00> : vector<128x8xf32>
    %92 = tpu.matmul %89, %91, %cst_91 {dimension_numbers = #tpu.dot_dimension_numbers<[1], [0], [0], [1], [0, 0, 1, 1], [], []>} : vector<128x8xbf16>, vector<8x8xbf16>, vector<128x8xf32> -> vector<128x8xf32>
    %93 = arith.addf %87, %92 : vector<128x8xf32>
    %c0_92 = arith.constant 0 : index
    %c2_93 = arith.constant 2 : index
    %c0_94 = arith.constant 0 : index
    %94 = vector.load %arg10[%c0_92, %c2_93, %c0_94] : memref<10x18x8xbf16, #tpu.memory_space<vmem>>, vector<8x16x8xbf16>
    %95 = vector.shape_cast %94 : vector<8x16x8xbf16> to vector<128x8xbf16>
    %c2_95 = arith.constant 2 : index
    %c0_96 = arith.constant 0 : index
    %c0_97 = arith.constant 0 : index
    %96 = vector.load %arg5[%c2_95, %c0_96, %c0_97] : memref<9x8x8xbf16, #tpu.memory_space<vmem>>, vector<1x8x8xbf16>
    %97 = vector.shape_cast %96 : vector<1x8x8xbf16> to vector<8x8xbf16>
    %cst_98 = arith.constant dense<0.000000e+00> : vector<128x8xf32>
    %98 = tpu.matmul %95, %97, %cst_98 {dimension_numbers = #tpu.dot_dimension_numbers<[1], [0], [0], [1], [0, 0, 1, 1], [], []>} : vector<128x8xbf16>, vector<8x8xbf16>, vector<128x8xf32> -> vector<128x8xf32>
    %99 = arith.addf %93, %98 : vector<128x8xf32>
    %c1_99 = arith.constant 1 : index
    %c0_100 = arith.constant 0 : index
    %c0_101 = arith.constant 0 : index
    %100 = vector.load %arg10[%c1_99, %c0_100, %c0_101] : memref<10x18x8xbf16, #tpu.memory_space<vmem>>, vector<8x16x8xbf16>
    %101 = vector.shape_cast %100 : vector<8x16x8xbf16> to vector<128x8xbf16>
    %c3_102 = arith.constant 3 : index
    %c0_103 = arith.constant 0 : index
    %c0_104 = arith.constant 0 : index
    %102 = vector.load %arg5[%c3_102, %c0_103, %c0_104] : memref<9x8x8xbf16, #tpu.memory_space<vmem>>, vector<1x8x8xbf16>
    %103 = vector.shape_cast %102 : vector<1x8x8xbf16> to vector<8x8xbf16>
    %cst_105 = arith.constant dense<0.000000e+00> : vector<128x8xf32>
    %104 = tpu.matmul %101, %103, %cst_105 {dimension_numbers = #tpu.dot_dimension_numbers<[1], [0], [0], [1], [0, 0, 1, 1], [], []>} : vector<128x8xbf16>, vector<8x8xbf16>, vector<128x8xf32> -> vector<128x8xf32>
    %105 = arith.addf %99, %104 : vector<128x8xf32>
    %c1_106 = arith.constant 1 : index
    %c1_107 = arith.constant 1 : index
    %c0_108 = arith.constant 0 : index
    %106 = vector.load %arg10[%c1_106, %c1_107, %c0_108] : memref<10x18x8xbf16, #tpu.memory_space<vmem>>, vector<8x16x8xbf16>
    %107 = vector.shape_cast %106 : vector<8x16x8xbf16> to vector<128x8xbf16>
    %c4_109 = arith.constant 4 : index
    %c0_110 = arith.constant 0 : index
    %c0_111 = arith.constant 0 : index
    %108 = vector.load %arg5[%c4_109, %c0_110, %c0_111] : memref<9x8x8xbf16, #tpu.memory_space<vmem>>, vector<1x8x8xbf16>
    %109 = vector.shape_cast %108 : vector<1x8x8xbf16> to vector<8x8xbf16>
    %cst_112 = arith.constant dense<0.000000e+00> : vector<128x8xf32>
    %110 = tpu.matmul %107, %109, %cst_112 {dimension_numbers = #tpu.dot_dimension_numbers<[1], [0], [0], [1], [0, 0, 1, 1], [], []>} : vector<128x8xbf16>, vector<8x8xbf16>, vector<128x8xf32> -> vector<128x8xf32>
    %111 = arith.addf %105, %110 : vector<128x8xf32>
    %c1_113 = arith.constant 1 : index
    %c2_114 = arith.constant 2 : index
    %c0_115 = arith.constant 0 : index
    %112 = vector.load %arg10[%c1_113, %c2_114, %c0_115] : memref<10x18x8xbf16, #tpu.memory_space<vmem>>, vector<8x16x8xbf16>
    %113 = vector.shape_cast %112 : vector<8x16x8xbf16> to vector<128x8xbf16>
    %c5_116 = arith.constant 5 : index
    %c0_117 = arith.constant 0 : index
    %c0_118 = arith.constant 0 : index
    %114 = vector.load %arg5[%c5_116, %c0_117, %c0_118] : memref<9x8x8xbf16, #tpu.memory_space<vmem>>, vector<1x8x8xbf16>
    %115 = vector.shape_cast %114 : vector<1x8x8xbf16> to vector<8x8xbf16>
    %cst_119 = arith.constant dense<0.000000e+00> : vector<128x8xf32>
    %116 = tpu.matmul %113, %115, %cst_119 {dimension_numbers = #tpu.dot_dimension_numbers<[1], [0], [0], [1], [0, 0, 1, 1], [], []>} : vector<128x8xbf16>, vector<8x8xbf16>, vector<128x8xf32> -> vector<128x8xf32>
    %117 = arith.addf %111, %116 : vector<128x8xf32>
    %c2_120 = arith.constant 2 : index
    %c0_121 = arith.constant 0 : index
    %c0_122 = arith.constant 0 : index
    %118 = vector.load %arg10[%c2_120, %c0_121, %c0_122] : memref<10x18x8xbf16, #tpu.memory_space<vmem>>, vector<8x16x8xbf16>
    %119 = vector.shape_cast %118 : vector<8x16x8xbf16> to vector<128x8xbf16>
    %c6_123 = arith.constant 6 : index
    %c0_124 = arith.constant 0 : index
    %c0_125 = arith.constant 0 : index
    %120 = vector.load %arg5[%c6_123, %c0_124, %c0_125] : memref<9x8x8xbf16, #tpu.memory_space<vmem>>, vector<1x8x8xbf16>
    %121 = vector.shape_cast %120 : vector<1x8x8xbf16> to vector<8x8xbf16>
    %cst_126 = arith.constant dense<0.000000e+00> : vector<128x8xf32>
    %122 = tpu.matmul %119, %121, %cst_126 {dimension_numbers = #tpu.dot_dimension_numbers<[1], [0], [0], [1], [0, 0, 1, 1], [], []>} : vector<128x8xbf16>, vector<8x8xbf16>, vector<128x8xf32> -> vector<128x8xf32>
    %123 = arith.addf %117, %122 : vector<128x8xf32>
    %c2_127 = arith.constant 2 : index
    %c1_128 = arith.constant 1 : index
    %c0_129 = arith.constant 0 : index
    %124 = vector.load %arg10[%c2_127, %c1_128, %c0_129] : memref<10x18x8xbf16, #tpu.memory_space<vmem>>, vector<8x16x8xbf16>
    %125 = vector.shape_cast %124 : vector<8x16x8xbf16> to vector<128x8xbf16>
    %c7_130 = arith.constant 7 : index
    %c0_131 = arith.constant 0 : index
    %c0_132 = arith.constant 0 : index
    %126 = vector.load %arg5[%c7_130, %c0_131, %c0_132] : memref<9x8x8xbf16, #tpu.memory_space<vmem>>, vector<1x8x8xbf16>
    %127 = vector.shape_cast %126 : vector<1x8x8xbf16> to vector<8x8xbf16>
    %cst_133 = arith.constant dense<0.000000e+00> : vector<128x8xf32>
    %128 = tpu.matmul %125, %127, %cst_133 {dimension_numbers = #tpu.dot_dimension_numbers<[1], [0], [0], [1], [0, 0, 1, 1], [], []>} : vector<128x8xbf16>, vector<8x8xbf16>, vector<128x8xf32> -> vector<128x8xf32>
    %129 = arith.addf %123, %128 : vector<128x8xf32>
    %c2_134 = arith.constant 2 : index
    %c2_135 = arith.constant 2 : index
    %c0_136 = arith.constant 0 : index
    %130 = vector.load %arg10[%c2_134, %c2_135, %c0_136] : memref<10x18x8xbf16, #tpu.memory_space<vmem>>, vector<8x16x8xbf16>
    %131 = vector.shape_cast %130 : vector<8x16x8xbf16> to vector<128x8xbf16>
    %c8_137 = arith.constant 8 : index
    %c0_138 = arith.constant 0 : index
    %c0_139 = arith.constant 0 : index
    %132 = vector.load %arg5[%c8_137, %c0_138, %c0_139] : memref<9x8x8xbf16, #tpu.memory_space<vmem>>, vector<1x8x8xbf16>
    %133 = vector.shape_cast %132 : vector<1x8x8xbf16> to vector<8x8xbf16>
    %cst_140 = arith.constant dense<0.000000e+00> : vector<128x8xf32>
    %134 = tpu.matmul %131, %133, %cst_140 {dimension_numbers = #tpu.dot_dimension_numbers<[1], [0], [0], [1], [0, 0, 1, 1], [], []>} : vector<128x8xbf16>, vector<8x8xbf16>, vector<128x8xf32> -> vector<128x8xf32>
    %135 = arith.addf %129, %134 : vector<128x8xf32>
    %c0_141 = arith.constant 0 : index
    %c0_142 = arith.constant 0 : index
    %136 = vector.load %arg6[%c0_141, %c0_142] : memref<1x8xf32, #tpu.memory_space<vmem>>, vector<1x8xf32>
    %137 = vector.broadcast %136 : vector<1x8xf32> to vector<128x8xf32>
    %138 = arith.addf %135, %137 : vector<128x8xf32>
    %c0_143 = arith.constant 0 : index
    %c2_144 = arith.constant 2 : index
    %c1_145 = arith.constant 1 : index
    %c0_146 = arith.constant 0 : index
    %139 = vector.load %arg2[%c0_143, %c2_144, %c1_145, %c0_146] : memref<1x12x18x4xbf16, #tpu.memory_space<vmem>>, vector<1x8x16x4xbf16>
    %140 = vector.shape_cast %139 : vector<1x8x16x4xbf16> to vector<8x16x4xbf16>
    %141 = vector.shape_cast %140 : vector<8x16x4xbf16> to vector<128x4xbf16>
    %c0_147 = arith.constant 0 : index
    %c0_148 = arith.constant 0 : index
    %142 = vector.load %arg7[%c0_147, %c0_148] : memref<4x8xbf16, #tpu.memory_space<vmem>>, vector<4x8xbf16>
    %cst_149 = arith.constant dense<0.000000e+00> : vector<128x8xf32>
    %143 = tpu.matmul %141, %142, %cst_149 {dimension_numbers = #tpu.dot_dimension_numbers<[1], [0], [0], [1], [0, 0, 1, 1], [], []>} : vector<128x4xbf16>, vector<4x8xbf16>, vector<128x8xf32> -> vector<128x8xf32>
    %c0_150 = arith.constant 0 : index
    %c0_151 = arith.constant 0 : index
    %144 = vector.load %arg8[%c0_150, %c0_151] : memref<1x8xf32, #tpu.memory_space<vmem>>, vector<1x8xf32>
    %145 = vector.broadcast %144 : vector<1x8xf32> to vector<128x8xf32>
    %146 = arith.addf %143, %145 : vector<128x8xf32>
    %147 = arith.addf %138, %146 : vector<128x8xf32>
    %cst_152 = arith.constant 0.000000e+00 : f32
    %148 = vector.broadcast %cst_152 : f32 to vector<128x8xf32>
    %149 = arith.maximumf %147, %148 : vector<128x8xf32>
    %150 = vector.shape_cast %149 : vector<128x8xf32> to vector<8x16x8xf32>
    %c0_153 = arith.constant 0 : index
    %c0_154 = arith.constant 0 : index
    %c0_155 = arith.constant 0 : index
    %c0_156 = arith.constant 0 : index
    %151 = vector.load %arg9[%c0_153, %c0_154, %c0_155, %c0_156] : memref<1x8x16x8xf32, #tpu.memory_space<vmem>>, vector<1x8x16x8xf32>
    %152 = vector.shape_cast %151 : vector<1x8x16x8xf32> to vector<8x16x8xf32>
    %153 = vector.shape_cast %150 : vector<8x16x8xf32> to vector<1x8x16x8xf32>
    tpu.vector_store %arg9[%c0_153, %c0_154, %c0_155, %c0_156], %153 {strides = array<i32>} : memref<1x8x16x8xf32, #tpu.memory_space<vmem>>, vector<1x8x16x8xf32>,
    return
  }
  func.func @transform_0(%arg0: i32, %arg1: i32) -> (i32, i32, i32, i32) {
    %c2_i32 = arith.constant 2 : i32
    %0 = arith.muli %arg0, %c2_i32 : i32
    %1 = arith.addi %0, %arg1 : i32
    %c0_i32 = arith.constant 0 : i32
    %c0_i32_0 = arith.constant 0 : i32
    %c0_i32_1 = arith.constant 0 : i32
    %c0_i32_2 = arith.constant 0 : i32
    return %1, %c0_i32, %c0_i32_0, %c0_i32_1 : i32, i32, i32, i32
  }
  func.func @transform_1(%arg0: i32, %arg1: i32) -> (i32, i32, i32) {
    %c0_i32 = arith.constant 0 : i32
    %c0_i32_0 = arith.constant 0 : i32
    %c0_i32_1 = arith.constant 0 : i32
    %c0_i32_2 = arith.constant 0 : i32
    return %c0_i32, %c0_i32_0, %c0_i32_1 : i32, i32, i32
  }
  func.func @transform_2(%arg0: i32, %arg1: i32) -> (i32, i32) {
    %c0_i32 = arith.constant 0 : i32
    %c0_i32_0 = arith.constant 0 : i32
    %c0_i32_1 = arith.constant 0 : i32
    return %c0_i32, %c0_i32_0 : i32, i32
  }
  func.func @transform_3(%arg0: i32, %arg1: i32) -> (i32, i32, i32) {
    %c0_i32 = arith.constant 0 : i32
    %c0_i32_0 = arith.constant 0 : i32
    %c0_i32_1 = arith.constant 0 : i32
    %c0_i32_2 = arith.constant 0 : i32
    return %c0_i32, %c0_i32_0, %c0_i32_1 : i32, i32, i32
  }
  func.func @transform_4(%arg0: i32, %arg1: i32) -> (i32, i32) {
    %c0_i32 = arith.constant 0 : i32
    %c0_i32_0 = arith.constant 0 : i32
    %c0_i32_1 = arith.constant 0 : i32
    return %c0_i32, %c0_i32_0 : i32, i32
  }
  func.func @transform_5(%arg0: i32, %arg1: i32) -> (i32, i32) {
    %c0_i32 = arith.constant 0 : i32
    %c0_i32_0 = arith.constant 0 : i32
    %c0_i32_1 = arith.constant 0 : i32
    return %c0_i32, %c0_i32_0 : i32, i32
  }
  func.func @transform_6(%arg0: i32, %arg1: i32) -> (i32, i32) {
    %c0_i32 = arith.constant 0 : i32
    %c0_i32_0 = arith.constant 0 : i32
    %c0_i32_1 = arith.constant 0 : i32
    return %c0_i32, %c0_i32_0 : i32, i32
  }
  func.func @transform_7(%arg0: i32, %arg1: i32) -> (i32, i32, i32, i32) {
    %c0_i32 = arith.constant 0 : i32
    %c0_i32_0 = arith.constant 0 : i32
    %c0_i32_1 = arith.constant 0 : i32
    return %arg0, %arg1, %c0_i32, %c0_i32_0 : i32, i32, i32, i32
  }
}

</mosaic_0001>

<bundles_post_ra>
// kernel: tpu_custom_call.1
= control target key start
LH: loop header
LB: loop body
LE: loop exit
PB: predicated region body
PF: predicated region fallthrough
CT: control target
= control target key end

     0   :  { %s8464_s24 = smov 0   ;;  %s8466_s25 = smov 0   ;;  %s10475_s0 = inlined_call_operand.vmem [shape: bf16[4,12,18,4], index: 0, kind: input, shape index: {}]   ;;  %s10476_s1 = inlined_call_operand.vmem [shape: bf16[9,4,8], index: 1, kind: input, shape index: {}]   ;;  %s10477_s2 = inlined_call_operand.vmem [shape: f32[1,8], index: 2, kind: input, shape index: {}]   ;;  %s10478_s3 = inlined_call_operand.vmem [shape: bf16[9,8,8], index: 3, kind: input, shape index: {}]   ;;  %s10479_s4 = inlined_call_operand.vmem [shape: f32[1,8], index: 4, kind: input, shape index: {}]   ;;  %s10480_s5 = inlined_call_operand.vmem [shape: bf16[4,8], index: 5, kind: input, shape index: {}]   ;;  %s10481_s6 = inlined_call_operand.vmem [shape: f32[1,8], index: 6, kind: input, shape index: {}]   ;;  %s10482_s7 = inlined_call_operand.vmem [shape: f32[2,16,16,8], index: 7, kind: output, shape index: {}]  }
   0x1   :  { %s8468_s26 = smov 0   ;;  %s8470_s27 = smov 0  }
   0x2   :  { %s8472_s28 = smov 0  }
   0x3 LB: > { %s26_s29 = sadd.s32 1, %s8412_s26  ;;  %s29_s30 = sadd.s32 1, %s8416_s27  ;;  %s8420_s28 = sphi %s8472_s28, %s17_s28   ;;  %s8416_s27 = sphi %s8470_s27, %s10504_s27   ;;  %s8412_s26 = sphi %s8468_s26, %s10503_s26   ;;  %s8408_s25 = sphi %s8466_s25, %s10502_s25   ;;  %s8404_s24 = sphi %s8464_s24, %s10501_s24  }
   0x4   : > { %p27_p0 = scmp.ge.s32.totalorder %s26_s29, 2  ;;  %p6752_p1 = scmp.ge.s32.totalorder %s8420_s28, 1 }
   0x5   : > { %p259_p2 = scmp.lt.s32.totalorder %s8420_s28, 5 }
   0x6   : > { %s10506_s29 = smov (%p27_p0, %s26_s29), 0  ;;  %s10508_s30 = smov (!%p27_p0, %s29_s30), %s8416_s27 }
   0x7   : > { %p260_p3 = pnand %p6752_p1, %p259_p2  ;;  %p31_p4 = scmp.ge.s32.totalorder %s10508_s30, 2 }
   0x9   : > { %s10510_s30 = smov (%p31_p4, %s10508_s30), 0  ;;  %263 = sbr.rel (%p260_p3) target bundleno = 1194 (0x4aa), region = 48 }
  0x10   : > { %s6755_s8 = sshll.u32 %s8404_s24, 3  ;;  %p308_p5 = scmp.lt.s32.totalorder %s8408_s25, 1  ;;  %v6759_v0 = vld [vmem:[%s10476_s1 + $0x2] sm:$0x3]  ;;  %vm656_vm0 = vcmask 1041408   ;;  %vm625_vm4 = vcmask 31744  }
  0x11   : > { %p310_p6 = scmp.lt.s32.totalorder %s6755_s8, 15  ;;  %8265 = vmatprep.subr.msk.bf16.mxu0 %vm656_vm0, %v6759_v0  ;;  %v658_v1 = vsel %vm656_vm0, %v6759_v0, 0  ;;  %s6753_s11 = sshll.u32 %s8408_s25, 1  ;;  %8266 = vmatprep.subr.msk.bf16.mxu1 %vm656_vm0, %v6759_v0  ;;  %v339_v2 = vld [vmem:[%s10476_s1] sm:$0x3]  ;;  %vm999_vm5 = vcmask 1042432  }
  0x12   : > { %s10512_s25 = smov (!%p308_p5, %s8408_s25), 1  ;;  %7550 = vmatpush3.bf16.msra.mxu0 %v658_v1  ;;  %7928 = vmatpush3.bf16.msra.mxu1 %v658_v1  ;;  %s299_s15 = sadd.s32 %s8404_s24, %s6753_s11  ;;  %vm350_vm1 = vsmask.f32 3328  ;;  %vm351_vm2 = vsmask.f32 7440  ;;  %v854_v35 = vsel %vm656_vm0, %v339_v2, 0 }
  0x13   : > { %s10514_s8 = smov (!%p310_p6, %s6755_s8), 15  ;;  %8267 = vmatprep.subr.msk.bf16.mxu0 %vm656_vm0, %v339_v2  ;;  %s6757_s14 = sshll.u32 %s10512_s25, 5  ;;  %vm8556_vm3 = vmor %vm350_vm1, %vm351_vm2  ;;  %vm1000_vm6 = vcmask 1046532   ;;  %vm3407_vm8 = vsmask.f32 256  ;;  %vm3610_vm9 = vcmask 60416  }
  0x14   : > { %s6756_s16 = sshll.u32 %s10514_s8, 1  ;;  %p300_p7 = scmp.lt.s32.totalorder %s299_s15, 3  ;;  %vm8657_vm7 = vmor %vm999_vm5, %vm1000_vm6  ;;  %vm3611_vm10 = vsmask.f32 7938  ;;  %vm3618_vm11 = vcmask 57344  }
  0x15   : > { %s314_s17 = sadd.s32 %s6757_s14, %s6756_s16  ;;  %vm3408_vm12 = vsmask.f32 4368  ;;  %vm9513_vm13 = vmand %vm3610_vm9, %vm3611_vm10  ;;  %p7118_p8 = scmp.ne.s32.totalorder %s8404_s24, 0 }
  0x16   : > { %s6758_s18 = sshll.u32 %s314_s17, 3  ;;  %s10516_s15 = smov (!%p300_p7, %s299_s15), 3  ;;  %vm9520_vm14 = vmand %vm3618_vm11, %vm3407_vm8 }
  0x17   : > { %s8516_s21 = scalar_lea.vmem %s10482_s7, %s6758_s18  ;;  %s8285_s22 = smul.u32 144, %s10516_s15  ;;  %vm9526_vm15 = vmor %vm3407_vm8, %vm3408_vm12 }
  0x18   : > { %vm9558_vm1 = vmand %vm3618_vm11, %vm3611_vm10 }
  0x19   : > { %s8521_s10 = scalar_lea.vmem %s10475_s0, %s8285_s22 }
  0x1a   : > { %v8524_v3 = vld [vmem:[%s8521_s10] sm:$0xf]  ;;  %v8527_v4 = vld [vmem:[%s8521_s10 + $0x4] sm:$0xf]  ;;  %v8530_v5 = vld [vmem:[%s8521_s10 + $0x8] sm:$0x1] }
  0x1b   : > { %v354_v6 = vshrl.u32 %v8524_v3, 16  ;;  %v357_v7 = vshll.u32 %v8524_v3, 16  ;;  %v363_v8 = vshll.u32 %v8527_v4, 16  ;;  %v367_v9 = vshrl.u32 %v8527_v4, 16  ;;  %v8537_v10 = vld [vmem:[%s8521_s10 + $0xc] sm:$0xf] }
  0x1c   : > { %v373_v11 = vshll.u32 %v8530_v5, 16  ;;  %v8541_v12 = vld [vmem:[%s8521_s10 + $0x10] sm:$0xf]  ;;  %v8544_v13 = vld [vmem:[%s8521_s10 + $0x14] sm:$0x1]  ;;  %v378_v19 = vshrl.u32 %v8537_v10, 16 }
  0x1d   : > { %v356_v14 = vrot.slane %v354_v6, 4  ;;  %v359_v15 = vrot.slane %v357_v7, 5  ;;  %v365_v16 = vrot.slane %v363_v8, 5  ;;  %v369_v17 = vrot.slane %v367_v9, 4  ;;  %v8552_v26 = vld [vmem:[%s8521_s10 + $0x18] sm:$0xf] }
  0x1e   : > { %v375_v18 = vrot.slane %v373_v11, 5  ;;  %v381_v20 = vshll.u32 %v8537_v10, 16  ;;  %v387_v21 = vshll.u32 %v8541_v12, 16  ;;  %v391_v24 = vshrl.u32 %v8541_v12, 16  ;;  %v8561_v31 = vld [vmem:[%s8521_s10 + $0x1c] sm:$0xf] }
  0x1f   : > { %v360_v22 = vor.u32 %v359_v15, %v356_v14  ;;  %v370_v23 = vor.u32 %v369_v17, %v365_v16  ;;  %v397_v25 = vshll.u32 %v8544_v13, 16  ;;  %v380_v28 = vrot.slane %v378_v19, 4  ;;  %v8565_v38 = vld [vmem:[%s8521_s10 + $0x20] sm:$0x1]  ;;  %v8575_v45 = vld [vmem:[%s8521_s10 + $0x24] sm:$0xf] }
  0x20   : > { %v383_v29 = vrot.slane %v381_v20, 5  ;;  %v389_v30 = vrot.slane %v387_v21, 5  ;;  %v393_v34 = vrot.slane %v391_v24, 4  ;;  %v402_v39 = vshrl.u32 %v8552_v26, 16  ;;  %v8578_v50 = vld [vmem:[%s8521_s10 + $0x28] sm:$0xf] }
  0x21   : > { %v361_v32 = vrot.slane %v360_v22, 4  ;;  %v371_v33 = vrot.slane %v370_v23, 4  ;;  %v399_v37 = vrot.slane %v397_v25, 5  ;;  %v405_v40 = vshll.u32 %v8552_v26, 16  ;;  %v8586_v57 = vld [vmem:[%s8521_s10 + $0x2c] sm:$0x1] }
  0x22   : > { %v384_v36 = vor.u32 %v383_v29, %v380_v28  ;;  %v394_v43 = vor.u32 %v393_v34, %v389_v30  ;;  %v411_v44 = vshll.u32 %v8561_v31, 16  ;;  %v404_v48 = vrot.slane %v402_v39, 4  ;;  %v8594_v0 = vld [vmem:[%s8521_s10 + $0x30] sm:$0xf]  ;;  %v8597_v8 = vld [vmem:[%s8521_s10 + $0x34] sm:$0xf] }
  0x23   : > { %v366_v41 = vsel %vm8556_vm3, %v361_v32, %v365_v16  ;;  %v376_v42 = vsel %vm8556_vm3, %v371_v33, %v375_v18  ;;  %v407_v49 = vrot.slane %v405_v40, 5  ;;  %v415_v53 = vshrl.u32 %v8561_v31, 16  ;;  %v8604_v16 = vld [vmem:[%s10476_s1 + $0x4] sm:$0x3]  ;;  %v8610_v19 = vld [vmem:[%s8521_s10 + $0x38] sm:$0x1] }
  0x24   : > { %v6760_v46 = vcombine.low %v366_v41, %v376_v42  ;;  %v385_v47 = vrot.slane %v384_v36, 4  ;;  %v395_v51 = vrot.slane %v394_v43, 4  ;;  %v413_v52 = vrot.slane %v411_v44, 5  ;;  %v8617_v33 = vld [vmem:[%s8521_s10 + $0x3c] sm:$0xf] }
  0x25   : > { %v421_v54 = vshll.u32 %v8565_v38, 16  ;;  %v408_v56 = vor.u32 %v407_v49, %v404_v48  ;;  %v426_v58 = vshrl.u32 %v8575_v45, 16  ;;  %v429_v59 = vshll.u32 %v8575_v45, 16  ;;  %v8625_v39 = vld [vmem:[%s8521_s10 + $0x40] sm:$0xf] }
  0x26   : > { %7551 = vmatprep.mubr.msk.bf16.mxu0 %vm625_vm4, %v6760_v46  ;;  %v390_v55 = vsel %vm8556_vm3, %v385_v47, %v389_v30  ;;  %v400_v60 = vsel %vm8556_vm3, %v395_v51, %v399_v37  ;;  %v417_v61 = vrot.slane %v415_v53, 4  ;;  %v435_v63 = vshll.u32 %v8578_v50, 16  ;;  %v8630_v44 = vld [vmem:[%s8521_s10 + $0x44] sm:$0x1] }
  0x27   : > { %v423_v62 = vrot.slane %v421_v54, 5  ;;  %v6761_v1 = vcombine.low %v390_v55, %v400_v60  ;;  %v409_v2 = vrot.slane %v408_v56, 4  ;;  %v428_v6 = vrot.slane %v426_v58, 4 }
  0x28   : > { %v431_v7 = vrot.slane %v429_v59, 5  ;;  %v418_v9 = vor.u32 %v417_v61, %v413_v52  ;;  %v437_v11 = vrot.slane %v435_v63, 5  ;;  %v439_v14 = vshrl.u32 %v8578_v50, 16 }
  0x29   : > { %v445_v15 = vshll.u32 %v8586_v57, 16  ;;  %7552 = vmatmul.mubr.msk.bf16.vlgmr.msra.gmra.mrb[0].mxu0 %vm625_vm4, %v6761_v1  ;;  %v414_v17 = vsel %vm8556_vm3, %v409_v2, %v413_v52  ;;  %v450_v20 = vshrl.u32 %v8594_v0, 16  ;;  %v453_v21 = vshll.u32 %v8594_v0, 16 }
  0x2a   : > { %v432_v18 = vor.u32 %v431_v7, %v428_v6  ;;  %7572 = vmatpush3.bf16.msra.mxu0 %v854_v35  ;;  %v419_v22 = vrot.slane %v418_v9, 4  ;;  %v441_v23 = vrot.slane %v439_v14, 4  ;;  %v459_v25 = vshll.u32 %v8597_v8, 16 }
  0x2b   : > { %v447_v24 = vrot.slane %v445_v15, 5  ;;  %v452_v29 = vrot.slane %v450_v20, 4  ;;  %v455_v30 = vrot.slane %v453_v21, 5  ;;  %v463_v32 = vshrl.u32 %v8597_v8, 16  ;;  %8268 = vmatprep.subr.msk.bf16.mxu0 %vm656_vm0, %v8604_v16  ;;  %v969_v20 = vld [vmem:[%s8521_s10] sm:$0xe] }
  0x2c   : > { %v433_v28 = vrot.slane %v432_v18, 4  ;;  %v424_v34 = vsel %vm8556_vm3, %v419_v22, %v423_v62  ;;  %v442_v35 = vor.u32 %v441_v23, %v437_v11  ;;  %v461_v36 = vrot.slane %v459_v25, 5  ;;  %v970_v23 = vld [vmem:[%s8521_s10 + $0xc] sm:$0xe] }
  0x2d   : > { %v469_v37 = vshll.u32 %v8610_v19, 16  ;;  %v6762_v40 = vcombine.low %v414_v17, %v424_v34  ;;  %v456_v42 = vor.u32 %v455_v30, %v452_v29  ;;  %v465_v43 = vrot.slane %v463_v32, 4  ;;  %v972_v34 = vld [vmem:[%s8521_s10 + $0x24] sm:$0xe] }
  0x2e   : > { %v438_v41 = vsel %vm8556_vm3, %v433_v28, %v437_v11  ;;  %v443_v46 = vrot.slane %v442_v35, 4  ;;  %v474_v48 = vshrl.u32 %v8617_v33, 16  ;;  %v477_v49 = vshll.u32 %v8617_v33, 16 }
  0x2f   : > { %v471_v47 = vrot.slane %v469_v37, 5  ;;  %7555 = vmatprep.mubr.msk.bf16.mxu0 %vm625_vm4, %v6762_v40  ;;  %v457_v51 = vrot.slane %v456_v42, 4  ;;  %v466_v52 = vor.u32 %v465_v43, %v461_v36  ;;  %v483_v53 = vshll.u32 %v8625_v39, 16 }
  0x30   : > { %v487_v54 = vshrl.u32 %v8625_v39, 16  ;;  %v448_v55 = vsel %vm8556_vm3, %v443_v46, %v447_v24  ;;  %v476_v56 = vrot.slane %v474_v48, 4  ;;  %v479_v58 = vrot.slane %v477_v49, 5 }
  0x31   : > { %v493_v59 = vshll.u32 %v8630_v44, 16  ;;  %v6763_v60 = vcombine.low %v438_v41, %v448_v55  ;;  %v462_v61 = vsel %vm8556_vm3, %v457_v51, %v461_v36  ;;  %v467_v62 = vrot.slane %v466_v52, 4 }
  0x32   : > { %v485_v63 = vrot.slane %v483_v53, 5  ;;  %v480_v1 = vor.u32 %v479_v58, %v476_v56  ;;  %v489_v2 = vrot.slane %v487_v54, 4  ;;  %v1011_v18 = vrot.slane %v8541_v12, 5 }
  0x33   : > { %7556 = vmatmul.mubr.msk.bf16.gmra.mrb[4].mxu0 %vm625_vm4, %v6763_v60  ;;  %v472_v6 = vsel %vm8556_vm3, %v467_v62, %v471_v47  ;;  %v495_v14 = vrot.slane %v493_v59, 5  ;;  %v6780_v22 = vcombine.low %v8524_v3, %v8527_v4  ;;  %v1007_v24 = vrot.slane %v8530_v5, 5  ;;  %v974_v47 = vld [vmem:[%s8521_s10 + $0x3c] sm:$0xe] }
  0x34   : > { %v6764_v7 = vcombine.low %v462_v61, %v472_v6  ;;  %v481_v9 = vrot.slane %v480_v1, 4  ;;  %v490_v11 = vor.u32 %v489_v2, %v485_v63  ;;  %v1014_v25 = vrot.slane %v8544_v13, 5  ;;  %v973_v13 = vld [vmem:[%s8521_s10 + $0x30] sm:$0xe] }
  0x35   : > { %v6800_v30 = vrot.slane %v969_v20, 9  ;;  %v1004_v32 = vrot.slane %v8527_v4, 5  ;;  %v6801_v35 = vrot.slane %v970_v23, 9  ;;  %v1013_v36 = vrot.slane %v1011_v18, 4  ;;  %v971_v20 = vld [vmem:[%s8521_s10 + $0x18] sm:$0xe] }
  0x36   : > { %7559 = vmatprep.mubr.msk.bf16.mxu0 %vm625_vm4, %v6764_v7  ;;  %v486_v15 = vsel %vm8556_vm3, %v481_v9, %v485_v63  ;;  %v491_v17 = vrot.slane %v490_v11, 4  ;;  %v6803_v40 = vrot.slane %v972_v34, 9  ;;  %v1025_v41 = vrot.slane %v8578_v50, 5  ;;  %v8730_v9 = vld [vmem:[%s8521_s10 + $0x48] sm:$0xf] }
  0x37   : > { %v8667_v3 = vsel %vm8657_vm7, %v6800_v30, %v1004_v32  ;;  %v1006_v5 = vrot.slane %v1004_v32, 4  ;;  %v8672_v37 = vsel %vm8657_vm7, %v6801_v35, %v1011_v18  ;;  %v8676_v4 = vsel %vm8657_vm7, %v1013_v36, %v1014_v25  ;;  %v8733_v11 = vld [vmem:[%s8521_s10 + $0x4c] sm:$0xf]  ;;  %v8763_v18 = vld [vmem:[%s8521_s10 + $0x70] sm:$0xf] }
  0x38   : > { %v496_v21 = vsel %vm8556_vm3, %v491_v17, %v495_v14  ;;  %v6781_v42 = vcombine.low %v8537_v10, %v8541_v12  ;;  %v6812_v46 = vcombine.low %v8672_v37, %v8676_v4  ;;  %v8689_v49 = vsel %vm8657_vm7, %v6803_v40, %v1025_v41  ;;  %v6902_v34 = vld [vmem:[%s10476_s1 + $0x8] sm:$0x3]  ;;  %v8785_v35 = vld [vmem:[%s8521_s10 + $0x50] sm:$0x1] }
  0x39   : > { %v6765_v28 = vcombine.low %v486_v15, %v496_v21  ;;  %v1008_v43 = vsel %vm8657_vm7, %v1006_v5, %v1007_v24  ;;  %v1027_v51 = vrot.slane %v1025_v41, 4  ;;  %v1028_v52 = vrot.slane %v8586_v57, 5  ;;  %v6851_v57 = vld [vmem:[%s10476_s1 + $0x6] sm:$0x3]  ;;  %v975_v36 = vld [vmem:[%s8521_s10 + $0x48] sm:$0xe] }
  0x3a   : > { %v6811_v48 = vcombine.low %v8667_v3, %v1008_v43  ;;  %v6782_v53 = vcombine.low %v8552_v26, %v8561_v31  ;;  %v6804_v10 = vrot.slane %v973_v13, 9  ;;  %v1032_v12 = vrot.slane %v8597_v8, 5  ;;  %v8751_v15 = vld [vmem:[%s8521_s10 + $0x64] sm:$0xf]  ;;  %v8797_v41 = vld [vmem:[%s8521_s10 + $0x5c] sm:$0x1] }
  0x3b   : > { %7560 = vmatmul.mubr.msk.bf16.gmra.mrb[8].mxu0 %vm625_vm4, %v6765_v28  ;;  %v1035_v54 = vrot.slane %v8610_v19, 5  ;;  %v1135_v55 = vsel %vm656_vm0, %v8604_v16, 0  ;;  %v1029_v56 = vsel %vm8657_vm7, %v1027_v51, %v1028_v52  ;;  %v6805_v58 = vrot.slane %v974_v47, 9  ;;  %v977_v47 = vld [vmem:[%s8521_s10 + $0x60] sm:$0xe] }
  0x3c   : > { %7573 = vmatprep.mubr.msk.bf16.mxu0 %vm625_vm4, %v6780_v22  ;;  %v1039_v59 = vrot.slane %v8625_v39, 5  ;;  %v6814_v26 = vcombine.low %v8689_v49, %v1029_v56  ;;  %v1033_v60 = vsel %vm8657_vm7, %v6804_v10, %v1032_v12  ;;  %v1034_v61 = vrot.slane %v1032_v12, 4 }
  0x3d   : > { %v1042_v19 = vrot.slane %v8630_v44, 5  ;;  %v6783_v6 = vcombine.low %v8575_v45, %v8578_v50  ;;  %v6784_v7 = vcombine.low %v8594_v0, %v8597_v8  ;;  %v6785_v14 = vcombine.low %v8617_v33, %v8625_v39  ;;  %v8742_v50 = vld [vmem:[%s8521_s10 + $0x54] sm:$0xf]  ;;  %v8745_v0 = vld [vmem:[%s8521_s10 + $0x58] sm:$0xf] }
  0x3e   : > { %v8711_v16 = vsel %vm8657_vm7, %v6805_v58, %v1039_v59  ;;  %v1041_v62 = vrot.slane %v1039_v59, 4  ;;  %v1036_v63 = vsel %vm8657_vm7, %v1034_v61, %v1035_v54  ;;  %v6786_v45 = vcombine.low %v8730_v9, %v8733_v11  ;;  %v8748_v8 = vld [vmem:[%s8521_s10 + $0x60] sm:$0xf]  ;;  %v8760_v39 = vld [vmem:[%s8521_s10 + $0x6c] sm:$0xf] }
  0x3f   : > { %v6815_v44 = vcombine.low %v1033_v60, %v1036_v63  ;;  %v6787_v17 = vcombine.low %v8742_v50, %v8745_v0  ;;  %v6788_v33 = vcombine.low %v8748_v8, %v8751_v15  ;;  %v1018_v21 = vrot.slane %v8561_v31, 5 }
  0x40   : > { %v8719_v1 = vsel %vm8657_vm7, %v1041_v62, %v1042_v19  ;;  %v6789_v22 = vcombine.low %v8760_v39, %v8763_v18  ;;  %v6802_v23 = vrot.slane %v971_v20, 9  ;;  %v1021_v25 = vrot.slane %v8565_v38, 5  ;;  %v8341_v20 = vld [vmem:[%s8521_s10 + $0x30] sm:$0xff]  }
  0x41   : > { %v6816_v2 = vcombine.low %v8711_v16, %v8719_v1  ;;  %v1020_v24 = vrot.slane %v1018_v21, 4  ;;  %v1374_v32 = vsel %vm656_vm0, %v6851_v57, 0  ;;  %v1046_v38 = vrot.slane %v8733_v11, 5 }
  0x42   : > { %v1019_v28 = vsel %vm8657_vm7, %v6802_v23, %v1018_v21  ;;  %v6806_v3 = vrot.slane %v975_v36, 9  ;;  %v1049_v13 = vrot.slane %v8785_v35, 5  ;;  %v1053_v37 = vrot.slane %v8745_v0, 5  ;;  %v8342_v21 = vld [vmem:[%s8521_s10 + $0x3c] sm:$0xff]   ;;  %v8861_v36 = vld [vmem:[%s8521_s10 + $0x14] sm:$0x1] }
  0x43   : > { %7574 = vmatmul.mubr.msk.bf16.vlgmr.msra.gmra.mrb[0].mxu0 %vm625_vm4, %v6781_v42  ;;  %v1022_v30 = vsel %vm8657_vm7, %v1020_v24, %v1021_v25  ;;  %v1048_v5 = vrot.slane %v1046_v38, 4  ;;  %v976_v42 = vld [vmem:[%s8521_s10 + $0x54] sm:$0xe]  ;;  %v1060_v43 = vrot.slane %v8751_v15, 5  ;;  %v1056_v52 = vrot.slane %v8797_v41, 5 }
  0x44   : > { %7594 = vmatpush3.bf16.msra.mxu0 %v1135_v55  ;;  %7577 = vmatprep.mubr.msk.bf16.mxu0 %vm625_vm4, %v6782_v53  ;;  %v6813_v31 = vcombine.low %v1019_v28, %v1022_v30  ;;  %v1047_v4 = vsel %vm8657_vm7, %v6806_v3, %v1046_v38  ;;  %v6807_v49 = vrot.slane %v976_v42, 9  ;;  %v1055_v51 = vrot.slane %v1053_v37, 4  ;;  %v6875_v28 = vld [vmem:[%s8521_s10 + $0x18] sm:$0xf]  ;;  %v8855_v30 = vld [vmem:[%s8521_s10 + $0x1c] sm:$0xf] }
  0x45   : > { %8269 = vmatprep.subr.msk.bf16.mxu0 %vm656_vm0, %v6851_v57  ;;  %v1050_v40 = vsel %vm8657_vm7, %v1048_v5, %v1049_v13  ;;  %v6808_v53 = vrot.slane %v977_v47, 9  ;;  %v1062_v10 = vrot.slane %v1060_v43, 4  ;;  %v1067_v56 = vrot.slane %v8763_v18, 5  ;;  %v8819_v57 = vld [vmem:[%s8521_s10 + $0x74] sm:$0x1] }
  0x46   : > { %v1054_v54 = vsel %vm8657_vm7, %v6807_v49, %v1053_v37  ;;  %v1057_v55 = vsel %vm8657_vm7, %v1055_v51, %v1056_v52  ;;  %10490 = vst [vmem:[#allocation4_spill] sm:$0xff] %v8819_v57  ;;  %v1070_v62 = vrot.slane %v8819_v57, 5  ;;  %v1564_v3 = vshrl.u32 %v6875_v28, 16  ;;  %v8344_v42 = vld [vmem:[%s8521_s10 + $0x54] sm:$0xff]   ;;  %v8871_v49 = vld [vmem:[%s8521_s10 + $0x28] sm:$0xf] }
  0x47   : > { %v1061_v58 = vsel %vm8657_vm7, %v6808_v53, %v1060_v43  ;;  %v6818_v60 = vcombine.low %v1054_v54, %v1057_v55  ;;  %v1069_v16 = vrot.slane %v1067_v56, 4  ;;  %v1567_v5 = vshll.u32 %v6875_v28, 16  ;;  %v8874_v51 = vld [vmem:[%s8521_s10 + $0x20] sm:$0x1]  ;;  %v6884_v28 = vld [vmem:[%s8521_s10 + $0x3c] sm:$0xf] }
  0x48   : > { %v1573_v13 = vshll.u32 %v8855_v30, 16  ;;  %v1577_v37 = vshrl.u32 %v8855_v30, 16 }
  0x4a   : > { %v8876_v54 = vrot.slane %v1573_v13, 5  ;;  %v1579_v55 = vrot.slane %v1577_v37, 4 }
  0x4b   : > { %7578 = vmatmul.mubr.msk.bf16.gmra.mrb[4].mxu0 %vm625_vm4, %v6783_v6  ;;  %v8339_v6 = vld [vmem:[%s8521_s10 + $0x18] sm:$0xff]  }
  0x4c   : > { %7581 = vmatprep.mubr.msk.bf16.mxu0 %vm625_vm4, %v6784_v7  ;;  %v8340_v7 = vld [vmem:[%s8521_s10 + $0x24] sm:$0xff]  }
  0x53   : > { %7582 = vmatmul.mubr.msk.bf16.gmra.mrb[8].mxu0 %vm625_vm4, %v6785_v14  ;;  %v1842_v14 = vsel %vm656_vm0, %v6902_v34, 0 }
  0x54   : > { %7585 = vmatprep.mubr.msk.bf16.mxu0 %vm625_vm4, %v6786_v45  ;;  %v8838_v45 = vld [vmem:[%s10476_s1 + $0xa] sm:$0x3] }
  0x5b   : > { %7586 = vmatmul.mubr.msk.bf16.gmra.mrb[12].mxu0 %vm625_vm4, %v6787_v17  ;;  %v6872_v17 = vld [vmem:[%s8521_s10 + $0xc] sm:$0xf] }
  0x5c   : > { %7589 = vmatprep.mubr.msk.bf16.mxu0 %vm625_vm4, %v6788_v33  ;;  %v8844_v33 = vld [vmem:[%s8521_s10 + $0x10] sm:$0xf]  ;;  %v1543_v23 = vshll.u32 %v6872_v17, 16 }
  0x5d   : > { %v1549_v24 = vshll.u32 %v8844_v33, 16  ;;  %v1553_v25 = vshrl.u32 %v8844_v33, 16 }
  0x5f   : > { %v1555_v38 = vrot.slane %v1553_v25, 4  ;;  %v8898_v25 = vld [vmem:[%s8521_s10 + $0x2c] sm:$0x1] }
  0x63   : > { %7590 = vmatmul.mubr.msk.bf16.gmra.mrb[16].mxu0 %vm625_vm4, %v6789_v22  ;;  %v1540_v22 = vshrl.u32 %v6872_v17, 16  ;;  %v8345_v17 = vld [vmem:[%s8521_s10 + $0x60] sm:$0xff]  }
  0x64   : > { %7595 = vmatprep.mubr.msk.bf16.mxu0 %vm625_vm4, %v6811_v48  ;;  %v6817_v48 = vcombine.low %v1047_v4, %v1050_v40  ;;  %v6878_v4 = vld [vmem:[%s8521_s10 + $0x24] sm:$0xf]  ;;  %v8343_v40 = vld [vmem:[%s8521_s10 + $0x48] sm:$0xff]  }
  0x65   : > { %v1588_v52 = vshrl.u32 %v6878_v4, 16  ;;  %v1591_v53 = vshll.u32 %v6878_v4, 16  ;;  %v8907_v4 = vld [vmem:[%s8521_s10 + $0x38] sm:$0x1] }
  0x6b   : > { %7596 = vmatmul.mubr.msk.bf16.vlgmr.msra.gmra.mrb[0].mxu0 %vm625_vm4, %v6812_v46  ;;  %v8802_v46 = vld [vmem:[%s8521_s10 + $0x68] sm:$0x1] }
  0x6c   : > { %7616 = vmatpush3.bf16.msra.mxu0 %v1374_v32  ;;  %7599 = vmatprep.mubr.msk.bf16.mxu0 %vm625_vm4, %v6813_v31  ;;  %10489 = vst [vmem:[#allocation3_spill] sm:$0xff] %v8802_v46  ;;  %v1063_v12 = vrot.slane %v8802_v46, 5  ;;  %v1542_v31 = vrot.slane %v1540_v22, 4  ;;  %v1545_v32 = vrot.slane %v1543_v23, 5  ;;  %v8346_v22 = vld [vmem:[%s8521_s10 + $0x6c] sm:$0xff]  }
  0x6d   : > { %8270 = vmatprep.subr.msk.bf16.mxu0 %vm656_vm0, %v6902_v34  ;;  %v8858_v34 = vrot.slane %v1549_v24, 5  ;;  %v9003_v46 = vld [vmem:[%s8521_s10 + $0x7c] sm:$0xf] }
  0x6e   : > { %v1064_v59 = vsel %vm8657_vm7, %v1062_v10, %v1063_v12  ;;  %v1546_v43 = vor.u32 %v1545_v32, %v1542_v31  ;;  %v1566_v10 = vrot.slane %v1564_v3, 4  ;;  %v1569_v12 = vrot.slane %v1567_v5, 5  ;;  %v8904_v5 = vld [vmem:[%s8521_s10 + $0x40] sm:$0xf] }
  0x6f   : > { %v6819_v61 = vcombine.low %v1061_v58, %v1064_v59  ;;  %v1556_v47 = vor.u32 %v1555_v38, %v8858_v34  ;;  %v1597_v58 = vshll.u32 %v8871_v49, 16  ;;  %v1601_v59 = vshrl.u32 %v8871_v49, 16 }
  0x73   : > { %7600 = vmatmul.mubr.msk.bf16.gmra.mrb[4].mxu0 %vm625_vm4, %v6814_v26  ;;  %v978_v26 = vld [vmem:[%s8521_s10 + $0x6c] sm:$0xe] }
  0x74   : > { %7603 = vmatprep.mubr.msk.bf16.mxu0 %vm625_vm4, %v6815_v44  ;;  %v6809_v19 = vrot.slane %v978_v26, 9  ;;  %v1071_v44 = vsel %vm8657_vm7, %v1069_v16, %v1070_v62  ;;  %v8883_v26 = vld [vmem:[%s8521_s10 + $0x34] sm:$0xf]  ;;  %v1583_v16 = vshll.u32 %v8874_v51, 16  ;;  %v1590_v62 = vrot.slane %v1588_v52, 4 }
  0x75   : > { %v1645_v52 = vshll.u32 %v8904_v5, 16 }
  0x76   : > { %v1068_v63 = vsel %vm8657_vm7, %v6809_v19, %v1067_v56  ;;  %v6881_v56 = vld [vmem:[%s8521_s10 + $0x30] sm:$0xf]  ;;  %v1585_v24 = vrot.slane %v1583_v16, 5  ;;  %v8927_v16 = vld [vmem:[%s8521_s10 + $0x44] sm:$0x1] }
  0x77   : > { %v6820_v1 = vcombine.low %v1068_v63, %v1071_v44  ;;  %v1593_v63 = vrot.slane %v1591_v53, 5  ;;  %v1612_v44 = vshrl.u32 %v6881_v56, 16  ;;  %v1649_v53 = vshrl.u32 %v8904_v5, 16 }
  0x79   : > { %v1594_v32 = vor.u32 %v1593_v63, %v1590_v62  ;;  %v1614_v38 = vrot.slane %v1612_v44, 4  ;;  %v8930_v62 = vld [vmem:[%s8521_s10 + $0x4c] sm:$0xf] }
  0x7b   : > { %7604 = vmatmul.mubr.msk.bf16.gmra.mrb[8].mxu0 %vm625_vm4, %v6816_v2  ;;  %v8338_v2 = vld [vmem:[%s8521_s10 + $0xc] sm:$0xff]  }
  0x7c   : > { %7607 = vmatprep.mubr.msk.bf16.mxu0 %vm625_vm4, %v6817_v48  ;;  %v1559_v48 = vshll.u32 %v8861_v36, 16 }
  0x7e   : > { %v1561_v19 = vrot.slane %v1559_v48, 5  ;;  %v1639_v48 = vshll.u32 %v6884_v28, 16 }
  0x83   : > { %7608 = vmatmul.mubr.msk.bf16.gmra.mrb[12].mxu0 %vm625_vm4, %v6818_v60  ;;  %v1547_v60 = vrot.slane %v1546_v43, 4  ;;  %v1607_v43 = vshll.u32 %v8898_v25, 16 }
  0x84   : > { %7611 = vmatprep.mubr.msk.bf16.mxu0 %vm625_vm4, %v6819_v61  ;;  %v1557_v61 = vrot.slane %v1556_v47, 4  ;;  %v1636_v47 = vshrl.u32 %v6884_v28, 16  ;;  %v1669_v28 = vshll.u32 %v8930_v62, 16 }
  0x85   : > { %v1552_v23 = vsel %vm8556_vm3, %v1547_v60, %v8858_v34  ;;  %v1609_v44 = vrot.slane %v1607_v43, 5 }
  0x86   : > { %v1562_v31 = vsel %vm8556_vm3, %v1557_v61, %v1561_v19 }
  0x8b   : > { %7612 = vmatmul.mubr.msk.bf16.gmra.mrb[16].mxu0 %vm625_vm4, %v6820_v1  ;;  %v1615_v1 = vshll.u32 %v6881_v56, 16  ;;  %v6887_v56 = vld [vmem:[%s8521_s10 + $0x48] sm:$0xf] }
  0x8c   : > { %7617 = vmatprep.mubr.msk.bf16.mxu0 %vm625_vm4, %v8338_v2  ;;  %v1570_v2 = vor.u32 %v1569_v12, %v1566_v10  ;;  %v1595_v10 = vrot.slane %v1594_v32, 4  ;;  %v1673_v32 = vshrl.u32 %v8930_v62, 16 }
  0x8d   : > { %v1617_v3 = vrot.slane %v1615_v1, 5  ;;  %v1638_v1 = vrot.slane %v1636_v47, 4 }
  0x8e   : > { %v1571_v13 = vrot.slane %v1570_v2, 4  ;;  %v1641_v2 = vrot.slane %v1639_v48, 5 }
  0x8f   : > { %v1618_v12 = vor.u32 %v1617_v3, %v1614_v38 }
  0x90   : > { %v1576_v60 = vsel %vm8556_vm3, %v1571_v13, %v8876_v54 }
  0x93   : > { %7618 = vmatmul.mubr.msk.bf16.vlgmr.msra.gmra.mrb[0].mxu0 %vm625_vm4, %v8339_v6  ;;  %v1580_v6 = vor.u32 %v1579_v55, %v8876_v54  ;;  %v1631_v55 = vshll.u32 %v8907_v4, 16  ;;  %v8936_v54 = vld [vmem:[%s8521_s10 + $0x58] sm:$0xf] }
  0x94   : > { %7638 = vmatpush3.bf16.msra.mxu0 %v1842_v14  ;;  %7621 = vmatprep.mubr.msk.bf16.mxu0 %vm625_vm4, %v8340_v7  ;;  %v1621_v7 = vshll.u32 %v8883_v26, 16  ;;  %v1625_v14 = vshrl.u32 %v8883_v26, 16 }
  0x95   : > { %8271 = vmatprep.subr.msk.bf16.mxu0 %vm656_vm0, %v8838_v45  ;;  %v1581_v37 = vrot.slane %v1580_v6, 4  ;;  %v6890_v6 = vld [vmem:[%s8521_s10 + $0x54] sm:$0xf] }
  0x96   : > { %v1627_v34 = vrot.slane %v1625_v14, 4  ;;  %v1651_v14 = vrot.slane %v1649_v53, 4  ;;  %v1684_v38 = vshrl.u32 %v6890_v6, 16  ;;  %v1687_v3 = vshll.u32 %v6890_v6, 16 }
  0x97   : > { %v1586_v61 = vsel %vm8556_vm3, %v1581_v37, %v1585_v24  ;;  %v1633_v24 = vrot.slane %v1631_v55, 5  ;;  %v1655_v37 = vshll.u32 %v8927_v16, 16 }
  0x9b   : > { %7622 = vmatmul.mubr.msk.bf16.gmra.mrb[4].mxu0 %vm625_vm4, %v8341_v20  ;;  %v8891_v20 = vrot.slane %v1597_v58, 5  ;;  %v8347_v58 = vld [vmem:[%s8521_s10 + $0x78] sm:$0xff]  }
  0x9c   : > { %7625 = vmatprep.mubr.msk.bf16.mxu0 %vm625_vm4, %v8342_v21  ;;  %v1603_v21 = vrot.slane %v1601_v59, 4  ;;  %v6903_v59 = vcombine.low %v1552_v23, %v1562_v31  ;;  %v1619_v23 = vrot.slane %v1618_v12, 4  ;;  %v8957_v12 = vrot.slane %v1669_v28, 5 }
  0xa3   : > { %7626 = vmatmul.mubr.msk.bf16.gmra.mrb[8].mxu0 %vm625_vm4, %v8343_v40  ;;  %v8909_v40 = vrot.slane %v1621_v7, 5  ;;  %v8933_v7 = vrot.slane %v1645_v52, 5  ;;  %v6904_v52 = vcombine.low %v1576_v60, %v1586_v61  ;;  %v1657_v60 = vrot.slane %v1655_v37, 5 }
  0xa4   : > { %7629 = vmatprep.mubr.msk.bf16.mxu0 %vm625_vm4, %v8344_v42  ;;  %v1604_v42 = vor.u32 %v1603_v21, %v8891_v20  ;;  %v1663_v21 = vshll.u32 %v6887_v56, 16 }
  0xa5   : > { %v1628_v19 = vor.u32 %v1627_v34, %v8909_v40  ;;  %v1697_v34 = vshrl.u32 %v8936_v54, 16  ;;  %v1652_v43 = vor.u32 %v1651_v14, %v8933_v7  ;;  %v1624_v53 = vsel %vm8556_vm3, %v1619_v23, %v8909_v40 }
  0xa6   : > { %v1605_v63 = vrot.slane %v1604_v42, 4  ;;  %v1642_v42 = vor.u32 %v1641_v2, %v1638_v1  ;;  %v1665_v48 = vrot.slane %v1663_v21, 5  ;;  %v2150_v21 = vsel %vm656_vm0, %v8838_v45, 0 }
  0xa7   : > { %v1629_v31 = vrot.slane %v1628_v19, 4  ;;  %v1689_v19 = vrot.slane %v1687_v3, 5  ;;  %v1699_v40 = vrot.slane %v1697_v34, 4  ;;  %v1653_v2 = vrot.slane %v1652_v43, 4  ;;  %v8982_v3 = vld [vmem:[%s10476_s1 + $0xc] sm:$0x3] }
  0xa8   : > { %v1610_v13 = vsel %vm8556_vm3, %v1605_v63, %v1609_v44  ;;  %v6893_v44 = vld [vmem:[%s8521_s10 + $0x60] sm:$0xf]  ;;  %v1643_v1 = vrot.slane %v1642_v42, 4 }
  0xa9   : > { %v1634_v55 = vsel %vm8556_vm3, %v1629_v31, %v1633_v24  ;;  %v6896_v24 = vld [vmem:[%s8521_s10 + $0x6c] sm:$0xf]  ;;  %v1711_v45 = vshll.u32 %v6893_v44, 16  ;;  %v1658_v42 = vsel %vm8556_vm3, %v1653_v2, %v1657_v60  ;;  %v8999_v60 = vld [vmem:[%s8521_s10 + $0x68] sm:$0x1] }
  0xaa   : > { %v6906_v23 = vcombine.low %v1624_v53, %v1634_v55  ;;  %v1648_v34 = vsel %vm8556_vm3, %v1643_v1, %v8933_v7 }
  0xab   : > { %7630 = vmatmul.mubr.msk.bf16.gmra.mrb[12].mxu0 %vm625_vm4, %v8345_v17  ;;  %v1660_v17 = vshrl.u32 %v6887_v56, 16  ;;  %v1675_v56 = vrot.slane %v1673_v32, 4  ;;  %v1708_v32 = vshrl.u32 %v6893_v44, 16  ;;  %v6907_v2 = vcombine.low %v1648_v34, %v1658_v42 }
  0xac   : > { %7633 = vmatprep.mubr.msk.bf16.mxu0 %vm625_vm4, %v8346_v22  ;;  %v1600_v22 = vsel %vm8556_vm3, %v1595_v10, %v8891_v20  ;;  %v1693_v20 = vshll.u32 %v8936_v54, 16  ;;  %v8955_v10 = vld [vmem:[%s8521_s10 + $0x50] sm:$0x1]  ;;  %v1765_v42 = vshll.u32 %v9003_v46, 16 }
  0xad   : > { %v1662_v47 = vrot.slane %v1660_v17, 4  ;;  %v6905_v63 = vcombine.low %v1600_v22, %v1610_v13  ;;  %v1679_v14 = vshll.u32 %v8955_v10, 16  ;;  %v8969_v17 = vld [vmem:[%s8521_s10 + $0x64] sm:$0xf]  ;;  %v1676_v22 = vor.u32 %v1675_v56, %v8957_v12 }
  0xae   : > { %v8964_v61 = vrot.slane %v1693_v20, 5  ;;  %v1717_v37 = vshll.u32 %v8969_v17, 16  ;;  %v1721_v20 = vshrl.u32 %v8969_v17, 16  ;;  %v1710_v7 = vrot.slane %v1708_v32, 4  ;;  %v9012_v32 = vld [vmem:[%s8521_s10 + $0x74] sm:$0x1] }
  0xaf   : > { %v1666_v6 = vor.u32 %v1665_v48, %v1662_v47  ;;  %v1681_v47 = vrot.slane %v1679_v14, 5  ;;  %v1732_v48 = vshrl.u32 %v6896_v24, 16  ;;  %v1677_v56 = vrot.slane %v1676_v22, 4 }
  0xb0   : > { %v1700_v13 = vor.u32 %v1699_v40, %v8964_v61  ;;  %v1713_v40 = vrot.slane %v1711_v45, 5  ;;  %v1719_v44 = vrot.slane %v1717_v37, 5  ;;  %v1723_v1 = vrot.slane %v1721_v20, 4 }
  0xb1   : > { %v1667_v43 = vrot.slane %v1666_v6, 4  ;;  %v6899_v6 = vld [vmem:[%s8521_s10 + $0x78] sm:$0xf]  ;;  %v1734_v14 = vrot.slane %v1732_v48, 4  ;;  %v1751_v48 = vshll.u32 %v9012_v32, 16 }
  0xb2   : > { %v1714_v37 = vor.u32 %v1713_v40, %v1710_v7  ;;  %v1724_v20 = vor.u32 %v1723_v1, %v1719_v44  ;;  %v1759_v34 = vshll.u32 %v6899_v6, 16  ;;  %v1767_v7 = vrot.slane %v1765_v42, 5 }
  0xb3   : > { %7634 = vmatmul.mubr.msk.bf16.gmra.mrb[16].mxu0 %vm625_vm4, %v8347_v58  ;;  %v8962_v58 = vld [vmem:[%s8521_s10 + $0x5c] sm:$0x1]  ;;  %v1672_v22 = vsel %vm8556_vm3, %v1667_v43, %v8957_v12  ;;  %v1756_v12 = vshrl.u32 %v6899_v6, 16  ;;  %v1769_v43 = vshrl.u32 %v9003_v46, 16  ;;  %v9025_v6 = vld [vmem:[%s8521_s10 + $0x80] sm:$0x1] }
  0xb4   : > { %7639 = vmatprep.mubr.msk.bf16.mxu0 %vm625_vm4, %v6903_v59  ;;  %v1686_v59 = vrot.slane %v1684_v38, 4  ;;  %v1703_v31 = vshll.u32 %v8962_v58, 16  ;;  %v8977_v38 = vld [vmem:[%s8521_s10 + $0x70] sm:$0xf] }
  0xb5   : > { %v1741_v53 = vshll.u32 %v8977_v38, 16  ;;  %v1745_v55 = vshrl.u32 %v8977_v38, 16 }
  0xb6   : > { %v1690_v28 = vor.u32 %v1689_v19, %v1686_v59  ;;  %v1705_v19 = vrot.slane %v1703_v31, 5  ;;  %v1727_v31 = vshll.u32 %v8999_v60, 16 }
  0xb7   : > { %v1747_v57 = vrot.slane %v1745_v55, 4  ;;  %v1725_v55 = vrot.slane %v1724_v20, 4 }
  0xb8   : > { %v1691_v59 = vrot.slane %v1690_v28, 4  ;;  %v1682_v28 = vsel %vm8556_vm3, %v1677_v56, %v1681_v47  ;;  %v1729_v56 = vrot.slane %v1727_v31, 5 }
  0xbb   : > { %7640 = vmatmul.mubr.msk.bf16.vlgmr.msra.gmra.mrb[0].mxu0 %vm625_vm4, %v6904_v52  ;;  %v1735_v52 = vshll.u32 %v6896_v24, 16  ;;  %v1743_v24 = vrot.slane %v1741_v53, 5  ;;  %v1715_v53 = vrot.slane %v1714_v37, 4  ;;  %v6923_v37 = vld [vmem:[%s8521_s10 + $0xc] sm:$0xe] }
  0xbc   : > { %7660 = vmatpush3.bf16.msra.mxu0 %v2150_v21  ;;  %7643 = vmatprep.mubr.msk.bf16.mxu0 %vm625_vm4, %v6905_v63  ;;  %v1701_v63 = vrot.slane %v1700_v13, 4  ;;  %v1696_v13 = vsel %vm8556_vm3, %v1691_v59, %v8964_v61  ;;  %v1758_v59 = vrot.slane %v1756_v12, 4 }
  0xbd   : > { %8272 = vmatprep.subr.msk.bf16.mxu0 %vm656_vm0, %v8982_v3  ;;  %v1737_v21 = vrot.slane %v1735_v52, 5  ;;  %v6908_v52 = vcombine.low %v1672_v22, %v1682_v28  ;;  %v1775_v28 = vshll.u32 %v9025_v6, 16 }
  0xbe   : > { %v1706_v45 = vsel %vm8556_vm3, %v1701_v63, %v1705_v19  ;;  %v1761_v19 = vrot.slane %v1759_v34, 5  ;;  %v1771_v63 = vrot.slane %v1769_v43, 4  ;;  %v6933_v43 = vrot.slane %v6923_v37, 9 }
  0xbf   : > { %v1738_v47 = vor.u32 %v1737_v21, %v1734_v14  ;;  %v6909_v61 = vcombine.low %v1696_v13, %v1706_v45  ;;  %v1730_v14 = vsel %vm8556_vm3, %v1725_v55, %v1729_v56  ;;  %v2019_v45 = vrot.slane %v8844_v33, 5  ;;  %v6925_v55 = vld [vmem:[%s8521_s10 + $0x24] sm:$0xe] }
  0xc0   : > { %v1762_v21 = vor.u32 %v1761_v19, %v1758_v59  ;;  %v1772_v22 = vor.u32 %v1771_v63, %v1767_v7  ;;  %v1777_v42 = vrot.slane %v1775_v28, 5  ;;  %v2029_v63 = vrot.slane %v8874_v51, 5 }
  0xc1   : > { %v1739_v40 = vrot.slane %v1738_v47, 4  ;;  %v2021_v47 = vrot.slane %v2019_v45, 4 }
  0xc2   : > { %v1763_v12 = vrot.slane %v1762_v21, 4  ;;  %v1773_v34 = vrot.slane %v1772_v22, 4  ;;  %v2043_v22 = vrot.slane %v8907_v4, 5  ;;  %v549_v4 = vshll.u32 %v8748_v8, 16 }
  0xc3   : > { %7644 = vmatmul.mubr.msk.bf16.gmra.mrb[4].mxu0 %vm625_vm4, %v6906_v23  ;;  %v1748_v23 = vor.u32 %v1747_v57, %v1743_v24  ;;  %v1720_v57 = vsel %vm8556_vm3, %v1715_v53, %v1719_v44  ;;  %v1744_v31 = vsel %vm8556_vm3, %v1739_v40, %v1743_v24  ;;  %v2033_v53 = vrot.slane %v8871_v49, 5 }
  0xc4   : > { %7647 = vmatprep.mubr.msk.bf16.mxu0 %vm625_vm4, %v6907_v2  ;;  %v1753_v2 = vrot.slane %v1751_v48, 5  ;;  %v6910_v44 = vcombine.low %v1720_v57, %v1730_v14  ;;  %v1768_v24 = vsel %vm8556_vm3, %v1763_v12, %v1767_v7  ;;  %v1778_v33 = vsel %vm8556_vm3, %v1773_v34, %v1777_v42 }
  0xc5   : > { %v1749_v1 = vrot.slane %v1748_v23, 4  ;;  %v2022_v23 = vrot.slane %v8861_v36, 5  ;;  %v2026_v48 = vrot.slane %v8855_v30, 5  ;;  %v6924_v36 = vld [vmem:[%s8521_s10 + $0x18] sm:$0xe]  ;;  %v6912_v56 = vcombine.low %v1768_v24, %v1778_v33 }
  0xc6   : > { %v6934_v19 = vrot.slane %v6924_v36, 9  ;;  %v6935_v40 = vrot.slane %v6925_v55, 9  ;;  %v2036_v30 = vrot.slane %v8898_v25, 5  ;;  %v2040_v57 = vrot.slane %v8883_v26, 5  ;;  %v9094_v36 = vld [vmem:[%s10476_s1 + $0xe] sm:$0x3] }
  0xc7   : > { %v1754_v13 = vsel %vm8556_vm3, %v1749_v1, %v1753_v2  ;;  %v2028_v7 = vrot.slane %v2026_v48, 4  ;;  %v2035_v1 = vrot.slane %v2033_v53, 4  ;;  %v6926_v2 = vld [vmem:[%s8521_s10 + $0x30] sm:$0xe]  ;;  %v522_v14 = vshrl.u32 %v8742_v50, 16 }
  0xc8   : > { %v6911_v20 = vcombine.low %v1744_v31, %v1754_v13  ;;  %v2027_v49 = vsel %vm8657_vm7, %v6934_v19, %v2026_v48  ;;  %v6936_v21 = vrot.slane %v6926_v2, 9  ;;  %v2034_v25 = vsel %vm8657_vm7, %v6935_v40, %v2033_v53  ;;  %v6927_v31 = vld [vmem:[%s8521_s10 + $0x3c] sm:$0xe] }
  0xc9   : > { %v2030_v51 = vsel %vm8657_vm7, %v2028_v7, %v2029_v63  ;;  %v2037_v26 = vsel %vm8657_vm7, %v2035_v1, %v2036_v30  ;;  %v2042_v28 = vrot.slane %v2040_v57, 4  ;;  %v2047_v13 = vrot.slane %v8904_v5, 5  ;;  %v6929_v7 = vld [vmem:[%s8521_s10 + $0x54] sm:$0xe] }
  0xca   : > { %v524_v37 = vrot.slane %v522_v14, 4  ;;  %v546_v12 = vshrl.u32 %v8748_v8, 16  ;;  %v570_v34 = vshrl.u32 %v8760_v39, 16  ;;  %v573_v42 = vshll.u32 %v8760_v39, 16 }
  0xcb   : > { %7648 = vmatmul.mubr.msk.bf16.gmra.mrb[8].mxu0 %vm625_vm4, %v6908_v52  ;;  %v2020_v52 = vsel %vm8657_vm7, %v6933_v43, %v2019_v45  ;;  %v6928_v45 = vld [vmem:[%s8521_s10 + $0x48] sm:$0xe]  ;;  %v6945_v43 = vcombine.low %v2027_v49, %v2030_v51  ;;  %v6937_v5 = vrot.slane %v6927_v31, 9  ;;  %v2044_v33 = vsel %vm8657_vm7, %v2042_v28, %v2043_v22 }
  0xcc   : > { %7651 = vmatprep.mubr.msk.bf16.mxu0 %vm625_vm4, %v6909_v61  ;;  %v2023_v61 = vsel %vm8657_vm7, %v2021_v47, %v2022_v23  ;;  %v2389_v47 = vsel %vm656_vm0, %v8982_v3, 0  ;;  %v6946_v23 = vcombine.low %v2034_v25, %v2037_v26  ;;  %v6938_v24 = vrot.slane %v6928_v45, 9  ;;  %v6930_v45 = vld [vmem:[%s8521_s10 + $0x60] sm:$0xe] }
  0xcd   : > { %v6944_v59 = vcombine.low %v2020_v52, %v2023_v61  ;;  %v2049_v48 = vrot.slane %v2047_v13, 4  ;;  %v2050_v8 = vrot.slane %v8927_v16, 5  ;;  %v9087_v61 = vrot.slane %v546_v12, 4 }
  0xce   : > { %v559_v39 = vshrl.u32 %v8751_v15, 16  ;;  %v2054_v3 = vrot.slane %v8930_v62, 5  ;;  %v9096_v53 = vrot.slane %v549_v4, 5  ;;  %v9098_v55 = vrot.slane %v570_v34, 4 }
  0xcf   : > { %v583_v16 = vshrl.u32 %v8763_v18, 16  ;;  %v2048_v62 = vsel %vm8657_vm7, %v6937_v5, %v2047_v13  ;;  %v498_v63 = vshrl.u32 %v8730_v9, 16  ;;  %v2051_v40 = vsel %vm8657_vm7, %v2049_v48, %v2050_v8 }
  0xd0   : > { %v9109_v19 = vsel %vm8657_vm7, %v6938_v24, %v2054_v3  ;;  %v2061_v1 = vrot.slane %v8936_v54, 5  ;;  %v501_v30 = vshll.u32 %v8730_v9, 16  ;;  %v507_v2 = vshll.u32 %v8733_v11, 16 }
  0xd1   : > { %v2057_v14 = vrot.slane %v8955_v10, 5  ;;  %v500_v49 = vrot.slane %v498_v63, 4  ;;  %v511_v51 = vshrl.u32 %v8733_v11, 16  ;;  %v2064_v22 = vrot.slane %v8962_v58, 5 }
  0xd2   : > { %v503_v25 = vrot.slane %v501_v30, 5  ;;  %v509_v26 = vrot.slane %v507_v2, 5  ;;  %v6948_v54 = vcombine.low %v2048_v62, %v2051_v40  ;;  %v2068_v28 = vrot.slane %v8969_v17, 5  ;;  %v10491_v2 = vld [vmem:[#allocation3_spill] sm:$0xff] }
  0xd3   : > { %7652 = vmatmul.mubr.msk.bf16.gmra.mrb[12].mxu0 %vm625_vm4, %v6910_v44  ;;  %v525_v44 = vshll.u32 %v8742_v50, 16  ;;  %v2041_v50 = vsel %vm8657_vm7, %v6936_v21, %v2040_v57  ;;  %v2056_v57 = vrot.slane %v2054_v3, 4  ;;  %v6939_v21 = vrot.slane %v6929_v7, 9 }
  0xd4   : > { %7655 = vmatprep.mubr.msk.bf16.mxu0 %vm625_vm4, %v6911_v20  ;;  %v535_v20 = vshrl.u32 %v8745_v0, 16  ;;  %v513_v31 = vrot.slane %v511_v51, 4  ;;  %v517_v13 = vshll.u32 %v8785_v35, 16  ;;  %v2063_v9 = vrot.slane %v2061_v1, 4 }
  0xd5   : > { %v527_v52 = vrot.slane %v525_v44, 5  ;;  %v504_v44 = vor.u32 %v503_v25, %v500_v49  ;;  %v531_v10 = vshll.u32 %v8745_v0, 16  ;;  %v541_v58 = vshll.u32 %v8797_v41, 16  ;;  %v6931_v0 = vld [vmem:[%s8521_s10 + $0x6c] sm:$0xe] }
  0xd6   : > { %v514_v4 = vor.u32 %v513_v31, %v509_v26  ;;  %v519_v11 = vrot.slane %v517_v13, 5  ;;  %v537_v34 = vrot.slane %v535_v20, 4  ;;  %v2058_v17 = vsel %vm8657_vm7, %v2056_v57, %v2057_v14  ;;  %v6932_v25 = vld [vmem:[%s8521_s10 + $0x78] sm:$0xe] }
  0xd7   : > { %v528_v12 = vor.u32 %v527_v52, %v524_v37  ;;  %v533_v35 = vrot.slane %v531_v10, 5  ;;  %v2062_v37 = vsel %vm8657_vm7, %v6939_v21, %v2061_v1  ;;  %v2065_v41 = vsel %vm8657_vm7, %v2063_v9, %v2064_v22 }
  0xd8   : > { %v515_v20 = vrot.slane %v514_v4, 4  ;;  %v2070_v48 = vrot.slane %v2068_v28, 4  ;;  %v2071_v8 = vrot.slane %v8999_v60, 5  ;;  %v6941_v3 = vrot.slane %v6931_v0, 9  ;;  %v8349_v0 = vld [vmem:[%s8521_s10 + $0x24] sm:$0xff]  }
  0xd9   : > { %v538_v24 = vor.u32 %v537_v34, %v533_v35  ;;  %v6950_v7 = vcombine.low %v2062_v37, %v2065_v41  ;;  %v2078_v40 = vrot.slane %v9012_v32, 5  ;;  %v552_v1 = vor.u32 %v9096_v53, %v9087_v61  ;;  %v9202_v41 = vld [vmem:[%s10476_s1 + $0x10] sm:$0x3] }
  0xda   : > { %v520_v52 = vsel %vm8556_vm3, %v515_v20, %v519_v11  ;;  %v561_v30 = vrot.slane %v559_v39, 4  ;;  %v565_v57 = vshll.u32 %v10491_v2, 16  ;;  %v2082_v32 = vrot.slane %v9003_v46, 5 }
  0xdb   : > { %7656 = vmatmul.mubr.msk.bf16.gmra.mrb[16].mxu0 %vm625_vm4, %v6912_v56  ;;  %v9100_v56 = vrot.slane %v573_v42, 5  ;;  %v505_v42 = vrot.slane %v504_v44, 4  ;;  %v539_v62 = vrot.slane %v538_v24, 4  ;;  %v2072_v53 = vsel %vm8657_vm7, %v2070_v48, %v2071_v8  ;;  %v7005_v24 = vld [vmem:[%s8521_s10 + $0x18] sm:$0xf] }
  0xdc   : > { %7661 = vmatprep.mubr.msk.bf16.mxu0 %vm625_vm4, %v6944_v59  ;;  %v6947_v59 = vcombine.low %v2041_v50, %v2044_v33  ;;  %v543_v50 = vrot.slane %v541_v58, 5  ;;  %v6949_v33 = vcombine.low %v9109_v19, %v2058_v17  ;;  %v555_v19 = vshll.u32 %v8751_v15, 16 }
  0xdd   : > { %v510_v5 = vsel %vm8556_vm3, %v505_v42, %v509_v26  ;;  %v576_v61 = vor.u32 %v9100_v56, %v9098_v55  ;;  %v553_v51 = vrot.slane %v552_v1, 4  ;;  %v579_v39 = vshll.u32 %v8763_v18, 16  ;;  %v10492_v56 = vld [vmem:[#allocation4_spill] sm:$0xff]  ;;  %v7011_v1 = vld [vmem:[%s8521_s10 + $0x30] sm:$0xf] }
  0xde   : > { %v544_v60 = vsel %vm8556_vm3, %v539_v62, %v543_v50  ;;  %v557_v15 = vrot.slane %v555_v19, 5  ;;  %v585_v55 = vrot.slane %v583_v16, 4  ;;  %v589_v22 = vshll.u32 %v10492_v56, 16  ;;  %v8352_v50 = vld [vmem:[%s8521_s10 + $0x48] sm:$0xff]   ;;  %v9242_v56 = vld [vmem:[%s8521_s10 + $0x40] sm:$0xf] }
  0xdf   : > { %v581_v31 = vrot.slane %v579_v39, 5  ;;  %v6942_v4 = vrot.slane %v6932_v25, 9  ;;  %v2084_v11 = vrot.slane %v2082_v32, 4  ;;  %v2085_v18 = vrot.slane %v9025_v6, 5 }
  0xe0   : > { %v562_v26 = vor.u32 %v561_v30, %v557_v15  ;;  %v558_v9 = vsel %vm8556_vm3, %v553_v51, %v557_v15  ;;  %v2857_v20 = vsel %vm656_vm0, %v9094_v36, 0  ;;  %v2555_v48 = vshrl.u32 %v7005_v24, 16 }
  0xe1   : > { %v586_v44 = vor.u32 %v585_v55, %v581_v31  ;;  %v2083_v6 = vsel %vm8657_vm7, %v6942_v4, %v2082_v32  ;;  %v2558_v8 = vshll.u32 %v7005_v24, 16  ;;  %v9233_v32 = vld [vmem:[%s8521_s10 + $0x20] sm:$0x1]  ;;  %v2603_v51 = vshrl.u32 %v7011_v1, 16  ;;  %v7014_v55 = vld [vmem:[%s8521_s10 + $0x3c] sm:$0xf] }
  0xe2   : > { %v2606_v15 = vshll.u32 %v7011_v1, 16  ;;  %v2574_v25 = vshll.u32 %v9233_v32, 16 }
  0xe3   : > { %7662 = vmatmul.mubr.msk.bf16.vlgmr.msra.gmra.mrb[0].mxu0 %vm625_vm4, %v6945_v43  ;;  %v529_v43 = vrot.slane %v528_v12, 4  ;;  %v591_v12 = vrot.slane %v589_v22, 5  ;;  %v587_v58 = vrot.slane %v586_v44, 4  ;;  %v2640_v44 = vshrl.u32 %v9242_v56, 16 }
  0xe4   : > { %7682 = vmatpush3.bf16.msra.mxu0 %v2389_v47  ;;  %7665 = vmatprep.mubr.msk.bf16.mxu0 %vm625_vm4, %v6946_v23  ;;  %v6940_v47 = vrot.slane %v6930_v45, 9  ;;  %v2075_v23 = vrot.slane %v8977_v38, 5  ;;  %v563_v45 = vrot.slane %v562_v26, 4 }
  0xe5   : > { %8273 = vmatprep.subr.msk.bf16.mxu0 %vm656_vm0, %v9094_v36  ;;  %v534_v38 = vsel %vm8556_vm3, %v529_v43, %v533_v35  ;;  %v592_v42 = vsel %vm8556_vm3, %v587_v58, %v591_v12  ;;  %v2086_v43 = vsel %vm8657_vm7, %v2084_v11, %v2085_v18  ;;  %v9212_v36 = vld [vmem:[%s8521_s10 + $0x1c] sm:$0xf]  ;;  %v2605_v12 = vrot.slane %v2603_v51, 4  ;;  %v8355_v18 = vld [vmem:[%s8521_s10 + $0x6c] sm:$0xff]  }
  0xe6   : > { %v2077_v63 = vrot.slane %v2075_v23, 4  ;;  %v2069_v14 = vsel %vm8657_vm7, %v6940_v47, %v2068_v28  ;;  %v6767_v49 = vcombine.low %v534_v38, %v544_v60  ;;  %v2076_v21 = vsel %vm8657_vm7, %v6941_v3, %v2075_v23  ;;  %v8348_v47 = vld [vmem:[%s8521_s10 + $0x18] sm:$0xff]   ;;  %v8350_v23 = vld [vmem:[%s8521_s10 + $0x30] sm:$0xff]  }
  0xe7   : > { %v577_v28 = vrot.slane %v576_v61, 4  ;;  %v6951_v13 = vcombine.low %v2069_v14, %v2072_v53  ;;  %v6953_v37 = vcombine.low %v2083_v6, %v2086_v43  ;;  %v2568_v3 = vshrl.u32 %v9212_v36, 16  ;;  %v8354_v14 = vld [vmem:[%s8521_s10 + $0x60] sm:$0xff]   ;;  %v9236_v53 = vld [vmem:[%s8521_s10 + $0x2c] sm:$0x1]  ;;  %v8356_v6 = vld [vmem:[%s8521_s10 + $0x78] sm:$0xff]  }
  0xe8   : > { %v2079_v46 = vsel %vm8657_vm7, %v2077_v63, %v2078_v40  ;;  %v2557_v63 = vrot.slane %v2555_v48, 4  ;;  %v2560_v40 = vrot.slane %v2558_v8, 5  ;;  %v2576_v58 = vrot.slane %v2574_v25, 5  ;;  %v9272_v48 = vld [vmem:[%s8521_s10 + $0x44] sm:$0x1] }
  0xe9   : > { %v6952_v10 = vcombine.low %v2076_v21, %v2079_v46  ;;  %v582_v34 = vsel %vm8556_vm3, %v577_v28, %v581_v31  ;;  %v2570_v19 = vrot.slane %v2568_v3, 4  ;;  %v2598_v31 = vshll.u32 %v9236_v53, 16  ;;  %v9288_v51 = vld [vmem:[%s8521_s10 + $0x50] sm:$0x1] }
  0xea   : > { %v6769_v35 = vcombine.low %v582_v34, %v592_v42  ;;  %v2561_v39 = vor.u32 %v2560_v40, %v2557_v63  ;;  %v9258_v42 = vld [vmem:[%s8521_s10 + $0x38] sm:$0x1]  ;;  %v7020_v40 = vld [vmem:[%s8521_s10 + $0x54] sm:$0xf] }
  0xeb   : > { %7666 = vmatmul.mubr.msk.bf16.gmra.mrb[4].mxu0 %vm625_vm4, %v6947_v59  ;;  %v6766_v59 = vcombine.low %v510_v5, %v520_v52  ;;  %v8351_v5 = vld [vmem:[%s8521_s10 + $0x3c] sm:$0xff]   ;;  %v2564_v52 = vshll.u32 %v9212_v36, 16 }
  0xec   : > { %7669 = vmatprep.mubr.msk.bf16.mxu0 %vm625_vm4, %v6948_v54  ;;  %v567_v54 = vrot.slane %v565_v57, 5  ;;  %v9229_v57 = vld [vmem:[%s8521_s10 + $0x34] sm:$0xf] }
  0xed   : > { %7563 = vmatprep.mubr.msk.bf16.mxu1 %vm625_vm4, %v6766_v59  ;;  %v9220_v59 = vld [vmem:[%s8521_s10 + $0x28] sm:$0xf]  ;;  %v9224_v60 = vrot.slane %v2564_v52, 5  ;;  %v2612_v21 = vshll.u32 %v9229_v57, 16  ;;  %v2616_v46 = vshrl.u32 %v9229_v57, 16 }
  0xee   : > { %7564 = vmatmul.mubr.msk.bf16.vlgmr.msra.gmra.mrb[0].mxu1 %vm625_vm4, %v6767_v49  ;;  %v568_v16 = vsel %vm8556_vm3, %v563_v45, %v567_v54  ;;  %v2588_v30 = vshll.u32 %v9220_v59, 16  ;;  %v2592_v2 = vshrl.u32 %v9220_v59, 16  ;;  %v2636_v45 = vshll.u32 %v9242_v56, 16 }
  0xef   : > { %v6768_v17 = vcombine.low %v558_v9, %v568_v16  ;;  %v2571_v22 = vor.u32 %v2570_v19, %v9224_v60  ;;  %v2630_v9 = vshll.u32 %v7014_v55, 16  ;;  %v9253_v4 = vrot.slane %v2612_v21, 5 }
  0xf0   : > { %v9247_v26 = vrot.slane %v2588_v30, 5  ;;  %v2594_v54 = vrot.slane %v2592_v2, 4  ;;  %v2618_v11 = vrot.slane %v2616_v46, 4  ;;  %v2562_v16 = vrot.slane %v2561_v39, 4  ;;  %v8357_v30 = vld [vmem:[%s8521_s10 + $0x84] sm:$0xff]  }
  0xf1   : > { %7567 = vmatprep.mubr.msk.bf16.mxu1 %vm625_vm4, %v6768_v17  ;;  %v2572_v34 = vrot.slane %v2571_v22, 4  ;;  %v9297_v46 = vld [vmem:[%s8521_s10 + $0x58] sm:$0xf]  ;;  %v7023_v22 = vld [vmem:[%s8521_s10 + $0x60] sm:$0xf] }
  0xf2   : > { %v2595_v17 = vor.u32 %v2594_v54, %v9247_v26  ;;  %v2567_v8 = vsel %vm8556_vm3, %v2562_v16, %v9224_v60  ;;  %v2646_v60 = vshll.u32 %v9272_v48, 16 }
  0xf3   : > { %7670 = vmatmul.mubr.msk.bf16.gmra.mrb[8].mxu0 %vm625_vm4, %v6949_v33  ;;  %v7008_v33 = vld [vmem:[%s8521_s10 + $0x24] sm:$0xf]  ;;  %v2577_v52 = vsel %vm8556_vm3, %v2572_v34, %v2576_v58 }
  0xf4   : > { %7673 = vmatprep.mubr.msk.bf16.mxu0 %vm625_vm4, %v6950_v7  ;;  %v2579_v38 = vshrl.u32 %v7008_v33, 16  ;;  %v2582_v62 = vshll.u32 %v7008_v33, 16  ;;  %v8353_v7 = vld [vmem:[%s8521_s10 + $0x54] sm:$0xff]   ;;  %v2622_v33 = vshll.u32 %v9258_v42, 16  ;;  %v2596_v3 = vrot.slane %v2595_v17, 4 }
  0xf5   : > { %v7036_v2 = vcombine.low %v2567_v8, %v2577_v52 }
  0xf6   : > { %7568 = vmatmul.mubr.msk.bf16.gmra.mrb[4].mxu1 %vm625_vm4, %v6769_v35  ;;  %v2581_v49 = vrot.slane %v2579_v38, 4  ;;  %v2584_v61 = vrot.slane %v2582_v62, 5  ;;  %v7017_v35 = vld [vmem:[%s8521_s10 + $0x48] sm:$0xf] }
  0xf7   : > { %v2651_v38 = vshrl.u32 %v7017_v35, 16  ;;  %v2654_v62 = vshll.u32 %v7017_v35, 16 }
  0xf8   : > { %v2585_v28 = vor.u32 %v2584_v61, %v2581_v49  ;;  %v2624_v61 = vrot.slane %v2622_v33, 5 }
  0xf9   : > { %v2653_v21 = vrot.slane %v2651_v38, 4  ;;  %v2656_v25 = vrot.slane %v2654_v62, 5  ;;  %v9329_v38 = vld [vmem:[%s8521_s10 + $0x68] sm:$0x1] }
  0xfa   : > { %v9261_v43 = vrot.slane %v2585_v28, 4 }
  0xfb   : > { %7674 = vmatmul.mubr.msk.bf16.gmra.mrb[12].mxu0 %vm625_vm4, %v6951_v13  ;;  %v2627_v13 = vshrl.u32 %v7014_v55, 16  ;;  %v2675_v55 = vshrl.u32 %v7020_v40, 16 }
  0xfc   : > { %7677 = vmatprep.mubr.msk.bf16.mxu0 %vm625_vm4, %v6952_v10  ;;  %v2608_v10 = vrot.slane %v2606_v15, 5  ;;  %v2591_v15 = vsel %vm8556_vm3, %v9261_v43, %v9247_v26  ;;  %v2670_v26 = vshll.u32 %v9288_v51, 16 }
  0xfd   : > { %v2677_v35 = vrot.slane %v2675_v55, 4 }
  0xfe   : > { %v2609_v24 = vor.u32 %v2608_v10, %v2605_v12  ;;  %v2684_v12 = vshll.u32 %v9297_v46, 16  ;;  %v2688_v10 = vshrl.u32 %v9297_v46, 16 }
 0x103   : > { %7678 = vmatmul.mubr.msk.bf16.gmra.mrb[16].mxu0 %vm625_vm4, %v6953_v37  ;;  %v2629_v37 = vrot.slane %v2627_v13, 4  ;;  %v9303_v13 = vld [vmem:[%s8521_s10 + $0x64] sm:$0xf] }
 0x104   : > { %7683 = vmatprep.mubr.msk.bf16.mxu0 %vm625_vm4, %v8348_v47  ;;  %v2632_v47 = vrot.slane %v2630_v9, 5  ;;  %v2708_v58 = vshll.u32 %v9303_v13, 16  ;;  %v2712_v17 = vshrl.u32 %v9303_v13, 16 }
 0x106   : > { %v2633_v1 = vor.u32 %v2632_v47, %v2629_v37  ;;  %v9331_v62 = vrot.slane %v2708_v58, 5 }
 0x108   : > { %v2634_v9 = vrot.slane %v2633_v1, 4 }
 0x10b   : > { %7684 = vmatmul.mubr.msk.bf16.vlgmr.msra.gmra.mrb[0].mxu0 %vm625_vm4, %v8349_v0  ;;  %v9264_v0 = vrot.slane %v2636_v45, 5 }
 0x10c   : > { %7704 = vmatpush3.bf16.msra.mxu0 %v2857_v20  ;;  %7687 = vmatprep.mubr.msk.bf16.mxu0 %vm625_vm4, %v8350_v23  ;;  %v2642_v23 = vrot.slane %v2640_v44, 4  ;;  %v9267_v20 = vld [vmem:[%s8521_s10 + $0x4c] sm:$0xf]  ;;  %v2648_v44 = vrot.slane %v2646_v60, 5  ;;  %v9336_v60 = vld [vmem:[%s8521_s10 + $0x70] sm:$0xf] }
 0x10d   : > { %8274 = vmatprep.subr.msk.bf16.mxu0 %vm656_vm0, %v9202_v41  ;;  %v2664_v63 = vshrl.u32 %v9267_v20, 16 }
 0x10e   : > { %v2643_v19 = vor.u32 %v2642_v23, %v9264_v0  ;;  %v2672_v23 = vrot.slane %v2670_v26, 5 }
 0x10f   : > { %v2666_v28 = vrot.slane %v2664_v63, 4 }
 0x110   : > { %v2644_v45 = vrot.slane %v2643_v19, 4 }
 0x112   : > { %v2649_v47 = vsel %vm8556_vm3, %v2644_v45, %v2648_v44 }
 0x113   : > { %7688 = vmatmul.mubr.msk.bf16.gmra.mrb[4].mxu0 %vm625_vm4, %v8351_v5  ;;  %v2600_v5 = vrot.slane %v2598_v31, 5  ;;  %v2678_v31 = vshll.u32 %v7020_v40, 16 }
 0x114   : > { %7691 = vmatprep.mubr.msk.bf16.mxu0 %vm625_vm4, %v8352_v50  ;;  %v2619_v50 = vor.u32 %v2618_v11, %v9253_v4  ;;  %v2699_v11 = vshrl.u32 %v7023_v22, 16 }
 0x115   : > { %v2601_v39 = vsel %vm8556_vm3, %v2596_v3, %v2600_v5  ;;  %v2680_v37 = vrot.slane %v2678_v31, 5  ;;  %v9324_v5 = vld [vmem:[%s8521_s10 + $0x5c] sm:$0x1] }
 0x116   : > { %v2620_v49 = vrot.slane %v2619_v50, 4  ;;  %v2690_v50 = vrot.slane %v2688_v10, 4  ;;  %v2701_v33 = vrot.slane %v2699_v11, 4  ;;  %v7037_v52 = vcombine.low %v2591_v15, %v2601_v39  ;;  %v7029_v39 = vld [vmem:[%s8521_s10 + $0x78] sm:$0xf] }
 0x117   : > { %v2681_v1 = vor.u32 %v2680_v37, %v2677_v35  ;;  %v2694_v19 = vshll.u32 %v9324_v5, 16  ;;  %v2747_v44 = vshrl.u32 %v7029_v39, 16  ;;  %v2750_v26 = vshll.u32 %v7029_v39, 16  ;;  %v7032_v37 = vld [vmem:[%s8521_s10 + $0x84] sm:$0xf] }
 0x118   : > { %v2625_v34 = vsel %vm8556_vm3, %v2620_v49, %v2624_v61  ;;  %v2718_v61 = vshll.u32 %v9329_v38, 16 }
 0x119   : > { %v2696_v45 = vrot.slane %v2694_v19, 5  ;;  %v2774_v19 = vshll.u32 %v7032_v37, 16 }
 0x11b   : > { %7692 = vmatmul.mubr.msk.bf16.gmra.mrb[8].mxu0 %vm625_vm4, %v8353_v7  ;;  %v2660_v7 = vshll.u32 %v9267_v20, 16 }
 0x11c   : > { %7695 = vmatprep.mubr.msk.bf16.mxu0 %vm625_vm4, %v8354_v14  ;;  %v2610_v14 = vrot.slane %v2609_v24, 4  ;;  %v9326_v24 = vrot.slane %v2684_v12, 5 }
 0x11d   : > { %v9300_v54 = vrot.slane %v2660_v7, 5  ;;  %v7026_v7 = vld [vmem:[%s8521_s10 + $0x6c] sm:$0xf] }
 0x11e   : > { %v2615_v16 = vsel %vm8556_vm3, %v2610_v14, %v9253_v4  ;;  %v2639_v4 = vsel %vm8556_vm3, %v2634_v9, %v9264_v0  ;;  %v2714_v0 = vrot.slane %v2712_v17, 4  ;;  %v2691_v14 = vor.u32 %v2690_v50, %v9326_v24 }
 0x11f   : > { %v2667_v43 = vor.u32 %v2666_v28, %v9300_v54  ;;  %v7038_v3 = vcombine.low %v2615_v16, %v2625_v34  ;;  %v2723_v15 = vshrl.u32 %v7026_v7, 16  ;;  %v2736_v28 = vshrl.u32 %v9336_v60, 16 }
 0x120   : > { %v2715_v55 = vor.u32 %v2714_v0, %v9331_v62  ;;  %v2682_v9 = vrot.slane %v2681_v1, 4  ;;  %v2692_v11 = vrot.slane %v2691_v14, 4  ;;  %v2720_v16 = vrot.slane %v2718_v61, 5  ;;  %v9372_v0 = vld [vmem:[%s8521_s10 + $0x80] sm:$0x1] }
 0x121   : > { %v2668_v40 = vrot.slane %v2667_v43, 4  ;;  %v2725_v34 = vrot.slane %v2723_v15, 4  ;;  %v2738_v43 = vrot.slane %v2736_v28, 4  ;;  %v2766_v61 = vshll.u32 %v9372_v0, 16 }
 0x122   : > { %v2716_v58 = vrot.slane %v2715_v55, 4  ;;  %v2776_v28 = vrot.slane %v2774_v19, 5 }
 0x123   : > { %7696 = vmatmul.mubr.msk.bf16.gmra.mrb[12].mxu0 %vm625_vm4, %v8355_v18  ;;  %v2702_v18 = vshll.u32 %v7023_v22, 16  ;;  %v2726_v22 = vshll.u32 %v7026_v7, 16  ;;  %v2673_v31 = vsel %vm8556_vm3, %v2668_v40, %v2672_v23 }
 0x124   : > { %7699 = vmatprep.mubr.msk.bf16.mxu0 %vm625_vm4, %v8356_v6  ;;  %v2657_v6 = vor.u32 %v2656_v25, %v2653_v21  ;;  %v9344_v21 = vld [vmem:[%s8521_s10 + $0x7c] sm:$0xf]  ;;  %v2732_v25 = vshll.u32 %v9336_v60, 16 }
 0x125   : > { %v2704_v8 = vrot.slane %v2702_v18, 5  ;;  %v2756_v12 = vshll.u32 %v9344_v21, 16  ;;  %v2760_v10 = vshrl.u32 %v9344_v21, 16  ;;  %v2728_v17 = vrot.slane %v2726_v22, 5 }
 0x126   : > { %v2658_v63 = vrot.slane %v2657_v6, 4  ;;  %v2734_v6 = vrot.slane %v2732_v25, 5 }
 0x127   : > { %v2705_v49 = vor.u32 %v2704_v8, %v2701_v33  ;;  %v2758_v23 = vrot.slane %v2756_v12, 5  ;;  %v2762_v50 = vrot.slane %v2760_v10, 4  ;;  %v9363_v33 = vld [vmem:[%s8521_s10 + $0x88] sm:$0xf]  ;;  %v2687_v8 = vsel %vm8556_vm3, %v2682_v9, %v9326_v24 }
 0x128   : > { %v2729_v40 = vor.u32 %v2728_v17, %v2725_v34  ;;  %v2739_v1 = vor.u32 %v2738_v43, %v2734_v6  ;;  %v2771_v24 = vshrl.u32 %v7032_v37, 16  ;;  %v2784_v14 = vshrl.u32 %v9363_v33, 16  ;;  %v7056_v43 = vld [vmem:[%s8521_s10 + $0x18] sm:$0xe] }
 0x129   : > { %v2706_v18 = vrot.slane %v2705_v49, 4  ;;  %v3034_v17 = vrot.slane %v9212_v36, 5 }
 0x12a   : > { %v2730_v39 = vrot.slane %v2729_v40, 4  ;;  %v2740_v55 = vrot.slane %v2739_v1, 4  ;;  %v2773_v25 = vrot.slane %v2771_v24, 4  ;;  %v7057_v40 = vld [vmem:[%s8521_s10 + $0x24] sm:$0xe] }
 0x12b   : > { %7700 = vmatmul.mubr.msk.bf16.gmra.mrb[16].mxu0 %vm625_vm4, %v8357_v30  ;;  %v3165_v30 = vsel %vm656_vm0, %v9202_v41, 0  ;;  %v2663_v41 = vsel %vm8556_vm3, %v2658_v63, %v9300_v54  ;;  %v9359_v54 = vld [vmem:[%s8521_s10 + $0x74] sm:$0x1]  ;;  %v2711_v7 = vsel %vm8556_vm3, %v2706_v18, %v9331_v62  ;;  %v2721_v63 = vsel %vm8556_vm3, %v2716_v58, %v2720_v16  ;;  %v7058_v1 = vld [vmem:[%s8521_s10 + $0x30] sm:$0xe] }
 0x12c   : > { %7705 = vmatprep.mubr.msk.bf16.mxu0 %vm625_vm4, %v7036_v2  ;;  %v7039_v2 = vcombine.low %v2639_v4, %v2649_v47  ;;  %v7040_v35 = vcombine.low %v2663_v41, %v2673_v31  ;;  %v2749_v4 = vrot.slane %v2747_v44, 4  ;;  %v2752_v47 = vrot.slane %v2750_v26, 5  ;;  %v9385_v26 = vld [vmem:[%s8521_s10 + $0x8c] sm:$0x1] }
 0x12d   : > { %v7042_v62 = vcombine.low %v2711_v7, %v2721_v63  ;;  %v2786_v31 = vrot.slane %v2784_v14, 4  ;;  %v2768_v44 = vrot.slane %v2766_v61, 5  ;;  %v2735_v12 = vsel %vm8556_vm3, %v2730_v39, %v2734_v6 }
 0x12e   : > { %v2753_v49 = vor.u32 %v2752_v47, %v2749_v4  ;;  %v2790_v16 = vshll.u32 %v9385_v26, 16  ;;  %v3051_v61 = vrot.slane %v9258_v42, 5  ;;  %v3062_v42 = vrot.slane %v9267_v20, 5 }
 0x130   : > { %v2754_v9 = vrot.slane %v2753_v49, 4  ;;  %v2792_v47 = vrot.slane %v2790_v16, 5  ;;  %v3044_v49 = vrot.slane %v9236_v53, 5  ;;  %v7062_v16 = vld [vmem:[%s8521_s10 + $0x60] sm:$0xe] }
 0x132   : > { %v2759_v34 = vsel %vm8556_vm3, %v2754_v9, %v2758_v23  ;;  %v3058_v9 = vrot.slane %v9272_v48, 5 }
 0x133   : > { %7706 = vmatmul.mubr.msk.bf16.vlgmr.msra.gmra.mrb[0].mxu0 %vm625_vm4, %v7037_v52  ;;  %v2697_v52 = vsel %vm8556_vm3, %v2692_v11, %v2696_v45  ;;  %v2777_v11 = vor.u32 %v2776_v28, %v2773_v25 }
 0x134   : > { %7726 = vmatpush3.bf16.msra.mxu0 %v3165_v30  ;;  %7709 = vmatprep.mubr.msk.bf16.mxu0 %vm625_vm4, %v7038_v3  ;;  %v2742_v3 = vshll.u32 %v9359_v54, 16  ;;  %v2780_v30 = vshll.u32 %v9363_v33, 16  ;;  %v7041_v15 = vcombine.low %v2687_v8, %v2697_v52  ;;  %v3036_v8 = vrot.slane %v3034_v17, 4 }
 0x135   : > { %v2778_v37 = vrot.slane %v2777_v11, 4  ;;  %v3037_v52 = vrot.slane %v9233_v32, 5  ;;  %v3048_v32 = vrot.slane %v9229_v57, 5 }
 0x136   : > { %v2744_v22 = vrot.slane %v2742_v3, 5  ;;  %v2782_v41 = vrot.slane %v2780_v30, 5  ;;  %v3041_v3 = vrot.slane %v9220_v59, 5  ;;  %v7067_v30 = vrot.slane %v7057_v40, 9 }
 0x137   : > { %v3038_v63 = vsel %vm8657_vm7, %v3036_v8, %v3037_v52  ;;  %v3050_v59 = vrot.slane %v3048_v32, 4  ;;  %v7063_v8 = vld [vmem:[%s8521_s10 + $0x6c] sm:$0xe]  ;;  %v7064_v52 = vld [vmem:[%s8521_s10 + $0x78] sm:$0xe] }
 0x138   : > { %v2745_v10 = vsel %vm8556_vm3, %v2740_v55, %v2744_v22  ;;  %v2787_v18 = vor.u32 %v2786_v31, %v2782_v41  ;;  %v3043_v14 = vrot.slane %v3041_v3, 4  ;;  %v3042_v57 = vsel %vm8657_vm7, %v7067_v30, %v3041_v3  ;;  %v7059_v55 = vld [vmem:[%s8521_s10 + $0x3c] sm:$0xe]  ;;  %v7060_v22 = vld [vmem:[%s8521_s10 + $0x48] sm:$0xe] }
 0x139   : > { %v7043_v6 = vcombine.low %v2735_v12, %v2745_v10  ;;  %v3052_v53 = vsel %vm8657_vm7, %v3050_v59, %v3051_v61  ;;  %v3069_v10 = vrot.slane %v9297_v46, 5  ;;  %v7073_v3 = vrot.slane %v7063_v8, 9  ;;  %v7065_v30 = vld [vmem:[%s8521_s10 + $0x84] sm:$0xe] }
 0x13a   : > { %v2788_v4 = vrot.slane %v2787_v18, 4  ;;  %v7061_v18 = vld [vmem:[%s8521_s10 + $0x54] sm:$0xe]  ;;  %v7074_v40 = vrot.slane %v7064_v52, 9  ;;  %v3100_v59 = vrot.slane %v9385_v26, 5 }
 0x13b   : > { %7710 = vmatmul.mubr.msk.bf16.gmra.mrb[4].mxu0 %vm625_vm4, %v7039_v2  ;;  %v2763_v2 = vor.u32 %v2762_v50, %v2758_v23  ;;  %v7066_v50 = vrot.slane %v7056_v43, 9  ;;  %v2783_v23 = vsel %vm8556_vm3, %v2778_v37, %v2782_v41  ;;  %v7069_v41 = vrot.slane %v7059_v55, 9 }
 0x13c   : > { %7713 = vmatprep.mubr.msk.bf16.mxu0 %vm625_vm4, %v7040_v35  ;;  %v2793_v36 = vsel %vm8556_vm3, %v2788_v4, %v2792_v47  ;;  %v3071_v43 = vrot.slane %v3069_v10, 4  ;;  %v3079_v37 = vrot.slane %v9329_v38, 5  ;;  %v3083_v47 = vrot.slane %v9336_v60, 5 }
 0x13d   : > { %v2764_v45 = vrot.slane %v2763_v2, 4  ;;  %v3035_v7 = vsel %vm8657_vm7, %v7066_v50, %v3034_v17  ;;  %v7045_v24 = vcombine.low %v2783_v23, %v2793_v36  ;;  %v7068_v2 = vrot.slane %v7058_v1, 9 }
 0x13e   : > { %v7077_v19 = vcombine.low %v3035_v7, %v3038_v63  ;;  %v7071_v17 = vrot.slane %v7061_v18, 9  ;;  %v3090_v38 = vrot.slane %v9344_v21, 5  ;;  %v3085_v7 = vrot.slane %v3083_v47, 4 }
 0x13f   : > { %v2769_v58 = vsel %vm8556_vm3, %v2764_v45, %v2768_v44  ;;  %v3049_v39 = vsel %vm8657_vm7, %v7068_v2, %v3048_v32  ;;  %v7070_v45 = vrot.slane %v7060_v22, 9  ;;  %v3065_v44 = vrot.slane %v9288_v51, 5 }
 0x140   : > { %v7044_v35 = vcombine.low %v2759_v34, %v2769_v58  ;;  %v7079_v28 = vcombine.low %v3049_v39, %v3052_v53  ;;  %v3076_v51 = vrot.slane %v9303_v13, 5  ;;  %v3070_v13 = vsel %vm8657_vm7, %v7071_v17, %v3069_v10 }
 0x141   : > { %v3063_v11 = vsel %vm8657_vm7, %v7070_v45, %v3062_v42  ;;  %v3086_v63 = vrot.slane %v9359_v54, 5  ;;  %v3092_v32 = vrot.slane %v3090_v38, 4  ;;  %v3093_v60 = vrot.slane %v9372_v0, 5 }
 0x142   : > { %v3078_v46 = vrot.slane %v3076_v51, 4  ;;  %v3084_v1 = vsel %vm8657_vm7, %v7073_v3, %v3083_v47 }
 0x143   : > { %7714 = vmatmul.mubr.msk.bf16.gmra.mrb[8].mxu0 %vm625_vm4, %v7041_v15  ;;  %v3045_v15 = vsel %vm8657_vm7, %v3043_v14, %v3044_v49  ;;  %v3087_v21 = vsel %vm8657_vm7, %v3085_v7, %v3086_v63  ;;  %v3094_v54 = vsel %vm8657_vm7, %v3092_v32, %v3093_v60  ;;  %v7075_v49 = vrot.slane %v7065_v30, 9 }
 0x144   : > { %7717 = vmatprep.mubr.msk.bf16.mxu0 %vm625_vm4, %v7042_v62  ;;  %v3055_v62 = vrot.slane %v9242_v56, 5  ;;  %v7078_v25 = vcombine.low %v3042_v57, %v3045_v15  ;;  %v3064_v56 = vrot.slane %v3062_v42, 4  ;;  %v7084_v0 = vcombine.low %v3084_v1, %v3087_v21 }
 0x146   : > { %v3057_v31 = vrot.slane %v3055_v62, 4  ;;  %v3056_v20 = vsel %vm8657_vm7, %v7069_v41, %v3055_v62  ;;  %v3066_v48 = vsel %vm8657_vm7, %v3064_v56, %v3065_v44 }
 0x147   : > { %v7081_v58 = vcombine.low %v3063_v11, %v3066_v48 }
 0x148   : > { %v3059_v12 = vsel %vm8657_vm7, %v3057_v31, %v3058_v9 }
 0x149   : > { %v7080_v34 = vcombine.low %v3056_v20, %v3059_v12 }
 0x14b   : > { %7718 = vmatmul.mubr.msk.bf16.gmra.mrb[12].mxu0 %vm625_vm4, %v7043_v6  ;;  %v3072_v6 = vrot.slane %v9324_v5, 5  ;;  %v3080_v5 = vsel %vm8657_vm7, %v3078_v46, %v3079_v37 }
 0x14c   : > { %7721 = vmatprep.mubr.msk.bf16.mxu0 %vm625_vm4, %v7044_v35  ;;  %v7072_v35 = vrot.slane %v7062_v16, 9 }
 0x14d   : > { %v3073_v4 = vsel %vm8657_vm7, %v3071_v43, %v3072_v6 }
 0x14e   : > { %v3077_v50 = vsel %vm8657_vm7, %v7072_v35, %v3076_v51  ;;  %v7082_v23 = vcombine.low %v3070_v13, %v3073_v4 }
 0x14f   : > { %v7083_v36 = vcombine.low %v3077_v50, %v3080_v5  ;;  %v3623_v5 = vld [vmem:[#allocation2 + $0xc] sm:$0xf] }
 0x153   : > { %7722 = vmatmul.mubr.msk.bf16.gmra.mrb[16].mxu0 %vm625_vm4, %v7045_v24  ;;  %v3097_v24 = vrot.slane %v9363_v33, 5 }
 0x154   : > { %7727 = vmatprep.mubr.msk.bf16.mxu0 %vm625_vm4, %v7077_v19  ;;  %v3091_v19 = vsel %vm8657_vm7, %v7074_v40, %v3090_v38  ;;  %v3613_v40 = vld [vmem:[#allocation2] sm:$0xf] }
 0x155   : > { %v7085_v14 = vcombine.low %v3091_v19, %v3094_v54  ;;  %v3099_v2 = vrot.slane %v3097_v24, 4  ;;  %v3098_v33 = vsel %vm8657_vm7, %v7075_v49, %v3097_v24  ;;  %v3627_v54 = vld [vmem:[#allocation2 + $0x14] sm:$0x1] }
 0x157   : > { %v3101_v61 = vsel %vm8657_vm7, %v3099_v2, %v3100_v59  ;;  %v3620_v59 = vld [vmem:[#allocation2 + $0x8] sm:$0x1] }
 0x158   : > { %v7086_v57 = vcombine.low %v3098_v33, %v3101_v61 }
 0x15b   : > { %7728 = vmatmul.mubr.msk.bf16.vlgmr.msra.gmra.mrb[0].mxu0 %vm625_vm4, %v7078_v25  ;;  %v9504_v25 = vld [vmem:[%s10477_s2] ss:$0 sm:$0xff] }
 0x15c   : > { %7731 = vmatprep.mubr.msk.bf16.mxu0 %vm625_vm4, %v7079_v28 }
 0x163   : > { %7732 = vmatmul.mubr.msk.bf16.gmra.mrb[4].mxu0 %vm625_vm4, %v7080_v34 }
 0x164   : > { %7735 = vmatprep.mubr.msk.bf16.mxu0 %vm625_vm4, %v7081_v58 }
 0x16b   : > { %7736 = vmatmul.mubr.msk.bf16.gmra.mrb[8].mxu0 %vm625_vm4, %v7082_v23 }
 0x16c   : > { %7739 = vmatprep.mubr.msk.bf16.mxu0 %vm625_vm4, %v7083_v36 }
 0x173   : > { %7740 = vmatmul.mubr.msk.bf16.gmra.mrb[12].mxu0 %vm625_vm4, %v7084_v0 }
 0x174   : > { %7743 = vmatprep.mubr.msk.bf16.mxu0 %vm625_vm4, %v7085_v14 }
 0x17b   : > { %7744 = vmatmul.mubr.msk.bf16.gmra.mrb[16].mxu0 %vm625_vm4, %v7086_v57 }
 0x1c1   : > { %v9485_v15 = vpop.f32.mrb[0].mxu1 }
 0x1c2   : > { %v9487_v62 = vpop.f32.mrb[1].mxu1 }
 0x1c3   : > { %v9489_v39 = vpop.f32.mrb[2].mxu1 }
 0x1c4   : > { %v9491_v26 = vpop.f32.mrb[3].mxu1 }
 0x1c9   : > { %v9493_v53 = vpop.f32.mrb[4].mxu1 }
 0x1ca   : > { %v9495_v55 = vpop.f32.mrb[5].mxu1 }
 0x1cb   : > { %v9497_v42 = vpop.f32.mrb[6].mxu1 }
 0x1cc   : > { %v9499_v22 = vpop.f32.mrb[7].mxu1 }
 0x22e   : > { %v7729_v28 = vpop.f32.mrb[0].mxu0 }
 0x22f   : > { %v3309_v41 = vadd.f32 %v7729_v28, %v9504_v25  ;;  %v3201_v31 = vpop.f32.mrb[1].mxu0 }
 0x230   : > { %v3307_v9 = vadd.f32 %v9504_v25, %v3201_v31  ;;  %v7730_v45 = vpop.f32.mrb[2].mxu0 }
 0x231   : > { %v3329_v56 = vmax.f32 %v3309_v41, 0.0  ;;  %v3310_v44 = vadd.f32 %v7730_v45, %v9504_v25  ;;  %v3204_v20 = vpop.f32.mrb[3].mxu0 }
 0x232   : > { %v3327_v12 = vmax.f32 %v3307_v9, 0.0  ;;  %v3308_v10 = vadd.f32 %v9504_v25, %v3204_v20 }
 0x233   : > { %v7342_v11 = vpack.c.bf16 %v3329_v56, %v3329_v56  ;;  %v3330_v48 = vmax.f32 %v3310_v44, 0.0 }
 0x234   : > { %v7340_v18 = vpack.c.bf16 %v3327_v12, %v3327_v12  ;;  %v3328_v51 = vmax.f32 %v3308_v10, 0.0 }
 0x235   : > { %v3428_v16 = vshrl.u32 %v7342_v11, 16  ;;  %v7343_v34 = vpack.c.bf16 %v3330_v48, %v3330_v48  ;;  %v3431_v58 = vshll.u32 %v7342_v11, 16 }
 0x236   : > { %v3411_v17 = vshrl.u32 %v7340_v18, 16  ;;  %v3414_v43 = vshll.u32 %v7340_v18, 16  ;;  %v7341_v6 = vpack.c.bf16 %v3328_v51, %v3328_v51  ;;  %v7733_v35 = vpop.f32.mrb[4].mxu0 }
 0x237   : > { %v3430_v46 = vrot.slane %v3428_v16, 7  ;;  %v3436_v37 = vshrl.u32 %v7343_v34, 16  ;;  %v3439_v13 = vshll.u32 %v7343_v34, 16  ;;  %v3313_v4 = vadd.f32 %v7733_v35, %v9504_v25  ;;  %v3217_v47 = vpop.f32.mrb[5].mxu0  ;;  %v3637_v34 = vld [vmem:[#allocation2 + $0x24] sm:$0xf] }
 0x238   : > { %v3413_v8 = vrot.slane %v3411_v17, 7  ;;  %v3419_v38 = vshrl.u32 %v7341_v6, 16  ;;  %v3422_v52 = vshll.u32 %v7341_v6, 16  ;;  %v3311_v23 = vadd.f32 %v9504_v25, %v3217_v47  ;;  %v7734_v36 = vpop.f32.mrb[6].mxu0 }
 0x239   : > { %v3433_v3 = vor.u32 %v3431_v58, %v3430_v46  ;;  %v3434_v7 = vrot.slane %v3430_v46, 4  ;;  %v3438_v32 = vrot.slane %v3436_v37, 7  ;;  %v3333_v60 = vmax.f32 %v3313_v4, 0.0  ;;  %v3220_v1 = vpop.f32.mrb[7].mxu0  ;;  %v3630_v37 = vld [vmem:[#allocation2 + $0x18] sm:$0xf] }
 0x23a   : > { %v3416_v21 = vor.u32 %v3414_v43, %v3413_v8  ;;  %v3417_v24 = vrot.slane %v3413_v8, 4  ;;  %v3421_v30 = vrot.slane %v3419_v38, 7  ;;  %v3331_v0 = vmax.f32 %v3311_v23, 0.0 }
 0x23b   : > { %v3624_v14 = vsel %vm9513_vm13, %v3433_v3, %v3623_v5  ;;  %v3441_v49 = vor.u32 %v3439_v13, %v3438_v32  ;;  %v3443_v2 = vrot.slane %v3438_v32, 4  ;;  %v7346_v33 = vpack.c.bf16 %v3333_v60, %v3333_v60 }
 0x23c   : > { %3625 = vst [vmem:[#allocation2 + $0xc] sm:$0xf] %v3624_v14  ;;  %v3614_v61 = vsel %vm9513_vm13, %v3416_v21, %v3613_v40  ;;  %v3424_v57 = vor.u32 %v3422_v52, %v3421_v30  ;;  %v3426_v28 = vrot.slane %v3421_v30, 4  ;;  %v7344_v41 = vpack.c.bf16 %v3331_v0, %v3331_v0 }
 0x23d   : > { %3615 = vst [vmem:[#allocation2] sm:$0xf] %v3614_v61  ;;  %v3442_v31 = vsel %vm9526_vm15, %v3434_v7, %v3441_v49  ;;  %v3628_v9 = vsel %vm9520_vm14, %v3443_v2, %v3627_v54  ;;  %v3462_v45 = vshrl.u32 %v7346_v33, 16  ;;  %v3465_v20 = vshll.u32 %v7346_v33, 16  ;;  %v3641_v61 = vld [vmem:[#allocation2 + $0x2c] sm:$0x1] }
 0x23e   : > { %3626 = vst.msk [vmem:[#allocation2 + $0x10] sm:$0xf] %vm3610_vm9, %v3442_v31  ;;  %3629 = vst [vmem:[#allocation2 + $0x14] sm:$0x1] %v3628_v9  ;;  %v3425_v56 = vsel %vm9526_vm15, %v3417_v24, %v3424_v57  ;;  %v3621_v44 = vsel %vm9520_vm14, %v3426_v28, %v3620_v59  ;;  %v3445_v12 = vshrl.u32 %v7344_v41, 16  ;;  %v7737_v10 = vpop.f32.mrb[8].mxu0  ;;  %v3314_v48 = vadd.f32 %v7734_v36, %v9504_v25 }
 0x23f   : > { %3617 = vst.msk [vmem:[#allocation2 + $0x4] sm:$0xf] %vm3610_vm9, %v3425_v56  ;;  %3622 = vst [vmem:[#allocation2 + $0x8] sm:$0x1] %v3621_v44  ;;  %v9544_v11 = vrot.slane %v3462_v45, 7  ;;  %v3312_v18 = vadd.f32 %v9504_v25, %v3220_v1  ;;  %v3317_v51 = vadd.f32 %v7737_v10, %v9504_v25  ;;  %v3233_v16 = vpop.f32.mrb[9].mxu0 }
 0x240   : > { %v9549_v58 = vrot.slane %v3445_v12, 7  ;;  %v3448_v17 = vshll.u32 %v7344_v41, 16  ;;  %v3315_v43 = vadd.f32 %v9504_v25, %v3233_v16  ;;  %v7738_v6 = vpop.f32.mrb[10].mxu0  ;;  %v3334_v13 = vmax.f32 %v3314_v48, 0.0 }
 0x241   : > { %v3467_v35 = vor.u32 %v3465_v20, %v9544_v11  ;;  %v3468_v46 = vrot.slane %v9544_v11, 4  ;;  %v3332_v4 = vmax.f32 %v3312_v18, 0.0  ;;  %v3236_v47 = vpop.f32.mrb[11].mxu0  ;;  %v3337_v38 = vmax.f32 %v3317_v51, 0.0  ;;  %v3634_v20 = vld [vmem:[#allocation2 + $0x20] sm:$0x1] }
 0x242   : > { %v3450_v5 = vor.u32 %v3448_v17, %v9549_v58  ;;  %v3451_v8 = vrot.slane %v9549_v58, 4  ;;  %v3335_v52 = vmax.f32 %v3315_v43, 0.0  ;;  %v7347_v7 = vpack.c.bf16 %v3334_v13, %v3334_v13  ;;  %v3651_v17 = vld [vmem:[#allocation2 + $0x3c] sm:$0xf] }
 0x243   : > { %v3689_v23 = vld [vmem:[#allocation2 + $0xc] sm:$0x1]  ;;  %v3638_v3 = vsel %vm9513_vm13, %v3467_v35, %v3637_v34  ;;  %v7345_v40 = vpack.c.bf16 %v3332_v4, %v3332_v4  ;;  %v3318_v32 = vadd.f32 %v7738_v6, %v9504_v25  ;;  %v7350_v24 = vpack.c.bf16 %v3337_v38, %v3337_v38 }
 0x244   : > { %v3690_v60 = vsel %vm9520_vm14, 0, %v3689_v23  ;;  %v3686_v1 = vld [vmem:[#allocation2] sm:$0x1]  ;;  %3639 = vst [vmem:[#allocation2 + $0x24] sm:$0xf] %v3638_v3  ;;  %v3631_v21 = vsel %vm9513_vm13, %v3450_v5, %v3630_v37  ;;  %v7348_v54 = vpack.c.bf16 %v3335_v52, %v3335_v52  ;;  %v3470_v14 = vshrl.u32 %v7347_v7, 16 }
 0x245   : > { %3691 = vst [vmem:[#allocation2 + $0xc] sm:$0x1] %v3690_v60  ;;  %v3687_v30 = vsel %vm9520_vm14, 0, %v3686_v1  ;;  %v3720_v0 = vld [vmem:[#allocation2 + $0x14] sm:$0x1]  ;;  %v3473_v49 = vshll.u32 %v7347_v7, 16  ;;  %v3316_v48 = vadd.f32 %v9504_v25, %v3236_v47 }
 0x246   : > { %3632 = vst [vmem:[#allocation2 + $0x18] sm:$0xf] %v3631_v21  ;;  %v3453_v2 = vshrl.u32 %v7345_v40, 16  ;;  %3688 = vst [vmem:[#allocation2] sm:$0x1] %v3687_v30  ;;  %v3721_v59 = vsel %vm9558_vm1, 0, %v3720_v0 }
 0x247   : > { %v3717_v33 = vld [vmem:[#allocation2 + $0x8] sm:$0x1]  ;;  %v3456_v57 = vshll.u32 %v7345_v40, 16  ;;  %v3496_v28 = vshrl.u32 %v7350_v24, 16  ;;  %v3499_v41 = vshll.u32 %v7350_v24, 16  ;;  %v3472_v9 = vrot.slane %v3470_v14, 7 }
 0x248   : > { %3722 = vst [vmem:[#allocation2 + $0x14] sm:$0x1] %v3721_v59  ;;  %v3718_v31 = vsel %vm9558_vm1, 0, %v3717_v33  ;;  %v3455_v45 = vrot.slane %v3453_v2, 7  ;;  %v3479_v56 = vshrl.u32 %v7348_v54, 16  ;;  %v7741_v44 = vpop.f32.mrb[12].mxu0 }
 0x249   : > { %3719 = vst [vmem:[#allocation2 + $0x8] sm:$0x1] %v3718_v31  ;;  %v9575_v12 = vrot.slane %v3496_v28, 7  ;;  %v3482_v10 = vshll.u32 %v7348_v54, 16  ;;  %v3338_v11 = vmax.f32 %v3318_v32, 0.0  ;;  %v3249_v18 = vpop.f32.mrb[13].mxu0  ;;  %v3475_v51 = vor.u32 %v3473_v49, %v3472_v9 }
 0x24a   : > { %v3477_v16 = vrot.slane %v3472_v9, 4  ;;  %v3458_v34 = vor.u32 %v3456_v57, %v3455_v45  ;;  %v3460_v58 = vrot.slane %v3455_v45, 4  ;;  %v7742_v43 = vpop.f32.mrb[14].mxu0  ;;  %v9580_v37 = vrot.slane %v3479_v56, 7  ;;  %v3644_v3 = vld [vmem:[#allocation2 + $0x30] sm:$0xf] }
 0x24b   : > { %v3501_v6 = vor.u32 %v3499_v41, %v9575_v12  ;;  %v3502_v35 = vrot.slane %v9575_v12, 4  ;;  %v7351_v13 = vpack.c.bf16 %v3338_v11, %v3338_v11  ;;  %v3252_v4 = vpop.f32.mrb[15].mxu0  ;;  %v3695_v5 = vld [vmem:[#allocation2 + $0x24] sm:$0x1]  ;;  %v3476_v38 = vsel %vm9526_vm15, %v3468_v46, %v3475_v51 }
 0x24c   : > { %v3642_v47 = vsel %vm9520_vm14, %v3477_v16, %v3641_v61  ;;  %v3459_v52 = vsel %vm9526_vm15, %v3451_v8, %v3458_v34  ;;  %v3635_v23 = vsel %vm9520_vm14, %v3460_v58, %v3634_v20  ;;  %v3696_v7 = vsel %vm9520_vm14, 0, %v3695_v5  ;;  %3640 = vst.msk [vmem:[#allocation2 + $0x28] sm:$0xf] %vm3610_vm9, %v3476_v38  ;;  %v3655_v28 = vld [vmem:[#allocation2 + $0x44] sm:$0x1] }
 0x24d   : > { %v3692_v40 = vld [vmem:[#allocation2 + $0x18] sm:$0x1]  ;;  %3643 = vst [vmem:[#allocation2 + $0x2c] sm:$0x1] %v3642_v47  ;;  %3633 = vst.msk [vmem:[#allocation2 + $0x1c] sm:$0xf] %vm3610_vm9, %v3459_v52  ;;  %v3652_v46 = vsel %vm9513_vm13, %v3501_v6, %v3651_v17  ;;  %v3484_v32 = vor.u32 %v3482_v10, %v9580_v37  ;;  %v7929_v30 = vadd.f32 %v7741_v44, %v9485_v15 }
 0x24e   : > { %3636 = vst [vmem:[#allocation2 + $0x20] sm:$0x1] %v3635_v23  ;;  %v3485_v8 = vrot.slane %v9580_v37, 4  ;;  %3697 = vst [vmem:[#allocation2 + $0x24] sm:$0x1] %v3696_v7  ;;  %v3693_v60 = vsel %vm9520_vm14, 0, %v3692_v40  ;;  %v7930_v0 = vadd.f32 %v3249_v18, %v9487_v62  ;;  %v7931_v14 = vadd.f32 %v7742_v43, %v9489_v39 }
 0x24f   : > { %3653 = vst [vmem:[#allocation2 + $0x3c] sm:$0xf] %v3652_v46  ;;  %v3504_v1 = vshrl.u32 %v7351_v13, 16  ;;  %v3507_v21 = vshll.u32 %v7351_v13, 16  ;;  %v3336_v24 = vmax.f32 %v3316_v48, 0.0  ;;  %v3645_v54 = vsel %vm9513_vm13, %v3484_v32, %v3644_v3  ;;  %v7745_v49 = vpop.f32.mrb[16].mxu0 }
 0x250   : > { %3694 = vst [vmem:[#allocation2 + $0x18] sm:$0x1] %v3693_v60  ;;  %3646 = vst [vmem:[#allocation2 + $0x30] sm:$0xf] %v3645_v54  ;;  %v7932_v33 = vadd.f32 %v3252_v4, %v9491_v26  ;;  %v7933_v61 = vadd.f32 %v7745_v49, %v9493_v53  ;;  %v3265_v57 = vpop.f32.mrb[17].mxu0  ;;  %v3321_v41 = vadd.f32 %v7929_v30, %v9504_v25 }
 0x251   : > { %v3506_v2 = vrot.slane %v3504_v1, 7  ;;  %v7349_v59 = vpack.c.bf16 %v3336_v24, %v3336_v24  ;;  %v3319_v31 = vadd.f32 %v7930_v0, %v9504_v25  ;;  %v3322_v15 = vadd.f32 %v7931_v14, %v9504_v25  ;;  %v7746_v9 = vpop.f32.mrb[18].mxu0  ;;  %v3648_v43 = vld [vmem:[#allocation2 + $0x38] sm:$0x1]  ;;  %v3665_v54 = vld [vmem:[#allocation2 + $0x54] sm:$0xf] }
 0x252   : > { %v7934_v62 = vadd.f32 %v3265_v57, %v9495_v55  ;;  %v9611_v20 = vpop.f32.mrb[19].mxu0  ;;  %v3341_v26 = vmax.f32 %v3321_v41, 0.0  ;;  %v3320_v10 = vadd.f32 %v7932_v33, %v9504_v25  ;;  %v3325_v16 = vadd.f32 %v7933_v61, %v9504_v25  ;;  %v3658_v30 = vld [vmem:[#allocation2 + $0x48] sm:$0xf]  ;;  %v3669_v61 = vld [vmem:[#allocation2 + $0x5c] sm:$0x1] }
 0x253   : > { %v3509_v39 = vor.u32 %v3507_v21, %v3506_v2  ;;  %v3511_v45 = vrot.slane %v3506_v2, 4  ;;  %v3487_v56 = vshrl.u32 %v7349_v59, 16  ;;  %v3490_v44 = vshll.u32 %v7349_v59, 16 }
 0x254   : > { %v3339_v12 = vmax.f32 %v3319_v31, 0.0  ;;  %v3342_v53 = vmax.f32 %v3322_v15, 0.0  ;;  %v3726_v11 = vld [vmem:[#allocation2 + $0x2c] sm:$0x1]  ;;  %v7354_v6 = vpack.c.bf16 %v3341_v26, %v3341_v26  ;;  %v3340_v24 = vmax.f32 %v3320_v10, 0.0 }
 0x255   : > { %v3723_v48 = vld [vmem:[#allocation2 + $0x20] sm:$0x1]  ;;  %v3510_v18 = vsel %vm9526_vm15, %v3502_v35, %v3509_v39  ;;  %v3656_v55 = vsel %vm9520_vm14, %v3511_v45, %v3655_v28  ;;  %v3489_v51 = vrot.slane %v3487_v56, 7  ;;  %v3727_v34 = vsel %vm9558_vm1, 0, %v3726_v11 }
 0x256   : > { %v3724_v58 = vsel %vm9558_vm1, 0, %v3723_v48  ;;  %v3701_v17 = vld [vmem:[#allocation2 + $0x3c] sm:$0x1]  ;;  %3654 = vst.msk [vmem:[#allocation2 + $0x40] sm:$0xf] %vm3610_vm9, %v3510_v18  ;;  %v7352_v37 = vpack.c.bf16 %v3339_v12, %v3339_v12  ;;  %v7355_v5 = vpack.c.bf16 %v3342_v53, %v3342_v53  ;;  %v3530_v47 = vshrl.u32 %v7354_v6, 16 }
 0x257   : > { %3657 = vst [vmem:[#allocation2 + $0x44] sm:$0x1] %v3656_v55  ;;  %3728 = vst [vmem:[#allocation2 + $0x2c] sm:$0x1] %v3727_v34  ;;  %v3702_v35 = vsel %vm9520_vm14, 0, %v3701_v17  ;;  %v3492_v13 = vor.u32 %v3490_v44, %v3489_v51  ;;  %v3494_v4 = vrot.slane %v3489_v51, 4  ;;  %v3323_v49 = vadd.f32 %v7934_v62, %v9504_v25 }
 0x258   : > { %3725 = vst [vmem:[#allocation2 + $0x20] sm:$0x1] %v3724_v58  ;;  %3703 = vst [vmem:[#allocation2 + $0x3c] sm:$0x1] %v3702_v35  ;;  %v3698_v38 = vld [vmem:[#allocation2 + $0x30] sm:$0x1]  ;;  %v7353_v31 = vpack.c.bf16 %v3340_v24, %v3340_v24  ;;  %v7936_v55 = vadd.f32 %v9611_v20, %v9499_v22 }
 0x259   : > { %v3533_v52 = vshll.u32 %v7354_v6, 16  ;;  %v3513_v23 = vshrl.u32 %v7352_v37, 16  ;;  %v3516_v3 = vshll.u32 %v7352_v37, 16  ;;  %v3699_v7 = vsel %vm9520_vm14, 0, %v3698_v38  ;;  %v3679_v37 = vld [vmem:[#allocation2 + $0x6c] sm:$0xf] }
 0x25a   : > { %v3493_v40 = vsel %vm9526_vm15, %v3485_v8, %v3492_v13  ;;  %v3649_v46 = vsel %vm9520_vm14, %v3494_v4, %v3648_v43  ;;  %v3538_v32 = vshrl.u32 %v7355_v5, 16  ;;  %3700 = vst [vmem:[#allocation2 + $0x30] sm:$0x1] %v3699_v7  ;;  %v3532_v60 = vrot.slane %v3530_v47, 7  ;;  %v3672_v47 = vld [vmem:[#allocation2 + $0x60] sm:$0xf] }
 0x25b   : > { %3647 = vst.msk [vmem:[#allocation2 + $0x34] sm:$0xf] %vm3610_vm9, %v3493_v40  ;;  %3650 = vst [vmem:[#allocation2 + $0x38] sm:$0x1] %v3649_v46  ;;  %v3515_v1 = vrot.slane %v3513_v23, 7  ;;  %v3541_v21 = vshll.u32 %v7355_v5, 16  ;;  %v7935_v8 = vadd.f32 %v7746_v9, %v9497_v42  ;;  %v3324_v13 = vadd.f32 %v7936_v55, %v9504_v25 }
 0x25c   : > { %v3540_v0 = vrot.slane %v3538_v32, 7  ;;  %v3345_v14 = vmax.f32 %v3325_v16, 0.0  ;;  %v3535_v2 = vor.u32 %v3533_v52, %v3532_v60  ;;  %v3536_v59 = vrot.slane %v3532_v60, 4  ;;  %v3662_v16 = vld [vmem:[#allocation2 + $0x50] sm:$0x1] }
 0x25d   : > { %v3518_v33 = vor.u32 %v3516_v3, %v3515_v1  ;;  %v3343_v56 = vmax.f32 %v3323_v49, 0.0  ;;  %v3521_v44 = vshrl.u32 %v7353_v31, 16  ;;  %v3326_v53 = vadd.f32 %v7935_v8, %v9504_v25 }
 0x25e   : > { %v3732_v57 = vld [vmem:[#allocation2 + $0x44] sm:$0x1]  ;;  %v3543_v28 = vor.u32 %v3541_v21, %v3540_v0  ;;  %v3545_v41 = vrot.slane %v3540_v0, 4  ;;  %v7358_v15 = vpack.c.bf16 %v3345_v14, %v3345_v14  ;;  %v3666_v45 = vsel %vm9513_vm13, %v3535_v2, %v3665_v54  ;;  %v3683_v14 = vld [vmem:[#allocation2 + $0x74] sm:$0x1] }
 0x25f   : > { %v3733_v39 = vsel %vm9558_vm1, 0, %v3732_v57  ;;  %v3659_v62 = vsel %vm9513_vm13, %v3518_v33, %v3658_v30  ;;  %3667 = vst [vmem:[#allocation2 + $0x54] sm:$0xf] %v3666_v45  ;;  %v7356_v12 = vpack.c.bf16 %v3343_v56, %v3343_v56  ;;  %v3519_v11 = vrot.slane %v3515_v1, 4 }
 0x260   : > { %3734 = vst [vmem:[#allocation2 + $0x44] sm:$0x1] %v3733_v39  ;;  %3660 = vst [vmem:[#allocation2 + $0x48] sm:$0xf] %v3659_v62  ;;  %v3544_v42 = vsel %vm9526_vm15, %v3536_v59, %v3543_v28  ;;  %v3670_v9 = vsel %vm9520_vm14, %v3545_v41, %v3669_v61  ;;  %v3564_v26 = vshrl.u32 %v7358_v15, 16  ;;  %v3523_v48 = vrot.slane %v3521_v44, 7 }
 0x261   : > { %3668 = vst.msk [vmem:[#allocation2 + $0x58] sm:$0xf] %vm3610_vm9, %v3544_v42  ;;  %3671 = vst [vmem:[#allocation2 + $0x5c] sm:$0x1] %v3670_v9  ;;  %v3524_v18 = vshll.u32 %v7353_v31, 16  ;;  %v3567_v58 = vshll.u32 %v7358_v15, 16 }
 0x262   : > { %v3729_v10 = vld [vmem:[#allocation2 + $0x38] sm:$0x1]  ;;  %v3566_v34 = vrot.slane %v3564_v26, 7  ;;  %v3547_v17 = vshrl.u32 %v7356_v12, 16  ;;  %v3528_v6 = vrot.slane %v3523_v48, 4  ;;  %v3346_v35 = vmax.f32 %v3326_v53, 0.0 }
 0x263   : > { %v3730_v51 = vsel %vm9558_vm1, 0, %v3729_v10  ;;  %v3526_v43 = vor.u32 %v3524_v18, %v3523_v48  ;;  %v3550_v38 = vshll.u32 %v7356_v12, 16  ;;  %v3344_v23 = vmax.f32 %v3324_v13, 0.0  ;;  %v3676_v41 = vld [vmem:[#allocation2 + $0x68] sm:$0x1] }
 0x264   : > { %3731 = vst [vmem:[#allocation2 + $0x38] sm:$0x1] %v3730_v51  ;;  %v3569_v4 = vor.u32 %v3567_v58, %v3566_v34  ;;  %v3549_v5 = vrot.slane %v3547_v17, 7  ;;  %v3663_v20 = vsel %vm9520_vm14, %v3528_v6, %v3662_v16  ;;  %v7359_v52 = vpack.c.bf16 %v3346_v35, %v3346_v35 }
 0x265   : > { %v3527_v22 = vsel %vm9526_vm15, %v3519_v11, %v3526_v43  ;;  %3664 = vst [vmem:[#allocation2 + $0x50] sm:$0x1] %v3663_v20  ;;  %v7357_v54 = vpack.c.bf16 %v3344_v23, %v3344_v23  ;;  %v3570_v8 = vrot.slane %v3566_v34, 4  ;;  %v8422_v11 = vmov (!%p7118_p8), 0  }
 0x266   : > { %v3707_v3 = vld [vmem:[#allocation2 + $0x54] sm:$0x1]  ;;  %3661 = vst.msk [vmem:[#allocation2 + $0x4c] sm:$0xf] %vm3610_vm9, %v3527_v22  ;;  %v3680_v25 = vsel %vm9513_vm13, %v3569_v4, %v3679_v37  ;;  %v3552_v40 = vor.u32 %v3550_v38, %v3549_v5  ;;  %v3572_v1 = vshrl.u32 %v7359_v52, 16  ;;  %v3575_v0 = vshll.u32 %v7359_v52, 16 }
 0x267   : > { %v3704_v7 = vld [vmem:[#allocation2 + $0x48] sm:$0x1]  ;;  %v3708_v46 = vsel %vm9520_vm14, 0, %v3707_v3  ;;  %3681 = vst [vmem:[#allocation2 + $0x6c] sm:$0xf] %v3680_v25  ;;  %v3555_v49 = vshrl.u32 %v7357_v54, 16 }
 0x268   : > { %v3705_v32 = vsel %vm9520_vm14, 0, %v3704_v7  ;;  %v3738_v60 = vld [vmem:[#allocation2 + $0x5c] sm:$0x1]  ;;  %3709 = vst [vmem:[#allocation2 + $0x54] sm:$0x1] %v3708_v46  ;;  %v3673_v24 = vsel %vm9513_vm13, %v3552_v40, %v3672_v47  ;;  %v3574_v30 = vrot.slane %v3572_v1, 7 }
 0x269   : > { %3706 = vst [vmem:[#allocation2 + $0x48] sm:$0x1] %v3705_v32  ;;  %v3739_v21 = vsel %vm9558_vm1, 0, %v3738_v60  ;;  %3674 = vst [vmem:[#allocation2 + $0x60] sm:$0xf] %v3673_v24  ;;  %v3557_v33 = vrot.slane %v3555_v49, 7 }
 0x26a   : > { %3740 = vst [vmem:[#allocation2 + $0x5c] sm:$0x1] %v3739_v21  ;;  %v3577_v2 = vor.u32 %v3575_v0, %v3574_v30  ;;  %v3579_v59 = vrot.slane %v3574_v30, 4  ;;  %v3558_v61 = vshll.u32 %v7357_v54, 16  ;;  %v3553_v39 = vrot.slane %v3549_v5, 4 }
 0x26b   : > { %v3562_v62 = vrot.slane %v3557_v33, 4  ;;  %3751 = vst.msk [vmem:[#allocation2] sm:$0xf] (!%p7118_p8), %vm3610_vm9, %v8422_v11  ;;  %3752 = vst.msk [vmem:[#allocation2 + $0x4] sm:$0xf] (!%p7118_p8), %vm3610_vm9, %v8422_v11 }
 0x26c   : > { %v3735_v57 = vld [vmem:[#allocation2 + $0x50] sm:$0x1]  ;;  %v3578_v28 = vsel %vm9526_vm15, %v3570_v8, %v3577_v2  ;;  %v3684_v50 = vsel %vm9520_vm14, %v3579_v59, %v3683_v14  ;;  %v3560_v45 = vor.u32 %v3558_v61, %v3557_v33  ;;  %3754 = vst.msk [vmem:[#allocation2 + $0x8] sm:$0x1] (!%p7118_p8), %vm3618_vm11, %v8422_v11 }
 0x26d   : > { %v3736_v31 = vsel %vm9558_vm1, 0, %v3735_v57  ;;  %3682 = vst.msk [vmem:[#allocation2 + $0x70] sm:$0xf] %vm3610_vm9, %v3578_v28  ;;  %3685 = vst [vmem:[#allocation2 + $0x74] sm:$0x1] %v3684_v50  ;;  %v3677_v44 = vsel %vm9520_vm14, %v3562_v62, %v3676_v41 }
 0x26e   : > { %v3713_v15 = vld [vmem:[#allocation2 + $0x6c] sm:$0x1]  ;;  %3737 = vst [vmem:[#allocation2 + $0x50] sm:$0x1] %v3736_v31  ;;  %v3561_v9 = vsel %vm9526_vm15, %v3553_v39, %v3560_v45  ;;  %3678 = vst [vmem:[#allocation2 + $0x68] sm:$0x1] %v3677_v44 }
 0x26f   : > { %v3714_v56 = vsel %vm9520_vm14, 0, %v3713_v15  ;;  %3675 = vst.msk [vmem:[#allocation2 + $0x64] sm:$0xf] %vm3610_vm9, %v3561_v9 }
 0x270   : > { %3715 = vst [vmem:[#allocation2 + $0x6c] sm:$0x1] %v3714_v56  ;;  %v3710_v42 = vld [vmem:[#allocation2 + $0x60] sm:$0x1] }
 0x271   : > { %v3711_v26 = vsel %vm9520_vm14, 0, %v3710_v42  ;;  %3750 = sbr.rel (%p7118_p8) target bundleno = 632 (0x278), region = 52 }
 0x272   : > { %3712 = vst [vmem:[#allocation2 + $0x60] sm:$0x1] %v3711_v26 }
 0x274   : > { %v3744_v12 = vld [vmem:[#allocation2 + $0x74] sm:$0x1] }
 0x275   : > { %v3745_v53 = vsel %vm9558_vm1, 0, %v3744_v12  ;;  %v3741_v10 = vld [vmem:[#allocation2 + $0x68] sm:$0x1] }
 0x276   : > { %3746 = vst [vmem:[#allocation2 + $0x74] sm:$0x1] %v3745_v53  ;;  %v3742_v19 = vsel %vm9558_vm1, 0, %v3741_v10 }
 0x277   : > { %3743 = vst [vmem:[#allocation2 + $0x68] sm:$0x1] %v3742_v19 }
 0x278 PF: > { %p7119_p9 = scmp.ne.s32.totalorder %s8404_s24, 1 }
 0x279   : > { %v8423_v63 = vmov (!%p7119_p9), 0  }
 0x27a   : > { %3758 = sbr.rel (%p7119_p9) target bundleno = 641 (0x281), region = 56  ;;  %3760 = vst.msk [vmem:[#allocation2 + $0x6c] sm:$0xf] (!%p7119_p9), %vm3610_vm9, %v8423_v63  ;;  %3761 = vst.msk [vmem:[#allocation2 + $0x70] sm:$0xf] (!%p7119_p9), %vm3610_vm9, %v8423_v63 }
 0x27b   : > { %3763 = vst.msk [vmem:[#allocation2 + $0x74] sm:$0x1] (!%p7119_p9), %vm3618_vm11, %v8423_v63 }
 0x281 PF: > { %v7120_v36 = vld [vmem:[%s10478_s3 + $0x4] sm:$0xf]  ;;  %vm4032_vm2 = vcmask 1043456   ;;  %v9698_v48 = vld [vmem:[#allocation2] sm:$0xf]  ;;  %vm4007_vm5 = vcmask 64512  }
 0x282   : > { %8275 = vmatprep.subr.msk.bf16.mxu1 %vm4032_vm2, %v7120_v36  ;;  %v4034_v18 = vsel %vm4032_vm2, %v7120_v36, 0  ;;  %v9702_v55 = vld [vmem:[#allocation2 + $0x4] sm:$0xf]  ;;  %v9704_v51 = vld [vmem:[#allocation2 + $0x8] sm:$0x1]  ;;  %v3790_v16 = vshrl.u32 %v9698_v48, 16 }
 0x283   : > { %7748 = vmatpush3.bf16.msra.mxu1 %v4034_v18  ;;  %v3793_v34 = vshll.u32 %v9698_v48, 16  ;;  %v3799_v58 = vshll.u32 %v9702_v55, 16  ;;  %v3803_v17 = vshrl.u32 %v9702_v55, 16  ;;  %v3809_v43 = vshll.u32 %v9704_v51, 16  ;;  %v3780_v6 = vld [vmem:[%s10478_s3] sm:$0xf] }
 0x284   : > { %v3792_v37 = vrot.slane %v3790_v16, 4  ;;  %8276 = vmatprep.subr.msk.bf16.mxu1 %vm4032_vm2, %v3780_v6  ;;  %v9715_v35 = vld [vmem:[#allocation2 + $0xc] sm:$0xf]  ;;  %v9717_v13 = vld [vmem:[#allocation2 + $0x10] sm:$0xf]  ;;  %v4198_v33 = vsel %vm4032_vm2, %v3780_v6, 0 }
 0x285   : > { %v3795_v4 = vrot.slane %v3793_v34, 5  ;;  %v3801_v5 = vrot.slane %v3799_v58, 5  ;;  %v3805_v38 = vrot.slane %v3803_v17, 4  ;;  %v3811_v22 = vrot.slane %v3809_v43, 5  ;;  %v3782_v20 = vld [vmem:[#allocation2 + $0x14] sm:$0x1] }
 0x286   : > { %v3814_v47 = vshrl.u32 %v9715_v35, 16  ;;  %v3817_v52 = vshll.u32 %v9715_v35, 16  ;;  %v3823_v23 = vshll.u32 %v9717_v13, 16  ;;  %v3827_v3 = vshrl.u32 %v9717_v13, 16  ;;  %v4298_v7 = vld [vmem:[#allocation2 + $0xc] sm:$0xe] }
 0x287   : > { %v3796_v25 = vor.u32 %v3795_v4, %v3792_v37  ;;  %v3806_v40 = vor.u32 %v3805_v38, %v3801_v5  ;;  %v3833_v46 = vshll.u32 %v3782_v20, 16  ;;  %v7154_v32 = vrot.slane %v4298_v7, 9  ;;  %v9724_v49 = vld [vmem:[#allocation2 + $0x18] sm:$0xf]  ;;  %v9727_v61 = vld [vmem:[#allocation2 + $0x1c] sm:$0xf] }
 0x288   : > { %v3816_v60 = vrot.slane %v3814_v47, 4  ;;  %v3819_v1 = vrot.slane %v3817_v52, 5  ;;  %v3825_v21 = vrot.slane %v3823_v23, 5  ;;  %v3829_v24 = vrot.slane %v3827_v3, 4  ;;  %v9737_v31 = vld [vmem:[#allocation2 + $0x20] sm:$0x1] }
 0x289   : > { %v3797_v54 = vrot.slane %v3796_v25, 4  ;;  %v3807_v30 = vrot.slane %v3806_v40, 4  ;;  %v3835_v0 = vrot.slane %v3833_v46, 5  ;;  %v4330_v14 = vrot.slane %v9717_v13, 5  ;;  %v9740_v56 = vld [vmem:[#allocation2 + $0x24] sm:$0xf] }
 0x28a   : > { %v3820_v8 = vor.u32 %v3819_v1, %v3816_v60  ;;  %v3830_v2 = vor.u32 %v3829_v24, %v3825_v21  ;;  %v4333_v59 = vrot.slane %v3782_v20, 5  ;;  %v3838_v62 = vshrl.u32 %v9724_v49, 16  ;;  %v9749_v12 = vld [vmem:[#allocation2 + $0x28] sm:$0xf]  ;;  %v9758_v63 = vld [vmem:[#allocation2 + $0x2c] sm:$0x1] }
 0x28b   : > { %v3802_v57 = vsel %vm8556_vm3, %v3797_v54, %v3801_v5  ;;  %v3812_v28 = vsel %vm8556_vm3, %v3807_v30, %v3811_v22  ;;  %v9735_v50 = vsel %vm8657_vm7, %v7154_v32, %v4330_v14  ;;  %v4332_v41 = vrot.slane %v4330_v14, 4  ;;  %v9767_v22 = vld [vmem:[#allocation2 + $0x30] sm:$0xf]  ;;  %v9769_v20 = vld [vmem:[#allocation2 + $0x34] sm:$0xf] }
 0x28c   : > { %v7121_v15 = vcombine.low %v3802_v57, %v3812_v28  ;;  %v3821_v39 = vrot.slane %v3820_v8, 4  ;;  %v3831_v45 = vrot.slane %v3830_v2, 4  ;;  %v3841_v9 = vshll.u32 %v9724_v49, 16  ;;  %v9771_v32 = vld [vmem:[#allocation2 + $0x38] sm:$0x1] }
 0x28d   : > { %v9744_v42 = vsel %vm8657_vm7, %v4332_v41, %v4333_v59  ;;  %v3847_v44 = vshll.u32 %v9727_v61, 16  ;;  %v3851_v26 = vshrl.u32 %v9727_v61, 16  ;;  %v3840_v11 = vrot.slane %v3838_v62, 4  ;;  %v9779_v54 = vld [vmem:[%s10478_s3 + $0x8] sm:$0xf] }
 0x28e   : > { %7749 = vmatprep.mubr.msk.bf16.mxu1 %vm4007_vm5, %v7121_v15  ;;  %v3826_v53 = vsel %vm8556_vm3, %v3821_v39, %v3825_v21  ;;  %v3836_v10 = vsel %vm8556_vm3, %v3831_v45, %v3835_v0  ;;  %v7163_v19 = vcombine.low %v9735_v50, %v9744_v42  ;;  %v3843_v18 = vrot.slane %v3841_v9, 5  ;;  %v9786_v2 = vld [vmem:[#allocation2 + $0x3c] sm:$0xf]  ;;  %v9790_v41 = vld [vmem:[#allocation2 + $0x40] sm:$0xf] }
 0x28f   : > { %v7122_v36 = vcombine.low %v3826_v53, %v3836_v10  ;;  %v3849_v16 = vrot.slane %v3847_v44, 5  ;;  %v3853_v34 = vrot.slane %v3851_v26, 4  ;;  %v3857_v58 = vshll.u32 %v9737_v31, 16  ;;  %v9796_v26 = vld [vmem:[#allocation2 + $0x44] sm:$0x1] }
 0x290   : > { %v3862_v17 = vshrl.u32 %v9740_v56, 16  ;;  %v3865_v43 = vshll.u32 %v9740_v56, 16  ;;  %v3871_v6 = vshll.u32 %v9749_v12, 16  ;;  %v3844_v37 = vor.u32 %v3843_v18, %v3840_v11 }
 0x291   : > { %7750 = vmatmul.mubr.msk.bf16.vlgmr.msra.gmra.mrb[8].mxu1 %vm4007_vm5, %v7122_v36  ;;  %v3854_v4 = vor.u32 %v3853_v34, %v3849_v16  ;;  %v3875_v5 = vshrl.u32 %v9749_v12, 16  ;;  %v3881_v38 = vshll.u32 %v9758_v63, 16  ;;  %v3859_v47 = vrot.slane %v3857_v58, 5  ;;  %v9803_v34 = vld [vmem:[#allocation2 + $0x48] sm:$0xf] }
 0x292   : > { %7766 = vmatpush3.bf16.msra.mxu1 %v4198_v33  ;;  %v3864_v52 = vrot.slane %v3862_v17, 4  ;;  %v3867_v23 = vrot.slane %v3865_v43, 5  ;;  %v3873_v3 = vrot.slane %v3871_v6, 5  ;;  %v3845_v7 = vrot.slane %v3844_v37, 4  ;;  %v9805_v58 = vld [vmem:[#allocation2 + $0x4c] sm:$0xf] }
 0x293   : > { %v3855_v25 = vrot.slane %v3854_v4, 4  ;;  %v3877_v40 = vrot.slane %v3875_v5, 4  ;;  %v3883_v46 = vrot.slane %v3881_v38, 5  ;;  %v3886_v1 = vshrl.u32 %v9767_v22, 16  ;;  %8277 = vmatprep.subr.msk.bf16.mxu1 %vm4032_vm2, %v9779_v54  ;;  %v9807_v4 = vld [vmem:[#allocation2 + $0x50] sm:$0x1] }
 0x294   : > { %v3868_v60 = vor.u32 %v3867_v23, %v3864_v52  ;;  %v3889_v21 = vshll.u32 %v9767_v22, 16  ;;  %v3895_v24 = vshll.u32 %v9769_v20, 16  ;;  %v3850_v30 = vsel %vm8556_vm3, %v3845_v7, %v3849_v16  ;;  %v9811_v23 = vld [vmem:[#allocation2 + $0x54] sm:$0xf] }
 0x295   : > { %v3860_v0 = vsel %vm8556_vm3, %v3855_v25, %v3859_v47  ;;  %v3878_v14 = vor.u32 %v3877_v40, %v3873_v3  ;;  %v3899_v8 = vshrl.u32 %v9769_v20, 16  ;;  %v3888_v57 = vrot.slane %v3886_v1, 4 }
 0x296   : > { %v7123_v59 = vcombine.low %v3850_v30, %v3860_v0  ;;  %v3869_v33 = vrot.slane %v3868_v60, 4  ;;  %v3891_v28 = vrot.slane %v3889_v21, 5  ;;  %v3897_v39 = vrot.slane %v3895_v24, 5 }
 0x297   : > { %v3879_v15 = vrot.slane %v3878_v14, 4  ;;  %v3901_v45 = vrot.slane %v3899_v8, 4  ;;  %v3905_v62 = vshll.u32 %v9771_v32, 16  ;;  %v3910_v53 = vshrl.u32 %v9786_v2, 16 }
 0x298   : > { %7753 = vmatprep.mubr.msk.bf16.mxu1 %vm4007_vm5, %v7123_v59  ;;  %v3874_v9 = vsel %vm8556_vm3, %v3869_v33, %v3873_v3  ;;  %v3892_v44 = vor.u32 %v3891_v28, %v3888_v57  ;;  %v3913_v10 = vshll.u32 %v9786_v2, 16  ;;  %v3919_v16 = vshll.u32 %v9790_v41, 16  ;;  %v9823_v59 = vld [vmem:[#allocation2 + $0x5c] sm:$0x1] }
 0x299   : > { %v3884_v11 = vsel %vm8556_vm3, %v3879_v15, %v3883_v46  ;;  %v3902_v36 = vor.u32 %v3901_v45, %v3897_v39  ;;  %v3907_v18 = vrot.slane %v3905_v62, 5  ;;  %v3912_v6 = vrot.slane %v3910_v53, 4  ;;  %v9818_v46 = vld [vmem:[#allocation2 + $0x58] sm:$0xf] }
 0x29a   : > { %v7124_v17 = vcombine.low %v3874_v9, %v3884_v11  ;;  %v3893_v43 = vrot.slane %v3892_v44, 4  ;;  %v3915_v37 = vrot.slane %v3913_v10, 5  ;;  %v3921_v38 = vrot.slane %v3919_v16, 5 }
 0x29b   : > { %v3903_v5 = vrot.slane %v3902_v36, 4  ;;  %v3923_v47 = vshrl.u32 %v9790_v41, 16  ;;  %v3929_v52 = vshll.u32 %v9796_v26, 16  ;;  %v3934_v25 = vshrl.u32 %v9803_v34, 16 }
 0x29c   : > { %7754 = vmatmul.mubr.msk.bf16.gmra.mrb[12].mxu1 %vm4007_vm5, %v7124_v17  ;;  %v3898_v3 = vsel %vm8556_vm3, %v3893_v43, %v3897_v39  ;;  %v3916_v7 = vor.u32 %v3915_v37, %v3912_v6  ;;  %v3937_v40 = vshll.u32 %v9803_v34, 16  ;;  %v3943_v24 = vshll.u32 %v9805_v58, 16 }
 0x29d   : > { %v3908_v60 = vsel %vm8556_vm3, %v3903_v5, %v3907_v18  ;;  %v3925_v1 = vrot.slane %v3923_v47, 4  ;;  %v3931_v21 = vrot.slane %v3929_v52, 5  ;;  %v3936_v14 = vrot.slane %v3934_v25, 4  ;;  %v4297_v25 = vld [vmem:[#allocation2] sm:$0xe] }
 0x29e   : > { %v7125_v30 = vcombine.low %v3898_v3, %v3908_v60  ;;  %v3917_v0 = vrot.slane %v3916_v7, 4  ;;  %v3939_v8 = vrot.slane %v3937_v40, 5  ;;  %v3945_v57 = vrot.slane %v3943_v24, 5  ;;  %v4299_v24 = vld [vmem:[#allocation2 + $0x18] sm:$0xe] }
 0x29f   : > { %v3926_v33 = vor.u32 %v3925_v1, %v3921_v38  ;;  %v3947_v28 = vshrl.u32 %v9805_v58, 16  ;;  %v3953_v15 = vshll.u32 %v9807_v4, 16  ;;  %v3958_v62 = vshrl.u32 %v9811_v23, 16 }
 0x2a0   : > { %7757 = vmatprep.mubr.msk.bf16.mxu1 %vm4007_vm5, %v7125_v30  ;;  %v3922_v39 = vsel %vm8556_vm3, %v3917_v0, %v3921_v38  ;;  %v3940_v45 = vor.u32 %v3939_v8, %v3936_v14  ;;  %v3961_v9 = vshll.u32 %v9811_v23, 16  ;;  %v3967_v11 = vshll.u32 %v9818_v46, 16  ;;  %v4300_v30 = vld [vmem:[#allocation2 + $0x24] sm:$0xe] }
 0x2a1   : > { %v3927_v44 = vrot.slane %v3926_v33, 4  ;;  %v3949_v53 = vrot.slane %v3947_v28, 4  ;;  %v3955_v10 = vrot.slane %v3953_v15, 5  ;;  %v3960_v18 = vrot.slane %v3958_v62, 4 }
 0x2a2   : > { %v3941_v36 = vrot.slane %v3940_v45, 4  ;;  %v3963_v16 = vrot.slane %v3961_v9, 5  ;;  %v3971_v17 = vshrl.u32 %v9818_v46, 16  ;;  %v3969_v37 = vrot.slane %v3967_v11, 5  ;;  %v4301_v45 = vld [vmem:[#allocation2 + $0x30] sm:$0xe] }
 0x2a3   : > { %v3932_v43 = vsel %vm8556_vm3, %v3927_v44, %v3931_v21  ;;  %v3950_v6 = vor.u32 %v3949_v53, %v3945_v57  ;;  %v3977_v5 = vshll.u32 %v9823_v59, 16  ;;  %v4326_v0 = vrot.slane %v9704_v51, 5 }
 0x2a4   : > { %v7126_v38 = vcombine.low %v3922_v39, %v3932_v43  ;;  %v3964_v47 = vor.u32 %v3963_v16, %v3960_v18  ;;  %v3973_v52 = vrot.slane %v3971_v17, 4  ;;  %v3946_v3 = vsel %vm8556_vm3, %v3941_v36, %v3945_v57 }
 0x2a5   : > { %v3951_v7 = vrot.slane %v3950_v6, 4  ;;  %v3979_v1 = vrot.slane %v3977_v5, 5  ;;  %v7137_v57 = vcombine.low %v9698_v48, %v9702_v55  ;;  %v7153_v28 = vrot.slane %v4297_v25, 9 }
 0x2a6   : > { %7758 = vmatmul.mubr.msk.bf16.gmra.mrb[16].mxu1 %vm4007_vm5, %v7126_v38  ;;  %v3965_v40 = vrot.slane %v3964_v47, 4  ;;  %v3974_v60 = vor.u32 %v3973_v52, %v3969_v37  ;;  %v4323_v15 = vrot.slane %v9702_v55, 5  ;;  %v7155_v39 = vrot.slane %v4299_v24, 9  ;;  %v4302_v55 = vld [vmem:[#allocation2 + $0x3c] sm:$0xe] }
 0x2a7   : > { %v3956_v21 = vsel %vm8556_vm3, %v3951_v7, %v3955_v10  ;;  %v4337_v51 = vrot.slane %v9727_v61, 5  ;;  %v4340_v9 = vrot.slane %v9737_v31, 5  ;;  %v7156_v44 = vrot.slane %v4300_v30, 9 }
 0x2a8   : > { %v7127_v14 = vcombine.low %v3946_v3, %v3956_v21  ;;  %v3970_v8 = vsel %vm8556_vm3, %v3965_v40, %v3969_v37  ;;  %v3975_v33 = vrot.slane %v3974_v60, 4  ;;  %v4324_v10 = vsel %vm8657_vm7, %v7153_v28, %v4323_v15 }
 0x2a9   : > { %v4325_v48 = vrot.slane %v4323_v15, 4  ;;  %v4344_v11 = vrot.slane %v9749_v12, 5  ;;  %v4338_v36 = vsel %vm8657_vm7, %v7155_v39, %v4337_v51  ;;  %v4339_v18 = vrot.slane %v4337_v51, 4  ;;  %v7178_v39 = vld [vmem:[%s10478_s3 + $0xc] sm:$0xf] }
 0x2aa   : > { %7761 = vmatprep.mubr.msk.bf16.mxu1 %vm4007_vm5, %v7127_v14  ;;  %v3980_v62 = vsel %vm8556_vm3, %v3975_v33, %v3979_v1  ;;  %v4347_v16 = vrot.slane %v9758_v63, 5  ;;  %v7157_v17 = vrot.slane %v4301_v45, 9  ;;  %v4351_v37 = vrot.slane %v9769_v20, 5  ;;  %v4304_v63 = vld [vmem:[#allocation2 + $0x54] sm:$0xe] }
 0x2ab   : > { %v7128_v53 = vcombine.low %v3970_v8, %v3980_v62  ;;  %v4327_v43 = vsel %vm8657_vm7, %v4325_v48, %v4326_v0  ;;  %v4345_v31 = vsel %vm8657_vm7, %v7156_v44, %v4344_v11  ;;  %v4346_v6 = vrot.slane %v4344_v11, 4  ;;  %v9937_v44 = vld [vmem:[#allocation2 + $0x10] sm:$0xf]  ;;  %v9943_v11 = vld [vmem:[%s10478_s3 + $0x14] sm:$0xf] }
 0x2ac   : > { %v7162_v5 = vcombine.low %v4324_v10, %v4327_v43  ;;  %v4341_v38 = vsel %vm8657_vm7, %v4339_v18, %v4340_v9  ;;  %v4354_v47 = vrot.slane %v9771_v32, 5  ;;  %v7158_v52 = vrot.slane %v4302_v55, 9  ;;  %v8368_v9 = vld [vmem:[#allocation2 + $0x24] sm:$0xff]   ;;  %v4745_v55 = vld [vmem:[#allocation2 + $0x18] sm:$0xf] }
 0x2ad   : > { %v7164_v3 = vcombine.low %v4338_v36, %v4341_v38  ;;  %v4348_v7 = vsel %vm8657_vm7, %v4346_v6, %v4347_v16  ;;  %v4352_v25 = vsel %vm8657_vm7, %v7157_v17, %v4351_v37  ;;  %v4353_v40 = vrot.slane %v4351_v37, 4  ;;  %v9945_v36 = vld [vmem:[#allocation2 + $0x1c] sm:$0xf]  ;;  %v8369_v38 = vld [vmem:[#allocation2 + $0x30] sm:$0xff]  }
 0x2ae   : > { %7762 = vmatmul.mubr.msk.bf16.gmra.mrb[20].mxu1 %vm4007_vm5, %v7128_v53  ;;  %v7165_v60 = vcombine.low %v4345_v31, %v4348_v7  ;;  %v4358_v1 = vrot.slane %v9790_v41, 5  ;;  %v4361_v24 = vrot.slane %v9796_v26, 5  ;;  %v7138_v32 = vcombine.low %v9715_v35, %v9717_v13 }
 0x2af   : > { %7767 = vmatprep.mubr.msk.bf16.mxu1 %vm4007_vm5, %v7137_v57  ;;  %v4355_v21 = vsel %vm8657_vm7, %v4353_v40, %v4354_v47  ;;  %v7160_v30 = vrot.slane %v4304_v63, 9  ;;  %v4372_v33 = vrot.slane %v9818_v46, 5  ;;  %v7139_v57 = vcombine.low %v9724_v49, %v9727_v61  ;;  %v8370_v63 = vld [vmem:[#allocation2 + $0x3c] sm:$0xff]  }
 0x2b0   : > { %v7166_v0 = vcombine.low %v4352_v25, %v4355_v21  ;;  %v4359_v14 = vsel %vm8657_vm7, %v7158_v52, %v4358_v1  ;;  %v4360_v8 = vrot.slane %v4358_v1, 4  ;;  %v4375_v28 = vrot.slane %v9823_v59, 5  ;;  %v4748_v25 = vld [vmem:[#allocation2 + $0x24] sm:$0xf]  ;;  %v9963_v21 = vld [vmem:[#allocation2 + $0x20] sm:$0x1] }
 0x2b1   : > { %v4428_v26 = vsel %vm4032_vm2, %v9779_v54, 0  ;;  %v4373_v13 = vsel %vm8657_vm7, %v7160_v30, %v4372_v33  ;;  %v4374_v15 = vrot.slane %v4372_v33, 4  ;;  %v7140_v54 = vcombine.low %v9740_v56, %v9749_v12 }
 0x2b2   : > { %v4362_v35 = vsel %vm8657_vm7, %v4360_v8, %v4361_v24  ;;  %v7141_v59 = vcombine.low %v9767_v22, %v9769_v20  ;;  %v7142_v62 = vcombine.low %v9786_v2, %v9790_v41  ;;  %v7143_v51 = vcombine.low %v9803_v34, %v9805_v58  ;;  %v7195_v22 = vld [vmem:[%s10478_s3 + $0x10] sm:$0xf]  ;;  %v4303_v2 = vld [vmem:[#allocation2 + $0x48] sm:$0xe] }
 0x2b3   : > { %v7167_v45 = vcombine.low %v4359_v14, %v4362_v35  ;;  %v4376_v49 = vsel %vm8657_vm7, %v4374_v15, %v4375_v28  ;;  %v7144_v56 = vcombine.low %v9811_v23, %v9818_v46  ;;  %v4627_v12 = vsel %vm4032_vm2, %v7178_v39, 0  ;;  %v8367_v46 = vld [vmem:[#allocation2 + $0x18] sm:$0xff]   ;;  %v4751_v15 = vld [vmem:[#allocation2 + $0x30] sm:$0xf] }
 0x2b4   : > { %v7169_v61 = vcombine.low %v4373_v13, %v4376_v49  ;;  %v4365_v20 = vrot.slane %v9805_v58, 5  ;;  %v7159_v41 = vrot.slane %v4303_v2, 9  ;;  %v4368_v23 = vrot.slane %v9807_v4, 5  ;;  %v8366_v58 = vld [vmem:[#allocation2 + $0xc] sm:$0xff]   ;;  %v9973_v49 = vld [vmem:[#allocation2 + $0x34] sm:$0xf] }
 0x2b5   : > { %v4742_v4 = vld [vmem:[#allocation2 + $0xc] sm:$0xf]  ;;  %v5009_v48 = vsel %vm4032_vm2, %v7195_v22, 0  ;;  %v4776_v18 = vshll.u32 %v9937_v44, 16  ;;  %v4780_v16 = vshrl.u32 %v9937_v44, 16  ;;  %v4791_v31 = vshrl.u32 %v4745_v55, 16 }
 0x2b6   : > { %7768 = vmatmul.mubr.msk.bf16.vlgmr.msra.gmra.mrb[8].mxu1 %vm4007_vm5, %v7138_v32  ;;  %v4367_v34 = vrot.slane %v4365_v20, 4  ;;  %v4366_v50 = vsel %vm8657_vm7, %v7159_v41, %v4365_v20  ;;  %v4767_v53 = vshrl.u32 %v4742_v4, 16  ;;  %v4770_v10 = vshll.u32 %v4742_v4, 16  ;;  %v9961_v32 = vld [vmem:[#allocation2 + $0x28] sm:$0xf] }
 0x2b7   : > { %7784 = vmatpush3.bf16.msra.mxu1 %v4428_v26  ;;  %7771 = vmatprep.mubr.msk.bf16.mxu1 %vm4007_vm5, %v7139_v57  ;;  %v4794_v6 = vshll.u32 %v4745_v55, 16  ;;  %v4800_v37 = vshll.u32 %v9945_v36, 16  ;;  %v9955_v47 = vrot.slane %v4776_v18, 5  ;;  %v4782_v52 = vrot.slane %v4780_v16, 4  ;;  %v9977_v2 = vld [vmem:[#allocation2 + $0x40] sm:$0xf] }
 0x2b8   : > { %8278 = vmatprep.subr.msk.bf16.mxu1 %vm4032_vm2, %v7178_v39  ;;  %v4369_v42 = vsel %vm8657_vm7, %v4367_v34, %v4368_v23  ;;  %v4769_v17 = vrot.slane %v4767_v53, 4  ;;  %v4772_v43 = vrot.slane %v4770_v10, 5  ;;  %v4793_v40 = vrot.slane %v4791_v31, 4  ;;  %v8371_v39 = vld [vmem:[#allocation2 + $0x48] sm:$0xff]  }
 0x2b9   : > { %v9959_v1 = vrot.slane %v4800_v37, 5  ;;  %v4783_v30 = vor.u32 %v4782_v52, %v9955_v47  ;;  %v4815_v14 = vshrl.u32 %v4748_v25, 16  ;;  %v4818_v8 = vshll.u32 %v4748_v25, 16 }
 0x2ba   : > { %v4773_v7 = vor.u32 %v4772_v43, %v4769_v17  ;;  %v4824_v33 = vshll.u32 %v9961_v32, 16  ;;  %v4828_v57 = vshrl.u32 %v9961_v32, 16  ;;  %v4810_v13 = vshll.u32 %v9963_v21, 16 }
 0x2bb   : > { %v4842_v20 = vshll.u32 %v4751_v15, 16  ;;  %v4872_v10 = vshll.u32 %v9977_v2, 16 }
 0x2bc   : > { %v4774_v28 = vrot.slane %v4773_v7, 4 }
 0x2bd   : > { %v4844_v17 = vrot.slane %v4842_v20, 5 }
 0x2be   : > { %7772 = vmatmul.mubr.msk.bf16.gmra.mrb[12].mxu1 %vm4007_vm5, %v7140_v54  ;;  %v4779_v41 = vsel %vm8556_vm3, %v4774_v28, %v9955_v47 }
 0x2bf   : > { %7775 = vmatprep.mubr.msk.bf16.mxu1 %vm4007_vm5, %v7141_v59  ;;  %v4817_v59 = vrot.slane %v4815_v14, 4 }
 0x2c6   : > { %7776 = vmatmul.mubr.msk.bf16.gmra.mrb[16].mxu1 %vm4007_vm5, %v7142_v62  ;;  %v4820_v62 = vrot.slane %v4818_v8, 5  ;;  %v10008_v8 = vld [vmem:[#allocation2 + $0x4c] sm:$0xf] }
 0x2c7   : > { %7779 = vmatprep.mubr.msk.bf16.mxu1 %vm4007_vm5, %v7143_v51  ;;  %v4754_v51 = vld [vmem:[#allocation2 + $0x3c] sm:$0xf] }
 0x2c8   : > { %v4863_v4 = vshrl.u32 %v4754_v51, 16  ;;  %v4821_v53 = vor.u32 %v4820_v62, %v4817_v59 }
 0x2ca   : > { %v4865_v47 = vrot.slane %v4863_v4, 4  ;;  %v4822_v25 = vrot.slane %v4821_v53, 4 }
 0x2ce   : > { %7780 = vmatmul.mubr.msk.bf16.gmra.mrb[20].mxu1 %vm4007_vm5, %v7144_v56  ;;  %v9975_v56 = vrot.slane %v4824_v33, 5 }
 0x2cf   : > { %7785 = vmatprep.mubr.msk.bf16.mxu1 %vm4007_vm5, %v7162_v5  ;;  %v4804_v5 = vshrl.u32 %v9945_v36, 16 }
 0x2d0   : > { %v4827_v59 = vsel %vm8556_vm3, %v4822_v25, %v9975_v56 }
 0x2d1   : > { %v4806_v24 = vrot.slane %v4804_v5, 4 }
 0x2d3   : > { %v4807_v35 = vor.u32 %v4806_v24, %v9959_v1  ;;  %v4757_v24 = vld [vmem:[#allocation2 + $0x48] sm:$0xf] }
 0x2d5   : > { %v4808_v23 = vrot.slane %v4807_v35, 4  ;;  %v4887_v35 = vshrl.u32 %v4757_v24, 16 }
 0x2d6   : > { %7786 = vmatmul.mubr.msk.bf16.vlgmr.msra.gmra.mrb[8].mxu1 %vm4007_vm5, %v7163_v19  ;;  %v7168_v19 = vcombine.low %v4366_v50, %v4369_v42  ;;  %v4812_v50 = vrot.slane %v4810_v13, 5  ;;  %v9982_v42 = vld [vmem:[#allocation2 + $0x2c] sm:$0x1]  ;;  %v4760_v13 = vld [vmem:[#allocation2 + $0x54] sm:$0xf] }
 0x2d7   : > { %7802 = vmatpush3.bf16.msra.mxu1 %v4627_v12  ;;  %7789 = vmatprep.mubr.msk.bf16.mxu1 %vm4007_vm5, %v7164_v3  ;;  %v9957_v3 = vld [vmem:[#allocation2 + $0x14] sm:$0x1]  ;;  %v4830_v12 = vrot.slane %v4828_v57, 4  ;;  %v4834_v18 = vshll.u32 %v9982_v42, 16  ;;  %v4914_v20 = vshll.u32 %v4760_v13, 16 }
 0x2d8   : > { %8279 = vmatprep.subr.msk.bf16.mxu1 %vm4032_vm2, %v7195_v22  ;;  %v4839_v22 = vshrl.u32 %v4751_v15, 16  ;;  %v4813_v31 = vsel %vm8556_vm3, %v4808_v23, %v4812_v50  ;;  %v10012_v15 = vld [vmem:[#allocation2 + $0x58] sm:$0xf] }
 0x2d9   : > { %v4831_v55 = vor.u32 %v4830_v12, %v9975_v56  ;;  %v5263_v56 = vsel %vm4032_vm2, %v9943_v11, 0 }
 0x2da   : > { %v4841_v16 = vrot.slane %v4839_v22, 4  ;;  %v4911_v22 = vshrl.u32 %v4760_v13, 16 }
 0x2de   : > { %7790 = vmatmul.mubr.msk.bf16.gmra.mrb[12].mxu1 %vm4007_vm5, %v7165_v60  ;;  %v4796_v60 = vrot.slane %v4794_v6, 5  ;;  %v9999_v6 = vld [vmem:[#allocation2 + $0x38] sm:$0x1] }
 0x2df   : > { %7793 = vmatprep.mubr.msk.bf16.mxu1 %vm4007_vm5, %v7166_v0  ;;  %v4786_v0 = vshll.u32 %v9957_v3, 16  ;;  %v4858_v14 = vshll.u32 %v9999_v6, 16 }
 0x2e0   : > { %v4797_v26 = vor.u32 %v4796_v60, %v4793_v40  ;;  %v10005_v40 = vrot.slane %v4872_v10, 5 }
 0x2e1   : > { %v4788_v54 = vrot.slane %v4786_v0, 5  ;;  %v4845_v0 = vor.u32 %v4844_v17, %v4841_v16  ;;  %v4860_v12 = vrot.slane %v4858_v14, 5  ;;  %v4916_v16 = vrot.slane %v4914_v20, 5 }
 0x2e2   : > { %v4798_v34 = vrot.slane %v4797_v26, 4 }
 0x2e4   : > { %v4803_v43 = vsel %vm8556_vm3, %v4798_v34, %v9959_v1  ;;  %v4832_v1 = vrot.slane %v4831_v55, 4  ;;  %v4924_v34 = vshrl.u32 %v10012_v15, 16  ;;  %v4763_v55 = vld [vmem:[#allocation2 + $0x60] sm:$0xf] }
 0x2e5   : > { %v7197_v33 = vcombine.low %v4803_v43, %v4813_v31  ;;  %v10030_v31 = vld [vmem:[#allocation2 + $0x64] sm:$0xf] }
 0x2e6   : > { %7794 = vmatmul.mubr.msk.bf16.gmra.mrb[16].mxu1 %vm4007_vm5, %v7167_v45  ;;  %v8372_v45 = vld [vmem:[#allocation2 + $0x54] sm:$0xff]   ;;  %v4926_v43 = vrot.slane %v4924_v34, 4 }
 0x2e7   : > { %7797 = vmatprep.mubr.msk.bf16.mxu1 %vm4007_vm5, %v7168_v19  ;;  %v4848_v19 = vshll.u32 %v9973_v49, 16 }
 0x2e9   : > { %v10001_v37 = vrot.slane %v4848_v19, 5 }
 0x2ee   : > { %7798 = vmatmul.mubr.msk.bf16.gmra.mrb[20].mxu1 %vm4007_vm5, %v7169_v61  ;;  %v4784_v61 = vrot.slane %v4783_v30, 4  ;;  %v4836_v30 = vrot.slane %v4834_v18, 5  ;;  %v4913_v18 = vrot.slane %v4911_v22, 4 }
 0x2ef   : > { %7803 = vmatprep.mubr.msk.bf16.mxu1 %vm4007_vm5, %v8366_v58  ;;  %v4852_v58 = vshrl.u32 %v9973_v49, 16 }
 0x2f0   : > { %v4837_v62 = vsel %vm8556_vm3, %v4832_v1, %v4836_v30  ;;  %v4944_v1 = vshll.u32 %v10030_v31, 16  ;;  %v4948_v30 = vshrl.u32 %v10030_v31, 16 }
 0x2f1   : > { %v4854_v5 = vrot.slane %v4852_v58, 4  ;;  %v4889_v58 = vrot.slane %v4887_v35, 4  ;;  %v7198_v10 = vcombine.low %v4827_v59, %v4837_v62 }
 0x2f3   : > { %v4855_v57 = vor.u32 %v4854_v5, %v10001_v37 }
 0x2f5   : > { %v4856_v23 = vrot.slane %v4855_v57, 4 }
 0x2f6   : > { %7804 = vmatmul.mubr.msk.bf16.vlgmr.msra.gmra.mrb[8].mxu1 %vm4007_vm5, %v8367_v46  ;;  %v4866_v46 = vshll.u32 %v4754_v51, 16  ;;  %v4846_v51 = vrot.slane %v4845_v0, 4  ;;  %v4917_v0 = vor.u32 %v4916_v16, %v4913_v18  ;;  %v5161_v16 = vrot.slane %v9957_v3, 5 }
 0x2f7   : > { %7820 = vmatpush3.bf16.msra.mxu1 %v5009_v48  ;;  %7807 = vmatprep.mubr.msk.bf16.mxu1 %vm4007_vm5, %v8368_v9  ;;  %v4789_v9 = vsel %vm8556_vm3, %v4784_v61, %v4788_v54  ;;  %v4876_v48 = vshrl.u32 %v9977_v2, 16  ;;  %v4896_v61 = vshll.u32 %v10008_v8, 16  ;;  %v4900_v54 = vshrl.u32 %v10008_v8, 16 }
 0x2f8   : > { %8280 = vmatprep.subr.msk.bf16.mxu1 %vm4032_vm2, %v9943_v11  ;;  %v4868_v52 = vrot.slane %v4866_v46, 5  ;;  %v7196_v7 = vcombine.low %v4779_v41, %v4789_v9  ;;  %v4920_v41 = vshll.u32 %v10012_v15, 16  ;;  %v4851_v5 = vsel %vm8556_vm3, %v4846_v51, %v10001_v37 }
 0x2f9   : > { %v4878_v60 = vrot.slane %v4876_v48, 4  ;;  %v4898_v9 = vrot.slane %v4896_v61, 5  ;;  %v4902_v53 = vrot.slane %v4900_v54, 4  ;;  %v10028_v48 = vld [vmem:[#allocation2 + $0x50] sm:$0x1]  ;;  %v4946_v61 = vrot.slane %v4944_v1, 5 }
 0x2fa   : > { %v4869_v28 = vor.u32 %v4868_v52, %v4865_v47  ;;  %v4922_v17 = vrot.slane %v4920_v41, 5  ;;  %v4861_v47 = vsel %vm8556_vm3, %v4856_v23, %v4860_v12  ;;  %v10040_v52 = vld [vmem:[#allocation2 + $0x5c] sm:$0x1]  ;;  %v4950_v54 = vrot.slane %v4948_v30, 4  ;;  %v10057_v12 = vld [vmem:[#allocation2 + $0x68] sm:$0x1] }
 0x2fb   : > { %v4903_v25 = vor.u32 %v4902_v53, %v4898_v9  ;;  %v7199_v57 = vcombine.low %v4851_v5, %v4861_v47  ;;  %v4918_v59 = vrot.slane %v4917_v0, 4  ;;  %v4954_v23 = vshll.u32 %v10057_v12, 16 }
 0x2fc   : > { %v4870_v50 = vrot.slane %v4869_v28, 4  ;;  %v4927_v14 = vor.u32 %v4926_v43, %v4922_v17  ;;  %v4951_v34 = vor.u32 %v4950_v54, %v4946_v61  ;;  %v5165_v43 = vrot.slane %v9945_v36, 5 }
 0x2fd   : > { %v4904_v35 = vrot.slane %v4903_v25, 4  ;;  %v5172_v3 = vrot.slane %v9961_v32, 5  ;;  %v5175_v36 = vrot.slane %v9982_v42, 5  ;;  %v5186_v42 = vrot.slane %v9977_v2, 5 }
 0x2fe   : > { %7808 = vmatmul.mubr.msk.bf16.gmra.mrb[12].mxu1 %vm4007_vm5, %v8369_v38  ;;  %v10003_v38 = vld [vmem:[#allocation2 + $0x44] sm:$0x1]  ;;  %v4875_v11 = vsel %vm8556_vm3, %v4870_v50, %v10005_v40  ;;  %v4928_v62 = vrot.slane %v4927_v14, 4  ;;  %v4923_v50 = vsel %vm8556_vm3, %v4918_v59, %v4922_v17  ;;  %v5179_v14 = vrot.slane %v9973_v49, 5 }
 0x2ff   : > { %7811 = vmatprep.mubr.msk.bf16.mxu1 %vm4007_vm5, %v8370_v63  ;;  %v8373_v63 = vld [vmem:[#allocation2 + $0x60] sm:$0xff]   ;;  %v4882_v26 = vshll.u32 %v10003_v38, 16  ;;  %v5174_v30 = vrot.slane %v5172_v3, 4  ;;  %v5188_v54 = vrot.slane %v5186_v42, 4  ;;  %v5189_v59 = vrot.slane %v10003_v38, 5 }
 0x301   : > { %v4884_v19 = vrot.slane %v4882_v26, 5 }
 0x306   : > { %7812 = vmatmul.mubr.msk.bf16.gmra.mrb[16].mxu1 %vm4007_vm5, %v8371_v39  ;;  %v4879_v39 = vor.u32 %v4878_v60, %v10005_v40  ;;  %v4906_v60 = vshll.u32 %v10028_v48, 16  ;;  %v4935_v40 = vshrl.u32 %v4763_v55, 16 }
 0x307   : > { %7815 = vmatprep.mubr.msk.bf16.mxu1 %vm4007_vm5, %v8372_v45  ;;  %v4890_v45 = vshll.u32 %v4757_v24, 16  ;;  %v4938_v24 = vshll.u32 %v4763_v55, 16 }
 0x308   : > { %v4880_v4 = vrot.slane %v4879_v39, 4  ;;  %v4908_v13 = vrot.slane %v4906_v60, 5  ;;  %v4937_v39 = vrot.slane %v4935_v40, 4  ;;  %v5167_v40 = vrot.slane %v5165_v43, 4 }
 0x309   : > { %v4892_v46 = vrot.slane %v4890_v45, 5  ;;  %v4940_v45 = vrot.slane %v4938_v24, 5  ;;  %v5168_v24 = vrot.slane %v9963_v21, 5  ;;  %v5176_v21 = vsel %vm8657_vm7, %v5174_v30, %v5175_v36 }
 0x30a   : > { %v4909_v20 = vsel %vm8556_vm3, %v4904_v35, %v4908_v13 }
 0x30b   : > { %v4893_v37 = vor.u32 %v4892_v46, %v4889_v58  ;;  %v4941_v41 = vor.u32 %v4940_v45, %v4937_v39  ;;  %v5158_v58 = vrot.slane %v9937_v44, 5  ;;  %v5169_v32 = vsel %vm8657_vm7, %v5167_v40, %v5168_v24 }
 0x30c   : > { %v5181_v39 = vrot.slane %v5179_v14, 4  ;;  %v5182_v45 = vrot.slane %v9999_v6, 5 }
 0x30d   : > { %v4894_v26 = vrot.slane %v4893_v37, 4  ;;  %v4942_v53 = vrot.slane %v4941_v41, 4  ;;  %v5160_v18 = vrot.slane %v5158_v58, 4  ;;  %v5130_v41 = vld [vmem:[#allocation2 + $0x54] sm:$0xe] }
 0x30e   : > { %7816 = vmatmul.mubr.msk.bf16.gmra.mrb[20].mxu1 %vm4007_vm5, %v8373_v63  ;;  %v10045_v63 = vld [vmem:[%s10478_s3 + $0x18] sm:$0xf]  ;;  %v5183_v6 = vsel %vm8657_vm7, %v5181_v39, %v5182_v45 }
 0x30f   : > { %7821 = vmatprep.mubr.msk.bf16.mxu1 %vm4007_vm5, %v7196_v7  ;;  %v4885_v7 = vsel %vm8556_vm3, %v4880_v4, %v4884_v19  ;;  %v4899_v22 = vsel %vm8556_vm3, %v4894_v26, %v4898_v9  ;;  %v5124_v4 = vld [vmem:[#allocation2 + $0xc] sm:$0xe]  ;;  %v4947_v17 = vsel %vm8556_vm3, %v4942_v53, %v4946_v61  ;;  %v5162_v47 = vsel %vm8657_vm7, %v5160_v18, %v5161_v16 }
 0x310   : > { %v7200_v28 = vcombine.low %v4875_v11, %v4885_v7  ;;  %v7201_v46 = vcombine.low %v4899_v22, %v4909_v20  ;;  %v7212_v55 = vrot.slane %v5124_v4, 9  ;;  %v5125_v11 = vld [vmem:[#allocation2 + $0x18] sm:$0xe]  ;;  %v5126_v7 = vld [vmem:[#allocation2 + $0x24] sm:$0xe]  ;;  %v5462_v61 = vsel %vm4032_vm2, %v10045_v63, 0 }
 0x311   : > { %v7213_v60 = vrot.slane %v5125_v11, 9  ;;  %v7214_v1 = vrot.slane %v5126_v7, 9  ;;  %v5129_v22 = vld [vmem:[#allocation2 + $0x48] sm:$0xe]  ;;  %v5200_v20 = vrot.slane %v10012_v15, 5  ;;  %v7218_v4 = vrot.slane %v5130_v41, 9 }
 0x312   : > { %v5159_v5 = vsel %vm8657_vm7, %v7212_v55, %v5158_v58  ;;  %v5196_v58 = vrot.slane %v10028_v48, 5  ;;  %v5207_v53 = vrot.slane %v10030_v31, 5  ;;  %v8376_v11 = vld [vmem:[#allocation2 + $0x30] sm:$0xff]  }
 0x313   : > { %v7221_v25 = vcombine.low %v5159_v5, %v5162_v47  ;;  %v5166_v0 = vsel %vm8657_vm7, %v7213_v60, %v5165_v43  ;;  %v8374_v5 = vld [vmem:[#allocation2 + $0x18] sm:$0xff]   ;;  %v8375_v47 = vld [vmem:[#allocation2 + $0x24] sm:$0xff]  }
 0x314   : > { %v7222_v26 = vcombine.low %v5166_v0, %v5169_v32  ;;  %v5209_v16 = vrot.slane %v5207_v53, 4  ;;  %v10148_v60 = vld [vmem:[#allocation2 + $0x28] sm:$0xf] }
 0x315   : > { %v5635_v32 = vshll.u32 %v10148_v60, 16 }
 0x316   : > { %7822 = vmatmul.mubr.msk.bf16.vlgmr.msra.gmra.mrb[8].mxu1 %vm4007_vm5, %v7197_v33  ;;  %v4930_v33 = vshll.u32 %v10040_v52, 16 }
 0x317   : > { %7838 = vmatpush3.bf16.msra.mxu1 %v5263_v56  ;;  %7825 = vmatprep.mubr.msk.bf16.mxu1 %vm4007_vm5, %v7198_v10  ;;  %v4952_v56 = vrot.slane %v4951_v34, 4  ;;  %v4956_v10 = vrot.slane %v4954_v23, 5 }
 0x318   : > { %8281 = vmatprep.subr.msk.bf16.mxu1 %vm4032_vm2, %v10045_v63  ;;  %v4932_v51 = vrot.slane %v4930_v33, 5  ;;  %v5173_v33 = vsel %vm8657_vm7, %v7214_v1, %v5172_v3  ;;  %v5193_v63 = vrot.slane %v10008_v8, 5  ;;  %v5202_v8 = vrot.slane %v5200_v20, 4  ;;  %v5577_v3 = vld [vmem:[#allocation2 + $0x18] sm:$0xf] }
 0x319   : > { %v4957_v44 = vsel %vm8556_vm3, %v4952_v56, %v4956_v10  ;;  %v7223_v35 = vcombine.low %v5173_v33, %v5176_v21  ;;  %v5201_v56 = vsel %vm8657_vm7, %v7218_v4, %v5200_v20  ;;  %v5131_v10 = vld [vmem:[#allocation2 + $0x60] sm:$0xe]  ;;  %v5602_v40 = vshrl.u32 %v5577_v3, 16 }
 0x31a   : > { %v4933_v19 = vsel %vm8556_vm3, %v4928_v62, %v4932_v51  ;;  %v7203_v37 = vcombine.low %v4947_v17, %v4957_v44  ;;  %v7254_v62 = vld [vmem:[%s10478_s3 + $0x1c] sm:$0xf]  ;;  %v5190_v51 = vsel %vm8657_vm7, %v5188_v54, %v5189_v59  ;;  %v7219_v18 = vrot.slane %v5131_v10, 9  ;;  %v10164_v54 = vld [vmem:[#allocation2 + $0x34] sm:$0xf] }
 0x31b   : > { %v7202_v9 = vcombine.low %v4923_v50, %v4933_v19  ;;  %v7217_v50 = vrot.slane %v5129_v22, 9  ;;  %v5195_v19 = vrot.slane %v5193_v63, 4  ;;  %v5210_v17 = vrot.slane %v10057_v12, 5  ;;  %v10140_v12 = vld [vmem:[#allocation2 + $0x1c] sm:$0xf] }
 0x31c   : > { %v5208_v31 = vsel %vm8657_vm7, %v7219_v18, %v5207_v53  ;;  %v5844_v7 = vsel %vm4032_vm2, %v7254_v62, 0  ;;  %v5605_v24 = vshll.u32 %v5577_v3, 16  ;;  %v5611_v1 = vshll.u32 %v10140_v12, 16  ;;  %v8377_v33 = vld [vmem:[#allocation2 + $0x3c] sm:$0xff]   ;;  %v10166_v59 = vld [vmem:[#allocation2 + $0x2c] sm:$0x1] }
 0x31d   : > { %v5194_v15 = vsel %vm8657_vm7, %v7217_v50, %v5193_v63  ;;  %v5211_v44 = vsel %vm8657_vm7, %v5209_v16, %v5210_v17  ;;  %v5615_v30 = vshrl.u32 %v10140_v12, 16  ;;  %v5604_v21 = vrot.slane %v5602_v40, 4  ;;  %v8379_v50 = vld [vmem:[#allocation2 + $0x54] sm:$0xff]   ;;  %v10176_v4 = vld [vmem:[#allocation2 + $0x40] sm:$0xf] }
 0x31e   : > { %7826 = vmatmul.mubr.msk.bf16.gmra.mrb[12].mxu1 %vm4007_vm5, %v7199_v57  ;;  %v5127_v57 = vld [vmem:[#allocation2 + $0x30] sm:$0xe]  ;;  %v7228_v43 = vcombine.low %v5208_v31, %v5211_v44  ;;  %v5663_v22 = vshrl.u32 %v10164_v54, 16  ;;  %v5589_v53 = vld [vmem:[#allocation2 + $0x48] sm:$0xf]  ;;  %v5683_v44 = vshll.u32 %v10176_v4, 16 }
 0x31f   : > { %7829 = vmatprep.mubr.msk.bf16.mxu1 %vm4007_vm5, %v7200_v28  ;;  %v5128_v28 = vld [vmem:[#allocation2 + $0x3c] sm:$0xe]  ;;  %v7215_v13 = vrot.slane %v5127_v57, 9  ;;  %v5607_v57 = vrot.slane %v5605_v24, 5  ;;  %v10182_v31 = vld [vmem:[#allocation2 + $0x38] sm:$0x1] }
 0x320   : > { %v7216_v49 = vrot.slane %v5128_v28, 9  ;;  %v5617_v28 = vrot.slane %v5615_v30, 4 }
 0x321   : > { %v5180_v2 = vsel %vm8657_vm7, %v7215_v13, %v5179_v14  ;;  %v5639_v14 = vshrl.u32 %v10148_v60, 16  ;;  %v10160_v13 = vld [vmem:[#allocation2 + $0x20] sm:$0x1] }
 0x322   : > { %v5187_v38 = vsel %vm8657_vm7, %v7216_v49, %v5186_v42  ;;  %v7224_v34 = vcombine.low %v5180_v2, %v5183_v6  ;;  %v10158_v42 = vrot.slane %v5611_v1, 5  ;;  %v5608_v6 = vor.u32 %v5607_v57, %v5604_v21  ;;  %v8381_v21 = vld [vmem:[#allocation2 + $0x6c] sm:$0xff]  }
 0x323   : > { %v7225_v23 = vcombine.low %v5187_v38, %v5190_v51  ;;  %v5641_v49 = vrot.slane %v5639_v14, 4  ;;  %v5621_v38 = vshll.u32 %v10160_v13, 16  ;;  %v5659_v51 = vshll.u32 %v10164_v54, 16  ;;  %v10202_v14 = vld [vmem:[#allocation2 + $0x44] sm:$0x1] }
 0x324   : > { %v5618_v63 = vor.u32 %v5617_v28, %v10158_v42  ;;  %v5669_v1 = vshll.u32 %v10182_v31, 16 }
 0x326   : > { %7830 = vmatmul.mubr.msk.bf16.gmra.mrb[16].mxu1 %vm4007_vm5, %v7201_v46  ;;  %v5203_v46 = vrot.slane %v10040_v52, 5 }
 0x327   : > { %7833 = vmatprep.mubr.msk.bf16.mxu1 %vm4007_vm5, %v7202_v9  ;;  %v5197_v9 = vsel %vm8657_vm7, %v5195_v19, %v5196_v58 }
 0x328   : > { %v5204_v48 = vsel %vm8657_vm7, %v5202_v8, %v5203_v46  ;;  %v7226_v52 = vcombine.low %v5194_v15, %v5197_v9  ;;  %v8380_v8 = vld [vmem:[#allocation2 + $0x60] sm:$0xff]   ;;  %v5609_v46 = vrot.slane %v5608_v6, 4  ;;  %v5619_v15 = vrot.slane %v5618_v63, 4 }
 0x329   : > { %v7227_v55 = vcombine.low %v5201_v56, %v5204_v48  ;;  %v5623_v9 = vrot.slane %v5621_v38, 5  ;;  %v10178_v56 = vrot.slane %v5659_v51, 5  ;;  %v5665_v48 = vrot.slane %v5663_v22, 4  ;;  %v10211_v38 = vld [vmem:[#allocation2 + $0x58] sm:$0xf] }
 0x32a   : > { %v5614_v3 = vsel %vm8556_vm3, %v5609_v46, %v10158_v42  ;;  %v5693_v63 = vshll.u32 %v10202_v14, 16  ;;  %v5735_v46 = vshrl.u32 %v10211_v38, 16 }
 0x32b   : > { %v5666_v24 = vor.u32 %v5665_v48, %v10178_v56 }
 0x32c   : > { %v5695_v48 = vrot.slane %v5693_v63, 5 }
 0x32e   : > { %7834 = vmatmul.mubr.msk.bf16.gmra.mrb[20].mxu1 %vm4007_vm5, %v7203_v37  ;;  %v10146_v37 = vld [vmem:[%s10478_s3 + $0x20] sm:$0xf] }
 0x32f   : > { %7839 = vmatprep.mubr.msk.bf16.mxu1 %vm4007_vm5, %v7221_v25  ;;  %v5580_v25 = vld [vmem:[#allocation2 + $0x24] sm:$0xf] }
 0x330   : > { %v5626_v36 = vshrl.u32 %v5580_v25, 16  ;;  %v5629_v0 = vshll.u32 %v5580_v25, 16 }
 0x332   : > { %v5628_v39 = vrot.slane %v5626_v36, 4  ;;  %v5631_v45 = vrot.slane %v5629_v0, 5 }
 0x334   : > { %v5632_v20 = vor.u32 %v5631_v45, %v5628_v39  ;;  %v10206_v39 = vld [vmem:[#allocation2 + $0x50] sm:$0x1] }
 0x336   : > { %7840 = vmatmul.mubr.msk.bf16.vlgmr.msra.gmra.mrb[8].mxu1 %vm4007_vm5, %v7222_v26  ;;  %v5583_v26 = vld [vmem:[#allocation2 + $0x30] sm:$0xf]  ;;  %v5633_v18 = vrot.slane %v5632_v20, 4 }
 0x337   : > { %7856 = vmatpush3.bf16.msra.mxu1 %v5462_v61  ;;  %7843 = vmatprep.mubr.msk.bf16.mxu1 %vm4007_vm5, %v7223_v35  ;;  %v8378_v35 = vld [vmem:[#allocation2 + $0x48] sm:$0xff]   ;;  %v10162_v61 = vrot.slane %v5635_v32, 5  ;;  %v5653_v2 = vshll.u32 %v5583_v26, 16 }
 0x338   : > { %8282 = vmatprep.subr.msk.bf16.mxu1 %vm4032_vm2, %v7254_v62  ;;  %v5650_v62 = vshrl.u32 %v5583_v26, 16 }
 0x339   : > { %v5642_v41 = vor.u32 %v5641_v49, %v10162_v61  ;;  %v5655_v58 = vrot.slane %v5653_v2, 5  ;;  %v5638_v0 = vsel %vm8556_vm3, %v5633_v18, %v10162_v61  ;;  %v5667_v61 = vrot.slane %v5666_v24, 4  ;;  %v5598_v24 = vld [vmem:[#allocation2 + $0x6c] sm:$0xf] }
 0x33a   : > { %v5652_v19 = vrot.slane %v5650_v62, 4  ;;  %v5592_v62 = vld [vmem:[#allocation2 + $0x54] sm:$0xf]  ;;  %v5671_v2 = vrot.slane %v5669_v1, 5 }
 0x33b   : > { %v5643_v16 = vrot.slane %v5642_v41, 4  ;;  %v5717_v41 = vshll.u32 %v10206_v39, 16 }
 0x33e   : > { %7844 = vmatmul.mubr.msk.bf16.gmra.mrb[12].mxu1 %vm4007_vm5, %v7224_v34  ;;  %v5645_v34 = vshll.u32 %v10166_v59, 16 }
 0x33f   : > { %7847 = vmatprep.mubr.msk.bf16.mxu1 %vm4007_vm5, %v7225_v23  ;;  %v5586_v23 = vld [vmem:[#allocation2 + $0x3c] sm:$0xf] }
 0x340   : > { %v5674_v10 = vshrl.u32 %v5586_v23, 16  ;;  %v5647_v17 = vrot.slane %v5645_v34, 5  ;;  %v5722_v34 = vshrl.u32 %v5592_v62, 16 }
 0x342   : > { %v5676_v30 = vrot.slane %v5674_v10, 4  ;;  %v5648_v32 = vsel %vm8556_vm3, %v5643_v16, %v5647_v17 }
 0x343   : > { %v7256_v51 = vcombine.low %v5638_v0, %v5648_v32  ;;  %v10233_v32 = vld [vmem:[#allocation2 + $0x70] sm:$0xf] }
 0x346   : > { %7848 = vmatmul.mubr.msk.bf16.gmra.mrb[16].mxu1 %vm4007_vm5, %v7226_v52  ;;  %v5677_v52 = vshll.u32 %v5586_v23, 16  ;;  %v5595_v23 = vld [vmem:[#allocation2 + $0x60] sm:$0xf] }
 0x347   : > { %7851 = vmatprep.mubr.msk.bf16.mxu1 %vm4007_vm5, %v7227_v55  ;;  %v10180_v55 = vld [vmem:[#allocation2 + $0x4c] sm:$0xf]  ;;  %v5746_v10 = vshrl.u32 %v5595_v23, 16 }
 0x348   : > { %v5707_v25 = vshll.u32 %v10180_v55, 16  ;;  %v5711_v40 = vshrl.u32 %v10180_v55, 16  ;;  %v5679_v36 = vrot.slane %v5677_v52, 5  ;;  %v5749_v52 = vshll.u32 %v5595_v23, 16 }
 0x349   : > { %v5748_v1 = vrot.slane %v5746_v10, 4 }
 0x34a   : > { %v10208_v45 = vrot.slane %v5707_v25, 5  ;;  %v5713_v49 = vrot.slane %v5711_v40, 4  ;;  %v5680_v6 = vor.u32 %v5679_v36, %v5676_v30  ;;  %v6098_v25 = vsel %vm4032_vm2, %v10146_v37, 0 }
 0x34b   : > { %v5751_v30 = vrot.slane %v5749_v52, 5 }
 0x34d   : > { %v5752_v63 = vor.u32 %v5751_v30, %v5748_v1  ;;  %v5996_v30 = vrot.slane %v10160_v13, 5 }
 0x34e   : > { %7852 = vmatmul.mubr.msk.bf16.gmra.mrb[20].mxu1 %vm4007_vm5, %v7228_v43  ;;  %v5656_v43 = vor.u32 %v5655_v58, %v5652_v19  ;;  %v5714_v19 = vor.u32 %v5713_v49, %v10208_v45  ;;  %v5725_v58 = vshll.u32 %v5592_v62, 16  ;;  %v5770_v62 = vshrl.u32 %v5598_v24, 16 }
 0x34f   : > { %7857 = vmatprep.mubr.msk.bf16.mxu1 %vm4007_vm5, %v8374_v5  ;;  %v5687_v5 = vshrl.u32 %v10176_v4, 16 }
 0x350   : > { %v5657_v57 = vrot.slane %v5656_v43, 4  ;;  %v5719_v43 = vrot.slane %v5717_v41, 5 }
 0x351   : > { %v5689_v42 = vrot.slane %v5687_v5, 4  ;;  %v5724_v5 = vrot.slane %v5722_v34, 4 }
 0x356   : > { %7858 = vmatmul.mubr.msk.bf16.vlgmr.msra.gmra.mrb[8].mxu1 %vm4007_vm5, %v8375_v47  ;;  %v5698_v47 = vshrl.u32 %v5589_v53, 16 }
 0x357   : > { %7874 = vmatpush3.bf16.msra.mxu1 %v5844_v7  ;;  %7861 = vmatprep.mubr.msk.bf16.mxu1 %vm4007_vm5, %v8376_v11  ;;  %v5701_v11 = vshll.u32 %v5589_v53, 16  ;;  %v5624_v7 = vsel %vm8556_vm3, %v5619_v15, %v5623_v9  ;;  %v5662_v15 = vsel %vm8556_vm3, %v5657_v57, %v10178_v56  ;;  %v5672_v9 = vsel %vm8556_vm3, %v5667_v61, %v5671_v2 }
 0x358   : > { %8283 = vmatprep.subr.msk.bf16.mxu1 %vm4032_vm2, %v10146_v37  ;;  %v5700_v28 = vrot.slane %v5698_v47, 4  ;;  %v5681_v53 = vrot.slane %v5680_v6, 4  ;;  %v5715_v47 = vrot.slane %v5714_v19, 4  ;;  %v7257_v40 = vcombine.low %v5662_v15, %v5672_v9  ;;  %v10246_v37 = vld [vmem:[%s10480_s5] sm:$0x3] }
 0x359   : > { %v5703_v26 = vrot.slane %v5701_v11, 5  ;;  %v10229_v11 = vld [vmem:[#allocation2 + $0x5c] sm:$0x1]  ;;  %v5773_v61 = vshll.u32 %v5598_v24, 16  ;;  %v5779_v2 = vshll.u32 %v10233_v32, 16  ;;  %v5783_v6 = vshrl.u32 %v10233_v32, 16 }
 0x35a   : > { %v5772_v19 = vrot.slane %v5770_v62, 4  ;;  %v5753_v15 = vrot.slane %v5752_v63, 4 }
 0x35b   : > { %v5704_v20 = vor.u32 %v5703_v26, %v5700_v28  ;;  %v10241_v28 = vld [vmem:[#allocation2 + $0x68] sm:$0x1] }
 0x35e   : > { %7862 = vmatmul.mubr.msk.bf16.gmra.mrb[12].mxu1 %vm4007_vm5, %v8377_v33  ;;  %v10204_v33 = vrot.slane %v5683_v44, 5  ;;  %v5705_v44 = vrot.slane %v5704_v20, 4 }
 0x35f   : > { %7865 = vmatprep.mubr.msk.bf16.mxu1 %vm4007_vm5, %v8378_v35  ;;  %v7255_v35 = vcombine.low %v5614_v3, %v5624_v7  ;;  %v5727_v3 = vrot.slane %v5725_v58, 5  ;;  %v5737_v7 = vrot.slane %v5735_v46, 4  ;;  %v5775_v58 = vrot.slane %v5773_v61, 5 }
 0x360   : > { %v5690_v22 = vor.u32 %v5689_v42, %v10204_v33  ;;  %v5741_v42 = vshll.u32 %v10229_v11, 16  ;;  %v5710_v26 = vsel %vm8556_vm3, %v5705_v44, %v10208_v45  ;;  %v5785_v46 = vrot.slane %v5783_v6, 4 }
 0x361   : > { %v6010_v6 = vrot.slane %v10182_v31, 5  ;;  %v5963_v31 = vld [vmem:[#allocation2 + $0x48] sm:$0xe] }
 0x362   : > { %v5691_v17 = vrot.slane %v5690_v22, 4  ;;  %v5765_v22 = vshll.u32 %v10241_v28, 16  ;;  %v5743_v23 = vrot.slane %v5741_v42, 5 }
 0x364   : > { %v5696_v57 = vsel %vm8556_vm3, %v5691_v17, %v5695_v48  ;;  %v10260_v48 = vld [vmem:[#allocation2 + $0x74] sm:$0x1] }
 0x365   : > { %v5789_v17 = vshll.u32 %v10260_v48, 16 }
 0x366   : > { %7866 = vmatmul.mubr.msk.bf16.gmra.mrb[16].mxu1 %vm4007_vm5, %v8379_v50  ;;  %v10215_v50 = vld [vmem:[#allocation2 + $0x64] sm:$0xf] }
 0x367   : > { %7869 = vmatprep.mubr.msk.bf16.mxu1 %vm4007_vm5, %v8380_v8  ;;  %v5731_v8 = vshll.u32 %v10211_v38, 16  ;;  %v5755_v18 = vshll.u32 %v10215_v50, 16  ;;  %v5759_v16 = vshrl.u32 %v10215_v50, 16 }
 0x369   : > { %v5733_v56 = vrot.slane %v5731_v8, 5  ;;  %v5757_v36 = vrot.slane %v5755_v18, 5  ;;  %v5761_v0 = vrot.slane %v5759_v16, 4  ;;  %v5781_v8 = vrot.slane %v5779_v2, 5 }
 0x36a   : > { %v5776_v18 = vor.u32 %v5775_v58, %v5772_v19  ;;  %v7298_v19 = vld [vmem:[%s8521_s10 + $0x1c] sm:$0xf] }
 0x36b   : > { %v5738_v49 = vor.u32 %v5737_v7, %v5733_v56  ;;  %v5786_v16 = vor.u32 %v5785_v46, %v5781_v8  ;;  %v5758_v44 = vsel %vm8556_vm3, %v5753_v15, %v5757_v36  ;;  %v7275_v46 = vrot.slane %v5963_v31, 9 }
 0x36c   : > { %v5777_v7 = vrot.slane %v5776_v18, 4  ;;  %v6028_v15 = vrot.slane %v10211_v38, 5 }
 0x36d   : > { %v5739_v34 = vrot.slane %v5738_v49, 4  ;;  %v6003_v49 = vrot.slane %v10166_v59, 5 }
 0x36e   : > { %7870 = vmatmul.mubr.msk.bf16.gmra.mrb[20].mxu1 %vm4007_vm5, %v8381_v21  ;;  %v5686_v21 = vsel %vm8556_vm3, %v5681_v53, %v10204_v33  ;;  %v5720_v33 = vsel %vm8556_vm3, %v5715_v47, %v5719_v43  ;;  %v5767_v53 = vrot.slane %v5765_v22, 5  ;;  %v5959_v47 = vld [vmem:[#allocation2 + $0x18] sm:$0xe] }
 0x36f   : > { %7875 = vmatprep.mubr.msk.bf16.mxu1 %vm4007_vm5, %v7255_v35  ;;  %v5728_v35 = vor.u32 %v5727_v3, %v5724_v5  ;;  %v7258_v45 = vcombine.low %v5686_v21, %v5696_v57  ;;  %v7259_v20 = vcombine.low %v5710_v26, %v5720_v33  ;;  %v5744_v52 = vsel %vm8556_vm3, %v5739_v34, %v5743_v23  ;;  %v5960_v21 = vld [vmem:[#allocation2 + $0x24] sm:$0xe]  ;;  %v5961_v26 = vld [vmem:[#allocation2 + $0x30] sm:$0xe] }
 0x370   : > { %v5993_v5 = vrot.slane %v10140_v12, 5  ;;  %v7271_v24 = vrot.slane %v5959_v47, 9  ;;  %v6007_v57 = vrot.slane %v10164_v54, 5  ;;  %v7273_v61 = vrot.slane %v5961_v26, 9  ;;  %v7303_v26 = vld [vmem:[%s8521_s10 + $0x30] sm:$0xf] }
 0x371   : > { %v5729_v41 = vrot.slane %v5728_v35, 4  ;;  %v6014_v54 = vrot.slane %v10176_v4, 5  ;;  %v6021_v4 = vrot.slane %v10180_v55, 5  ;;  %v6017_v23 = vrot.slane %v10202_v14, 5 }
 0x372   : > { %v5995_v1 = vrot.slane %v5993_v5, 4  ;;  %v5994_v42 = vsel %vm8657_vm7, %v7271_v24, %v5993_v5  ;;  %v6009_v2 = vrot.slane %v6007_v57, 4  ;;  %v6008_v59 = vsel %vm8657_vm7, %v7273_v61, %v6007_v57  ;;  %v7304_v61 = vld [vmem:[%s8521_s10 + $0x34] sm:$0xf] }
 0x373   : > { %v5734_v10 = vsel %vm8556_vm3, %v5729_v41, %v5733_v56  ;;  %v6016_v34 = vrot.slane %v6014_v54, 4  ;;  %v6509_v55 = vsel %vm656_vm0, %v10246_v37, 0  ;;  %v6030_v5 = vrot.slane %v6028_v15, 4 }
 0x374   : > { %v7260_v3 = vcombine.low %v5734_v10, %v5744_v52  ;;  %v5997_v13 = vsel %vm8657_vm7, %v5995_v1, %v5996_v30  ;;  %v5964_v10 = vld [vmem:[#allocation2 + $0x54] sm:$0xe]  ;;  %v6031_v47 = vrot.slane %v10229_v11, 5 }
 0x375   : > { %v7280_v62 = vcombine.low %v5994_v42, %v5997_v13  ;;  %v7276_v38 = vrot.slane %v5964_v10, 9 }
 0x376   : > { %7876 = vmatmul.mubr.msk.bf16.vlgmr.msra.gmra.mrb[8].mxu1 %vm4007_vm5, %v7256_v51  ;;  %v5762_v51 = vor.u32 %v5761_v0, %v5757_v36  ;;  %v6000_v0 = vrot.slane %v10148_v60, 5  ;;  %v5782_v36 = vsel %vm8556_vm3, %v5777_v7, %v5781_v8  ;;  %v7272_v60 = vrot.slane %v5960_v21, 9 }
 0x377   : > { %7892 = vmatpush3.bf16.msra.mxu1 %v6098_v25  ;;  %7879 = vmatprep.mubr.msk.bf16.mxu1 %vm4007_vm5, %v7257_v40  ;;  %v5787_v25 = vrot.slane %v5786_v16, 4  ;;  %v5791_v40 = vrot.slane %v5789_v17, 5  ;;  %v6270_v16 = vshll.u32 %v7298_v19, 16  ;;  %v6274_v17 = vshrl.u32 %v7298_v19, 16 }
 0x378   : > { %8284 = vmatprep.subr.msk.bf16.mxu1 %vm656_vm0, %v10246_v37  ;;  %v5763_v9 = vrot.slane %v5762_v51, 4  ;;  %v6002_v35 = vrot.slane %v6000_v0, 4  ;;  %v6001_v63 = vsel %vm8657_vm7, %v7272_v60, %v6000_v0  ;;  %v5962_v51 = vld [vmem:[#allocation2 + $0x3c] sm:$0xe]  ;;  %v7301_v37 = vld [vmem:[%s8521_s10 + $0x28] sm:$0xf]  ;;  %v6029_v42 = vsel %vm8657_vm7, %v7276_v38, %v6028_v15 }
 0x379   : > { %v5792_v12 = vsel %vm8556_vm3, %v5787_v25, %v5791_v40  ;;  %v7274_v41 = vrot.slane %v5962_v51, 9  ;;  %v6035_v7 = vrot.slane %v10215_v50, 5  ;;  %v10322_v24 = vrot.slane %v6270_v16, 5  ;;  %v7309_v38 = vld [vmem:[%s8521_s10 + $0x48] sm:$0xf] }
 0x37a   : > { %v5768_v43 = vsel %vm8556_vm3, %v5763_v9, %v5767_v53  ;;  %v7262_v33 = vcombine.low %v5782_v36, %v5792_v12  ;;  %v6004_v22 = vsel %vm8657_vm7, %v6002_v35, %v6003_v49  ;;  %v6023_v9 = vrot.slane %v6021_v4, 4  ;;  %v7299_v36 = vld [vmem:[%s8521_s10 + $0x20] sm:$0x1]  ;;  %v5966_v35 = vld [vmem:[#allocation2 + $0x6c] sm:$0xe] }
 0x37b   : > { %v7261_v56 = vcombine.low %v5758_v44, %v5768_v43  ;;  %v7281_v58 = vcombine.low %v6001_v63, %v6004_v22  ;;  %v6024_v53 = vrot.slane %v10206_v39, 5  ;;  %v6015_v14 = vsel %vm8657_vm7, %v7274_v41, %v6014_v54  ;;  %v7300_v43 = vld [vmem:[%s8521_s10 + $0x24] sm:$0xf]  ;;  %v7302_v54 = vld [vmem:[%s8521_s10 + $0x2c] sm:$0x1] }
 0x37c   : > { %v6018_v44 = vsel %vm8657_vm7, %v6016_v34, %v6017_v23  ;;  %v6022_v39 = vsel %vm8657_vm7, %v7275_v46, %v6021_v4  ;;  %v6276_v1 = vrot.slane %v6274_v17, 4  ;;  %v6285_v30 = vshrl.u32 %v7300_v43, 16  ;;  %v7307_v17 = vld [vmem:[%s8521_s10 + $0x40] sm:$0xf] }
 0x37d   : > { %v6288_v0 = vshll.u32 %v7300_v43, 16  ;;  %v7283_v11 = vcombine.low %v6015_v14, %v6018_v44  ;;  %v6294_v12 = vshll.u32 %v7301_v37, 16  ;;  %v6298_v21 = vshrl.u32 %v7301_v37, 16 }
 0x37e   : > { %7880 = vmatmul.mubr.msk.bf16.gmra.mrb[12].mxu1 %vm4007_vm5, %v7258_v45  ;;  %v6011_v45 = vsel %vm8657_vm7, %v6009_v2, %v6010_v6  ;;  %v6038_v50 = vrot.slane %v10241_v28, 5  ;;  %v6037_v60 = vrot.slane %v6035_v7, 4  ;;  %v6042_v49 = vrot.slane %v10233_v32, 5 }
 0x37f   : > { %7883 = vmatprep.mubr.msk.bf16.mxu1 %vm4007_vm5, %v7259_v20  ;;  %v7297_v20 = vld [vmem:[%s8521_s10 + $0x18] sm:$0xf]  ;;  %v7282_v8 = vcombine.low %v6008_v59, %v6011_v45  ;;  %v6277_v2 = vor.u32 %v6276_v1, %v10322_v24  ;;  %v6280_v6 = vshll.u32 %v7299_v36, 16  ;;  %v6287_v63 = vrot.slane %v6285_v30, 4 }
 0x380   : > { %v6261_v52 = vshrl.u32 %v7297_v20, 16  ;;  %v6264_v18 = vshll.u32 %v7297_v20, 16  ;;  %v6290_v51 = vrot.slane %v6288_v0, 5  ;;  %v10335_v22 = vrot.slane %v6294_v12, 5 }
 0x381   : > { %v6300_v59 = vrot.slane %v6298_v21, 4  ;;  %v6309_v28 = vshrl.u32 %v7303_v26, 16  ;;  %v6312_v45 = vshll.u32 %v7303_v26, 16  ;;  %v7278_v31 = vrot.slane %v5966_v35, 9  ;;  %v7308_v26 = vld [vmem:[%s8521_s10 + $0x44] sm:$0x1] }
 0x382   : > { %v6263_v25 = vrot.slane %v6261_v52, 4  ;;  %v6266_v40 = vrot.slane %v6264_v18, 5  ;;  %v6045_v4 = vrot.slane %v10260_v48, 5  ;;  %v6318_v32 = vshll.u32 %v7304_v61, 16  ;;  %v7306_v48 = vld [vmem:[%s8521_s10 + $0x3c] sm:$0xf] }
 0x383   : > { %v6322_v20 = vshrl.u32 %v7304_v61, 16  ;;  %v6039_v34 = vsel %vm8657_vm7, %v6037_v60, %v6038_v50  ;;  %v6044_v23 = vrot.slane %v6042_v49, 4  ;;  %v6304_v19 = vshll.u32 %v7302_v54, 16  ;;  %v7311_v61 = vld [vmem:[%s8521_s10 + $0x50] sm:$0x1] }
 0x384   : > { %v6282_v46 = vrot.slane %v6280_v6, 5  ;;  %v6291_v15 = vor.u32 %v6290_v51, %v6287_v63  ;;  %v6314_v10 = vrot.slane %v6312_v45, 5  ;;  %v6043_v18 = vsel %vm8657_vm7, %v7278_v31, %v6042_v49  ;;  %v7313_v45 = vld [vmem:[%s8521_s10 + $0x58] sm:$0xf] }
 0x385   : > { %v6324_v16 = vrot.slane %v6322_v20, 4  ;;  %v6046_v44 = vsel %vm8657_vm7, %v6044_v23, %v6045_v4  ;;  %v6333_v43 = vshrl.u32 %v7306_v48, 16  ;;  %v6342_v1 = vshll.u32 %v7307_v17, 16  ;;  %v7316_v23 = vld [vmem:[%s8521_s10 + $0x64] sm:$0xf] }
 0x386   : > { %7884 = vmatmul.mubr.msk.bf16.gmra.mrb[16].mxu1 %vm4007_vm5, %v7260_v3  ;;  %v6025_v3 = vsel %vm8657_vm7, %v6023_v9, %v6024_v53  ;;  %v6301_v9 = vor.u32 %v6300_v59, %v10335_v22  ;;  %v6311_v53 = vrot.slane %v6309_v28, 4  ;;  %v6346_v29 = vshrl.u32 %v7307_v17, 16 }
 0x387   : > { %7887 = vmatprep.mubr.msk.bf16.mxu1 %vm4007_vm5, %v7261_v56  ;;  %v5965_v56 = vld [vmem:[#allocation2 + $0x60] sm:$0xe]  ;;  %v7284_v57 = vcombine.low %v6022_v39, %v6025_v3  ;;  %v6336_v39 = vshll.u32 %v7306_v48, 16  ;;  %v6292_v3 = vrot.slane %v6291_v15, 4  ;;  %v6357_v30 = vshrl.u32 %v7309_v38, 16 }
 0x388   : > { %v7277_v13 = vrot.slane %v5965_v56, 9  ;;  %v6306_v56 = vrot.slane %v6304_v19, 5  ;;  %v6360_v0 = vshll.u32 %v7309_v38, 16  ;;  %v6335_v21 = vrot.slane %v6333_v43, 4 }
 0x389   : > { %v6297_v50 = vsel %vm8556_vm3, %v6292_v3, %v10335_v22  ;;  %v10370_v35 = vrot.slane %v6342_v1, 5  ;;  %v6348_v49 = vrot.slane %v6346_v29, 4  ;;  %v6352_v28 = vshll.u32 %v7308_v26, 16  ;;  %v7318_v3 = vld [vmem:[%s8521_s10 + $0x6c] sm:$0xf] }
 0x38a   : > { %v6036_v41 = vsel %vm8657_vm7, %v7277_v13, %v6035_v7  ;;  %v7305_v7 = vld [vmem:[%s8521_s10 + $0x38] sm:$0x1]  ;;  %v6362_v6 = vrot.slane %v6360_v0, 5  ;;  %v6376_v20 = vshll.u32 %v7311_v61, 16  ;;  %v7319_v1 = vld [vmem:[%s8521_s10 + $0x70] sm:$0xf] }
 0x38b   : > { %v7286_v14 = vcombine.low %v6036_v41, %v6039_v34  ;;  %v6328_v12 = vshll.u32 %v7305_v7, 16  ;;  %v7315_v34 = vld [vmem:[%s8521_s10 + $0x60] sm:$0xf] }
 0x38d   : > { %v6330_v22 = vrot.slane %v6328_v12, 5 }
 0x38e   : > { %7888 = vmatmul.mubr.msk.bf16.gmra.mrb[20].mxu1 %vm4007_vm5, %v7262_v33  ;;  %v6032_v33 = vsel %vm8657_vm7, %v6030_v5, %v6031_v47  ;;  %v7310_v5 = vld [vmem:[%s8521_s10 + $0x4c] sm:$0xf] }
 0x38f   : > { %7893 = vmatprep.mubr.msk.bf16.mxu1 %vm4007_vm5, %v7280_v62  ;;  %v6267_v62 = vor.u32 %v6266_v40, %v6263_v25  ;;  %v7285_v52 = vcombine.low %v6029_v42, %v6032_v33  ;;  %v6302_v25 = vrot.slane %v6301_v9, 4  ;;  %v6315_v40 = vor.u32 %v6314_v10, %v6311_v53 }
 0x390   : > { %v6370_v36 = vshrl.u32 %v7310_v5, 16  ;;  %v7287_v42 = vcombine.low %v6043_v18, %v6046_v44  ;;  %v6354_v53 = vrot.slane %v6352_v28, 5  ;;  %v6405_v10 = vshrl.u32 %v7315_v34, 16 }
 0x391   : > { %v6307_v33 = vsel %vm8556_vm3, %v6302_v25, %v6306_v56  ;;  %v6316_v60 = vrot.slane %v6315_v40, 4  ;;  %v6414_v18 = vshll.u32 %v7316_v23, 16 }
 0x392   : > { %v6372_v63 = vrot.slane %v6370_v36, 4  ;;  %v7323_v4 = vcombine.low %v6297_v50, %v6307_v33  ;;  %v6407_v56 = vrot.slane %v6405_v10, 4  ;;  %v6442_v50 = vshrl.u32 %v7319_v1, 16  ;;  %v7296_v10 = vld [vmem:[%s10479_s4] ss:$0 sm:$0xff] }
 0x393   : > { %v6416_v25 = vrot.slane %v6414_v18, 5 }
 0x396   : > { %7894 = vmatmul.mubr.msk.bf16.vlgmr.msra.gmra.mrb[8].mxu1 %vm4007_vm5, %v7281_v58  ;;  %v6268_v58 = vrot.slane %v6267_v62, 4  ;;  %v7312_v62 = vld [vmem:[%s8521_s10 + $0x54] sm:$0xf] }
 0x397   : > { %7910 = vmatpush3.bf16.msra.mxu1 %v6509_v55  ;;  %7897 = vmatprep.mubr.msk.bf16.mxu1 %vm4007_vm5, %v7282_v8  ;;  %v6278_v8 = vrot.slane %v6277_v2, 4  ;;  %v10348_v55 = vrot.slane %v6318_v32, 5  ;;  %v6359_v2 = vrot.slane %v6357_v30, 4  ;;  %v6381_v31 = vshrl.u32 %v7312_v62, 16 }
 0x398   : > { %v6273_v47 = vsel %vm8556_vm3, %v6268_v58, %v10322_v24  ;;  %v6349_v32 = vor.u32 %v6348_v49, %v10370_v35  ;;  %v6384_v41 = vshll.u32 %v7312_v62, 16 }
 0x399   : > { %v6283_v37 = vsel %vm8556_vm3, %v6278_v8, %v6282_v46  ;;  %v6325_v24 = vor.u32 %v6324_v16, %v10348_v55  ;;  %v6363_v19 = vor.u32 %v6362_v6, %v6359_v2  ;;  %v6390_v8 = vshll.u32 %v7313_v45, 16 }
 0x39a   : > { %v7322_v13 = vcombine.low %v6273_v47, %v6283_v37  ;;  %v6394_v46 = vshrl.u32 %v7313_v45, 16  ;;  %v6321_v15 = vsel %vm8556_vm3, %v6316_v60, %v10348_v55  ;;  %v6418_v16 = vshrl.u32 %v7316_v23, 16  ;;  %v7314_v37 = vld [vmem:[%s8521_s10 + $0x5c] sm:$0x1]  ;;  %v7320_v45 = vld [vmem:[%s8521_s10 + $0x74] sm:$0x1] }
 0x39b   : > { %v6326_v51 = vrot.slane %v6325_v24, 4  ;;  %v6350_v17 = vrot.slane %v6349_v32, 4  ;;  %v6383_v44 = vrot.slane %v6381_v31, 4  ;;  %v6386_v43 = vrot.slane %v6384_v41, 5 }
 0x39c   : > { %v6392_v55 = vrot.slane %v6390_v8, 5  ;;  %v6420_v40 = vrot.slane %v6418_v16, 4  ;;  %v6448_v41 = vshll.u32 %v7320_v45, 16 }
 0x39d   : > { %v6331_v48 = vsel %vm8556_vm3, %v6326_v51, %v6330_v22  ;;  %v6355_v30 = vsel %vm8556_vm3, %v6350_v17, %v6354_v53  ;;  %v6387_v0 = vor.u32 %v6386_v43, %v6383_v44  ;;  %v6444_v51 = vrot.slane %v6442_v50, 4 }
 0x39e   : > { %7898 = vmatmul.mubr.msk.bf16.gmra.mrb[12].mxu1 %vm4007_vm5, %v7283_v11  ;;  %v6366_v11 = vshll.u32 %v7310_v5, 16  ;;  %v6396_v5 = vrot.slane %v6394_v46, 4  ;;  %v7324_v47 = vcombine.low %v6321_v15, %v6331_v48  ;;  %v6421_v33 = vor.u32 %v6420_v40, %v6416_v25 }
 0x39f   : > { %7901 = vmatprep.mubr.msk.bf16.mxu1 %vm4007_vm5, %v7284_v57  ;;  %v6338_v57 = vrot.slane %v6336_v39, 5  ;;  %v6364_v39 = vrot.slane %v6363_v19, 4  ;;  %v6388_v62 = vrot.slane %v6387_v0, 4  ;;  %v6450_v15 = vrot.slane %v6448_v41, 5 }
 0x3a0   : > { %v10374_v54 = vrot.slane %v6366_v11, 5  ;;  %v7317_v11 = vld [vmem:[%s8521_s10 + $0x68] sm:$0x1]  ;;  %v6397_v12 = vor.u32 %v6396_v5, %v6392_v55 }
 0x3a1   : > { %v6339_v59 = vor.u32 %v6338_v57, %v6335_v21  ;;  %v6400_v21 = vshll.u32 %v7314_v37, 16  ;;  %v6429_v57 = vshrl.u32 %v7318_v3, 16  ;;  %v6424_v60 = vshll.u32 %v7317_v11, 16 }
 0x3a2   : > { %v6373_v58 = vor.u32 %v6372_v63, %v10374_v54  ;;  %v6369_v36 = vsel %vm8556_vm3, %v6364_v39, %v10374_v54  ;;  %v6398_v61 = vrot.slane %v6397_v12, 4  ;;  %v6393_v31 = vsel %vm8556_vm3, %v6388_v62, %v6392_v55 }
 0x3a3   : > { %v6340_v9 = vrot.slane %v6339_v59, 4  ;;  %v6402_v2 = vrot.slane %v6400_v21, 5  ;;  %v6431_v6 = vrot.slane %v6429_v57, 4  ;;  %v6422_v59 = vrot.slane %v6421_v33, 4 }
 0x3a4   : > { %v6374_v38 = vrot.slane %v6373_v58, 4  ;;  %v6426_v28 = vrot.slane %v6424_v60, 5 }
 0x3a5   : > { %v6345_v29 = vsel %vm8556_vm3, %v6340_v9, %v10370_v35 }
 0x3a6   : > { %7902 = vmatmul.mubr.msk.bf16.gmra.mrb[16].mxu1 %vm4007_vm5, %v7285_v52  ;;  %v6408_v52 = vshll.u32 %v7315_v34, 16  ;;  %v7325_v35 = vcombine.low %v6345_v29, %v6355_v30  ;;  %v6427_v23 = vsel %vm8556_vm3, %v6422_v59, %v6426_v28 }
 0x3a7   : > { %7905 = vmatprep.mubr.msk.bf16.mxu1 %vm4007_vm5, %v7286_v14  ;;  %v6378_v14 = vrot.slane %v6376_v20, 5 }
 0x3a8   : > { %v6410_v7 = vrot.slane %v6408_v52, 5  ;;  %v7321_v52 = vld [vmem:[%s10481_s6] ss:$0 sm:$0xff] }
 0x3a9   : > { %v6379_v24 = vsel %vm8556_vm3, %v6374_v38, %v6378_v14  ;;  %v7943_v18 = vadd.f32 %v7321_v52, %v7296_v10 }
 0x3aa   : > { %v6411_v26 = vor.u32 %v6410_v7, %v6407_v56  ;;  %v7326_v49 = vcombine.low %v6369_v36, %v6379_v24 }
 0x3ac   : > { %v6412_v22 = vrot.slane %v6411_v26, 4 }
 0x3ae   : > { %7906 = vmatmul.mubr.msk.bf16.gmra.mrb[20].mxu1 %vm4007_vm5, %v7287_v42  ;;  %v6432_v42 = vshll.u32 %v7318_v3, 16  ;;  %v6417_v34 = vsel %vm8556_vm3, %v6412_v22, %v6416_v25 }
 0x3af   : > { %7911 = vmatprep.mubr.msk.bf16.mxu1 %vm625_vm4, %v7322_v13  ;;  %v6438_v13 = vshll.u32 %v7319_v1, 16  ;;  %v7328_v58 = vcombine.low %v6417_v34, %v6427_v23 }
 0x3b0   : > { %v6434_v54 = vrot.slane %v6432_v42, 5 }
 0x3b1   : > { %v6440_v63 = vrot.slane %v6438_v13, 5 }
 0x3b2   : > { %v6435_v32 = vor.u32 %v6434_v54, %v6431_v6 }
 0x3b3   : > { %v6445_v20 = vor.u32 %v6444_v51, %v6440_v63 }
 0x3b4   : > { %v6436_v8 = vrot.slane %v6435_v32, 4 }
 0x3b5   : > { %v6446_v46 = vrot.slane %v6445_v20, 4 }
 0x3b6   : > { %7912 = vmatmul.mubr.msk.bf16.vlgmr.msra.gmra.mrb[8].mxu1 %vm625_vm4, %v7323_v4  ;;  %v6403_v4 = vsel %vm8556_vm3, %v6398_v61, %v6402_v2  ;;  %v6441_v48 = vsel %vm8556_vm3, %v6436_v8, %v6440_v63 }
 0x3b7   : > { %7915 = vmatprep.mubr.msk.bf16.mxu1 %vm625_vm4, %v7324_v47  ;;  %v7327_v19 = vcombine.low %v6393_v31, %v6403_v4  ;;  %v6451_v9 = vsel %vm8556_vm3, %v6446_v46, %v6450_v15 }
 0x3b8   : > { %v7329_v53 = vcombine.low %v6441_v48, %v6451_v9 }
 0x3be   : > { %7916 = vmatmul.mubr.msk.bf16.gmra.mrb[12].mxu1 %vm625_vm4, %v7325_v35 }
 0x3bf   : > { %7919 = vmatprep.mubr.msk.bf16.mxu1 %vm625_vm4, %v7326_v49 }
 0x3c6   : > { %7920 = vmatmul.mubr.msk.bf16.gmra.mrb[16].mxu1 %vm625_vm4, %v7327_v19 }
 0x3c7   : > { %7923 = vmatprep.mubr.msk.bf16.mxu1 %vm625_vm4, %v7328_v58 }
 0x3ce   : > { %7924 = vmatmul.mubr.msk.bf16.gmra.mrb[20].mxu1 %vm625_vm4, %v7329_v53 }
 0x489   : > { %v7913_v16 = vpop.f32.mrb[8].mxu1 }
 0x48a   : > { %v7937_v17 = vadd.f32 %v7913_v16, %v7296_v10  ;;  %v6545_v27 = vpop.f32.mrb[9].mxu1 }
 0x48b   : > { %v7939_v14 = vadd.f32 %v7296_v10, %v6545_v27  ;;  %v7914_v44 = vpop.f32.mrb[10].mxu1 }
 0x48c   : > { %v7938_v43 = vadd.f32 %v7937_v17, %v7321_v52  ;;  %v7942_v39 = vadd.f32 %v7943_v18, %v7914_v44  ;;  %v6548_v38 = vpop.f32.mrb[11].mxu1 }
 0x48d   : > { %v7940_v55 = vadd.f32 %v7939_v14, %v7321_v52  ;;  %v7944_v5 = vadd.f32 %v7943_v18, %v6548_v38 }
 0x48e   : > { %v6626_v47 = vmax.f32 %v7938_v43, 0.0  ;;  %v6627_v37 = vmax.f32 %v7942_v39, 0.0 }
 0x48f   : > { %v6624_v3 = vmax.f32 %v7940_v55, 0.0  ;;  %v6625_v56 = vmax.f32 %v7944_v5, 0.0 }
 0x490   : > { %6642 = vst.msk [vmem:[%s8516_s21 + $0x10] sm:$0xff] %vm4007_vm5, %v6626_v47  ;;  %6643 = vst.msk [vmem:[%s8516_s21 + $0x18] sm:$0xff] %vm4007_vm5, %v6627_v37 }
 0x491   : > { %6640 = vst.msk [vmem:[%s8516_s21] sm:$0xff] %vm4007_vm5, %v6624_v3  ;;  %6641 = vst.msk [vmem:[%s8516_s21 + $0x8] sm:$0xff] %vm4007_vm5, %v6625_v56  ;;  %v7917_v7 = vpop.f32.mrb[12].mxu1 }
 0x492   : > { %v7946_v25 = vadd.f32 %v7943_v18, %v7917_v7  ;;  %v6561_v40 = vpop.f32.mrb[13].mxu1 }
 0x493   : > { %v7948_v1 = vadd.f32 %v7943_v18, %v6561_v40  ;;  %v7918_v29 = vpop.f32.mrb[14].mxu1 }
 0x494   : > { %v6630_v30 = vmax.f32 %v7946_v25, 0.0  ;;  %v7950_v0 = vadd.f32 %v7943_v18, %v7918_v29  ;;  %v6564_v11 = vpop.f32.mrb[15].mxu1 }
 0x495   : > { %v6628_v36 = vmax.f32 %v7948_v1, 0.0  ;;  %v7952_v24 = vadd.f32 %v7943_v18, %v6564_v11 }
 0x496   : > { %6646 = vst.msk [vmem:[%s8516_s21 + $0x30] sm:$0xff] %vm4007_vm5, %v6630_v30  ;;  %v6631_v12 = vmax.f32 %v7950_v0, 0.0 }
 0x497   : > { %6644 = vst.msk [vmem:[%s8516_s21 + $0x20] sm:$0xff] %vm4007_vm5, %v6628_v36  ;;  %v6629_v21 = vmax.f32 %v7952_v24, 0.0 }
 0x498   : > { %6647 = vst.msk [vmem:[%s8516_s21 + $0x38] sm:$0xff] %vm4007_vm5, %v6631_v12 }
 0x499   : > { %6645 = vst.msk [vmem:[%s8516_s21 + $0x28] sm:$0xff] %vm4007_vm5, %v6629_v21  ;;  %v7921_v57 = vpop.f32.mrb[16].mxu1 }
 0x49a   : > { %v7954_v42 = vadd.f32 %v7943_v18, %v7921_v57  ;;  %v6577_v13 = vpop.f32.mrb[17].mxu1 }
 0x49b   : > { %v7956_v50 = vadd.f32 %v7943_v18, %v6577_v13  ;;  %v7922_v26 = vpop.f32.mrb[18].mxu1 }
 0x49c   : > { %v6634_v33 = vmax.f32 %v7954_v42, 0.0  ;;  %v7958_v60 = vadd.f32 %v7943_v18, %v7922_v26  ;;  %v6580_v35 = vpop.f32.mrb[19].mxu1 }
 0x49d   : > { %v6632_v49 = vmax.f32 %v7956_v50, 0.0  ;;  %v7960_v62 = vadd.f32 %v7943_v18, %v6580_v35 }
 0x49e   : > { %6650 = vst.msk [vmem:[%s8516_s21 + $0x50] sm:$0xff] %vm4007_vm5, %v6634_v33  ;;  %v6635_v61 = vmax.f32 %v7958_v60, 0.0 }
 0x49f   : > { %6648 = vst.msk [vmem:[%s8516_s21 + $0x40] sm:$0xff] %vm4007_vm5, %v6632_v49  ;;  %v6633_v2 = vmax.f32 %v7960_v62, 0.0 }
 0x4a0   : > { %6651 = vst.msk [vmem:[%s8516_s21 + $0x58] sm:$0xff] %vm4007_vm5, %v6635_v61 }
 0x4a1   : > { %6649 = vst.msk [vmem:[%s8516_s21 + $0x48] sm:$0xff] %vm4007_vm5, %v6633_v2  ;;  %v7925_v6 = vpop.f32.mrb[20].mxu1 }
 0x4a2   : > { %v7962_v54 = vadd.f32 %v7943_v18, %v7925_v6  ;;  %v6593_v63 = vpop.f32.mrb[21].mxu1 }
 0x4a3   : > { %v7964_v51 = vadd.f32 %v7943_v18, %v6593_v63  ;;  %v7926_v22 = vpop.f32.mrb[22].mxu1 }
 0x4a4   : > { %v6638_v59 = vmax.f32 %v7962_v54, 0.0  ;;  %v7966_v28 = vadd.f32 %v7943_v18, %v7926_v22  ;;  %v6596_v45 = vpop.f32.mrb[23].mxu1 }
 0x4a5   : > { %v6636_v31 = vmax.f32 %v7964_v51, 0.0  ;;  %v7968_v4 = vadd.f32 %v7943_v18, %v6596_v45 }
 0x4a6   : > { %6654 = vst.msk [vmem:[%s8516_s21 + $0x70] sm:$0xff] %vm4007_vm5, %v6638_v59  ;;  %v6639_v32 = vmax.f32 %v7966_v28, 0.0 }
 0x4a7   : > { %6652 = vst.msk [vmem:[%s8516_s21 + $0x60] sm:$0xff] %vm4007_vm5, %v6636_v31  ;;  %v6637_v20 = vmax.f32 %v7968_v4, 0.0 }
 0x4a8   : > { %6655 = vst.msk [vmem:[%s8516_s21 + $0x78] sm:$0xff] %vm4007_vm5, %v6639_v32 }
 0x4a9   : > { %6653 = vst.msk [vmem:[%s8516_s21 + $0x68] sm:$0xff] %vm4007_vm5, %v6637_v20 }
 0x4aa PF: > { %s17_s28 = sadd.s32 1, %s8420_s28   ;;  %s10501_s24 = smov %s8412_s26 }
 0x4ab   : > { %p14_p10 = scmp.ge.s32.totalorder %s17_s28, 6   ;;  %s10502_s25 = smov %s8416_s27 }
 0x4ac   : > { %s10503_s26 = smov %s10506_s29  ;;  %s10504_s27 = smov %s10510_s30 }
 0x4ad   :  { %16 = sbr.rel (!%p14_p10) target bundleno = 3 (0x3), region = 107 }

</bundles_post_ra>
